<compile_context>
chip_gen: v7x
topology: tpu7x:2x2x1
jax: 0.10.0
libtpu: 0.0.40
codegen_flags: <defaults>
</compile_context>

<pallas_src>
import jax
import jax.numpy as jnp
from jax import lax
from jax.experimental import pallas as pl
from jax.experimental.pallas import tpu as pltpu


def linear_kernel(x_ref, w_ref, b_ref, o_ref):
    # x_ref: (M, K) resident; w_ref: (K, tn) streamed; b_ref: (1, tn); o_ref: (M, tn).
    # Contract x's K axis (1) with w's K axis (0): no transpose materialized anywhere.
    y = lax.dot_general(
        x_ref[...],
        w_ref[...],
        dimension_numbers=(((1,), (0,)), ((), ())),
        preferred_element_type=jnp.float32,
        precision=lax.Precision.DEFAULT,  # explicit; use HIGHEST for exact f32 parity
    )
    o_ref[...] = (y + b_ref[...]).astype(o_ref.dtype)


def linear_pallas(x, w_kn, bias, *, tn=None):
    """y[b, s, n] = sum_k x[b, s, k] * w_kn[k, n] + bias[n].

    x:    [B, S, K]  activations
    w_kn: [K, N]     nn.Linear weight stored in [in_features, out_features] layout
                     (i.e. torch_weight.T, converted once at parameter-load time)
    bias: [N]
    """
    B, S, K = x.shape
    K_w, N = w_kn.shape
    assert K == K_w, (K, K_w)
    M = B * S
    assert M % 8 == 0, M  # sublane alignment for the single M block

    x2d = x.reshape(M, K)
    b2d = bias.reshape(1, N)  # 2-D so it maps onto the lane axis cleanly

    if tn is None:
        # Two N blocks: streams W's DMA under compute on 1-TC chips (v5e/v6e) and shards
        # W across both TensorCores on v7x; 384 lanes keeps output stores unmasked.
        if N % 2 == 0 and (N // 2) % 128 == 0:
            tn = N // 2
        else:
            tn = N
    assert N % tn == 0 and tn % 128 == 0, (N, tn)
    grid = (N // tn,)

    itemsize = jnp.dtype(x.dtype).itemsize
    cost = pl.CostEstimate(
        flops=2 * M * N * K,
        transcendentals=0,
        bytes_accessed=(M * K + K * N + N + M * N) * itemsize,
    )

    out = pl.pallas_call(
        linear_kernel,
        out_shape=jax.ShapeDtypeStruct((M, N), x.dtype),
        grid_spec=pltpu.PrefetchScalarGridSpec(
            num_scalar_prefetch=0,
            grid=grid,
            in_specs=[
                pl.BlockSpec((M, K), lambda j: (0, 0)),    # x: resident (fetched once)
                pl.BlockSpec((K, tn), lambda j: (0, j)),   # W: streamed over N
                pl.BlockSpec((1, tn), lambda j: (0, j)),   # bias: streamed over N
            ],
            out_specs=pl.BlockSpec((M, tn), lambda j: (0, j)),
        ),
        compiler_params=pltpu.CompilerParams(
            dimension_semantics=("parallel",),  # independent N blocks -> megacore split
        ),
        cost_estimate=cost,
    )(x2d, w_kn, b2d)

    return out.reshape(B, S, N)


if __name__ == "__main__":
    key = jax.random.PRNGKey(0)
    k_x, k_w, k_b = jax.random.split(key, 3)

    # Shapes implied by the module: x [1, 384, 768], Linear(768 -> 768, bias=True).
    B, S, K, N = 1, 384, 768, 768

    x = jax.random.normal(k_x, (B, S, K), dtype=jnp.float32)
    bound = 1.0 / (K ** 0.5)
    # PyTorch-layout parameter [out_features, in_features].
    weight = jax.random.uniform(
        k_w, (N, K), minval=-bound, maxval=bound, dtype=jnp.float32
    )
    bias = jax.random.uniform(
        k_b, (N,), minval=-bound, maxval=bound, dtype=jnp.float32
    )

    # One-time parameter layout conversion to [in_features, out_features]
    # (done at load time, not per forward call).
    w_kn = jnp.asarray(weight.T)

    y = linear_pallas(x, w_kn, bias)
    y = jax.block_until_ready(y)

    # Correctness check against plain-JAX reference of the PyTorch forward.
    y_ref = x @ weight.T + bias
    assert y.shape == (B, S, N)
    assert jnp.allclose(y, y_ref, atol=1e-4, rtol=1e-4)

    print("KERNEL_OK")
</pallas_src>

<mosaic_0001>
module attributes {stable_mosaic.version = 11 : i64} {
  func.func @linear_kernel(%arg0: i32, %arg1: memref<384x768xf32, #tpu.memory_space<vmem>>, %arg2: memref<768x384xf32, #tpu.memory_space<vmem>>, %arg3: memref<1x384xf32, #tpu.memory_space<vmem>>, %arg4: memref<384x384xf32, #tpu.memory_space<vmem>>) attributes {dimension_semantics = [#tpu.dimension_semantics<parallel>], iteration_bounds = array<i64: 2>, scalar_prefetch = 0 : i64, scratch_operands = 0 : i64, tpu.core_type = #tpu.core_type<tc>, window_params = [{pipeline_mode = #tpu.pipeline_mode<synchronous>, transform_indices = @transform_0, window_bounds = array<i64: 384, 768>}, {transform_indices = @transform_1, window_bounds = array<i64: 768, 384>}, {transform_indices = @transform_2, window_bounds = array<i64: 1, 384>}, {transform_indices = @transform_3, window_bounds = array<i64: 384, 384>}]} {
    %c0 = arith.constant 0 : index
    %c0_0 = arith.constant 0 : index
    %0 = vector.load %arg1[%c0, %c0_0] : memref<384x768xf32, #tpu.memory_space<vmem>>, vector<384x768xf32>
    %c0_1 = arith.constant 0 : index
    %c0_2 = arith.constant 0 : index
    %1 = vector.load %arg2[%c0_1, %c0_2] : memref<768x384xf32, #tpu.memory_space<vmem>>, vector<768x384xf32>
    %cst = arith.constant dense<0.000000e+00> : vector<384x384xf32>
    %2 = tpu.matmul %0, %1, %cst {dimension_numbers = #tpu.dot_dimension_numbers<[1], [0], [0], [1], [0, 0, 1, 1], [], []>} : vector<384x768xf32>, vector<768x384xf32>, vector<384x384xf32> -> vector<384x384xf32>
    %c0_3 = arith.constant 0 : index
    %c0_4 = arith.constant 0 : index
    %3 = vector.load %arg3[%c0_3, %c0_4] : memref<1x384xf32, #tpu.memory_space<vmem>>, vector<1x384xf32>
    %4 = vector.broadcast %3 : vector<1x384xf32> to vector<384x384xf32>
    %5 = arith.addf %2, %4 : vector<384x384xf32>
    %c0_5 = arith.constant 0 : index
    %c0_6 = arith.constant 0 : index
    %6 = vector.load %arg4[%c0_5, %c0_6] : memref<384x384xf32, #tpu.memory_space<vmem>>, vector<384x384xf32>
    tpu.vector_store %arg4[%c0_5, %c0_6], %5 {strides = array<i32>} : memref<384x384xf32, #tpu.memory_space<vmem>>, vector<384x384xf32>,
    return
  }
  func.func @transform_0(%arg0: i32) -> (i32, i32) {
    %c0_i32 = arith.constant 0 : i32
    %c0_i32_0 = arith.constant 0 : i32
    %c0_i32_1 = arith.constant 0 : i32
    return %c0_i32, %c0_i32_0 : i32, i32
  }
  func.func @transform_1(%arg0: i32) -> (i32, i32) {
    %c0_i32 = arith.constant 0 : i32
    %c0_i32_0 = arith.constant 0 : i32
    return %c0_i32, %arg0 : i32, i32
  }
  func.func @transform_2(%arg0: i32) -> (i32, i32) {
    %c0_i32 = arith.constant 0 : i32
    %c0_i32_0 = arith.constant 0 : i32
    return %c0_i32, %arg0 : i32, i32
  }
  func.func @transform_3(%arg0: i32) -> (i32, i32) {
    %c0_i32 = arith.constant 0 : i32
    %c0_i32_0 = arith.constant 0 : i32
    return %c0_i32, %arg0 : i32, i32
  }
}

</mosaic_0001>

<bundles_post_ra>
// kernel: tpu_custom_call.1
= control target key start
LH: loop header
LB: loop body
LE: loop exit
PB: predicated region body
PF: predicated region fallthrough
CT: control target
= control target key end

     0   :  { %8 = vsyncpa [#allocation3], 0  ;;  %s5099_s0 = inlined_call_operand.hbm [shape: f32[384,768], index: 0, kind: input, shape index: {}]   ;;  %s5100_s1 = inlined_call_operand.hbm [shape: f32[768,768], index: 1, kind: input, shape index: {}]   ;;  %s5101_s2 = inlined_call_operand.hbm [shape: f32[1,768], index: 2, kind: input, shape index: {}]   ;;  %s5102_s3 = inlined_call_operand.hbm [shape: f32[384,768], index: 3, kind: output, shape index: {}]  }
   0x1   :  { %9 = vsyncpa [#allocation6], 0 }
   0x2   :  { %11 = vsyncpa [#allocation6 + $0x1], 0 }
   0x3   :  { %12 = vsyncpa [#allocation4], 0 }
   0x4   :  { %14 = vsyncpa [#allocation4 + $0x1], 0  ;;  %s4217_s12 = smov 0   ;;  %s4219_s13 = smov 0  }
   0x5   :  { %s4221_s14 = smov 0   ;;  %s4223_s15 = smov 0  }
   0x6 LB: > { %s4238_s16 = sadd.s32 1, %s4183_s15   ;;  %s48_s17 = sadd.s32 1, %s4179_s14  ;;  %s4183_s15 = sphi %s4223_s15, %s5131_s15   ;;  %s4179_s14 = sphi %s4221_s14, %s5130_s14   ;;  %s4175_s13 = sphi %s4219_s13, %s5129_s13   ;;  %s4171_s12 = sphi %s4217_s12, %s5128_s12  }
   0x7   : > { %s45_s18 = ssub.s32 %s4183_s15, %s4238_s16  ;;  %p55_p0 = scmp.ne.s32.totalorder %s4179_s14, %s4175_s13 }
   0x8   : > { %p46_p1 = scmp.eq.s32.totalorder %s45_s18, 0  ;;  %p56_p2 = scmp.eq.s32.totalorder %s4183_s15, 0 }
   0x9   : > { %p3981_p5 = scmp.lt.s32.totalorder %s4183_s15, 2  ;;  %s150_s20 = sand.u32 1, %s4183_s15  }
   0xa   : > { %s4248_s19 = scalar_select %p46_p1, %s4179_s14, %s48_s17  }
   0xb   : > { %p57_p4 = por %p56_p2, %p55_p0  ;;  %s152_s21 = sand.u32 1, %s4179_s14  }
   0xc   : > { %s3950_s22 = smul.u32 2304, %s152_s21  ;;  %s4270_s30 = scalar_lea.sflag [#allocation6], %s150_s20 }
   0xd   : > { %s3083_s23 = smul.u32 384, %s4183_s15  ;;  %p4259_p6 = pnand %p3981_p5, %p57_p4 }
   0xe   : > { %s154_s28 = scalar_lea.vmem [#allocation5], %s3950_s22  ;;  %s4030_s7 = scalar_lea.hbm %s5100_s1, 73728 }
   0xf   : > { %s5111_s24 = scalar_select %p4259_p6, 1, 0 }
  0x10   : > { %s4266_s27 = scalar_lea.hbm %s5100_s1, %s3083_s23  ;;  %s161_s29 = sshll.u32 %s154_s28, 4  ;;  %s4268_s29 = int_to_ptr.vmem [resolvable:$true] %s161_s29 }
  0x11   : > { %s4025_s4 = scalar_lea.hbm %s4266_s27, 36864  ;;  %p5105_p8 = pneg %p4259_p6 }
  0x12   : > { %p4026_p7 = scmp.ne.s32.totalorder %s4266_s27, %s4025_s4  ;;  %p4031_p11 = scmp.lt.u32.totalorder %s4266_s27, %s5100_s1 }
  0x13   : > { %p4032_p12 = scmp.lt.u32.totalorder %s4030_s7, %s4025_s4  ;;  %p4034_p1 = scmp.lt.u32.totalorder %s4025_s4, %s4266_s27 }
  0x14   : > { %p4028_p9 = pnand %p5105_p8, %p4026_p7 }
  0x15   : > { %p4033_p13 = por %p4032_p12, %p4031_p11 }
  0x16   : > { %p4029_p10 = pneg %p4028_p9 }
  0x17   : > { %p4035_p2 = por %p4034_p1, %p4033_p13 }
  0x19   : > { %p4036_p4 = pnand %p4035_p2, %p4029_p10 }
  0x1b   : > { %4039 = shalt.err (!%p4036_p4)
}
  0x1c   : > { %s4040_s10 = scalar_lea.vmem %s4268_s29, 36864  ;;  %s4185_s11 = smov [#allocation5]  }
  0x1d   : > { %p4041_p5 = scmp.ne.s32.totalorder %s4268_s29, %s4040_s10  ;;  %s4045_s17 = sshll.u32 %s4185_s11, 4  ;;  %s4046_s17 = int_to_ptr.vmem [resolvable:$false] %s4045_s17 }
  0x1e   : > { %s4047_s18 = scalar_lea.vmem %s4046_s17, 73728  ;;  %p4048_p3 = scmp.lt.s32.totalorder %s4268_s29, %s4046_s17 }
  0x1f   : > { %p4043_p7 = pnand %p4041_p5, %p5105_p8  ;;  %p4049_p11 = scmp.lt.s32.totalorder %s4047_s18, %s4040_s10 }
  0x21   : > { %p4044_p9 = pneg %p4043_p7  ;;  %p4050_p12 = por %p4049_p11, %p4048_p3 }
  0x23   : > { %p4051_p13 = pnand %p4050_p12, %p4044_p9 }
  0x25   : > { %4054 = shalt.err (!%p4051_p13)
}
  0x26   : > { %s5103_s20 = smov 768   ;;  %s4187_s22 = smov 384  }
  0x27   : > { %s4188_s23 = smov 24   ;;  %s4300_s25 = sadd.s32 4294967295, %s4183_s15  }
  0x28   : > { %3972 = dma.hbm_to_vmem [thread:$0]  (!%p4259_p6), %s4266_s27, 36864, %s4268_s29, %s4270_s30, %s5103_s20, %s4187_s22, %s4188_s23  }
  0x29   : > { %s3072_s26 = sadd.s32 4294967294, %s4183_s15   ;;  %p61_p3 = scmp.ne.s32.totalorder %s4175_s13, %s4171_s12 }
  0x2a   : > { %p5104_p10 = scmp.eq.s32.totalorder %s4300_s25, 0  ;;  %p111_p1 = scmp.eq.s32.totalorder %s4300_s25, 1 }
  0x2b   : > { %p117_p2 = scmp.eq.s32.totalorder %s3072_s26, 1  ;;  %p3073_p4 = scmp.ge.s32.totalorder %s4183_s15, 1 }
  0x2c   : > { %p4310_p5 = por %p5104_p10, %p61_p3  ;;  %p4317_p7 = por %p111_p1, %p55_p0 }
  0x2d   : > { %p4321_p9 = por %p117_p2, %p61_p3  ;;  %p124_p11 = scmp.lt.s32.totalorder %s4183_s15, 3 }
  0x2e   : > { %s5112_s28 = scalar_select %p4310_p5, 1, 0 }
  0x2f   : > { %s5113_s27 = scalar_select %p4317_p7, 1, 0 }
  0x30   : > { %s5114_s29 = scalar_select %p4321_p9, 1, 0 }
  0x31   : > { %p4326_p12 = pnand %p3073_p4, %p124_p11  ;;  %s4189_s5 = smov [#allocation2]  }
  0x32   : > { %s136_s6 = sshll.u32 %s4189_s5, 4  ;;  %s3951_s7 = smul.u32 3, %s152_s21  ;;  %s4330_s6 = int_to_ptr.vmem [resolvable:$true] %s136_s6 }
  0x33   : > { %s5115_s4 = scalar_select %p4326_p12, 1, 0 }
  0x34   : > { %p3965_p13 = pneg %p4326_p12  ;;  %s3084_s8 = smul.u32 48, %s4183_s15 }
  0x35   : > { %s175_s18 = scalar_lea.vmem [#allocation7], %s3951_s7  ;;  %s4055_s21 = scalar_lea.hbm %s5099_s0, 36864 }
  0x36   : > { %p4339_p0 = pnand %p3965_p13, %p5104_p10  ;;  %s4346_s17 = scalar_lea.hbm %s5101_s2, %s3084_s8 }
  0x37   : > { %s183_s22 = sshll.u32 %s175_s18, 4  ;;  %p4056_p3 = scmp.ne.s32.totalorder %s5099_s0, %s4055_s21  ;;  %s4348_s22 = int_to_ptr.vmem [resolvable:$true] %s183_s22 }
  0x38   : > { %p4057_p1 = pneg %p4339_p0  ;;  %p4062_p11 = scmp.lt.u32.totalorder %s4055_s21, %s5099_s0 }
  0x3a   : > { %p4058_p2 = pnand %p4057_p1, %p4056_p3 }
  0x3c   : > { %p4059_p4 = pneg %p4058_p2 }
  0x3e   : > { %p4064_p13 = pnand %p4062_p11, %p4059_p4 }
  0x40   : > { %4067 = shalt.err (!%p4064_p13)
}
  0x41   : > { %s4068_s7 = scalar_lea.vmem %s4330_s6, 36864  ;;  %p4076_p7 = scmp.lt.s32.totalorder %s4330_s6, %s4330_s6 }
  0x42   : > { %p4069_p10 = scmp.ne.s32.totalorder %s4330_s6, %s4068_s7  ;;  %p4077_p5 = scmp.lt.s32.totalorder %s4068_s7, %s4068_s7 }
  0x44   : > { %p4071_p8 = pnand %p4069_p10, %p4057_p1  ;;  %p4078_p12 = por %p4077_p5, %p4076_p7 }
  0x46   : > { %p4072_p9 = pneg %p4071_p8 }
  0x48   : > { %p4079_p6 = pnand %p4078_p12, %p4072_p9 }
  0x4a   : > { %4082 = shalt.err (!%p4079_p6)
}
  0x4b   : > { %s4190_s20 = smov 48   ;;  %s5117_s8 = smov 768  }
  0x4c   : > { %3968 = dma.hbm_to_vmem [thread:$0]  (!%p4339_p0), %s5099_s0, 36864, %s4330_s6, [#allocation3], %s5117_s8, %s5117_s8, %s4190_s20  }
  0x4d   : > { %s4083_s26 = scalar_lea.hbm %s4346_s17, 48  ;;  %p5118_p10 = scmp.ne.s32.totalorder %s5111_s24, 0 }
  0x4e   : > { %p4084_p8 = scmp.ne.s32.totalorder %s4346_s17, %s4083_s26  ;;  %s4088_s5 = scalar_lea.hbm %s5101_s2, 96 }
  0x4f   : > { %p5119_p5 = pneg %p5118_p10  ;;  %p4089_p9 = scmp.lt.u32.totalorder %s4346_s17, %s5101_s2 }
  0x50   : > { %p4090_p12 = scmp.lt.u32.totalorder %s4088_s5, %s4083_s26  ;;  %p4092_p1 = scmp.lt.u32.totalorder %s4083_s26, %s4346_s17 }
  0x51   : > { %p4086_p6 = pnand %p4084_p8, %p5119_p5 }
  0x52   : > { %p4091_p3 = por %p4090_p12, %p4089_p9 }
  0x53   : > { %p4087_p7 = pneg %p4086_p6 }
  0x54   : > { %p4093_p2 = por %p4092_p1, %p4091_p3 }
  0x56   : > { %p4094_p4 = pnand %p4093_p2, %p4087_p7 }
  0x58   : > { %4097 = shalt.err (!%p4094_p4)
}
  0x59   : > { %s4098_s6 = scalar_lea.vmem %s4348_s22, 48  ;;  %p5120_p11 = pmov %p5119_p5 }
  0x5a   : > { %p4099_p0 = scmp.ne.s32.totalorder %s4348_s22, %s4098_s6  ;;  %s4191_s7 = smov [#allocation7]  }
  0x5b   : > { %s4103_s20 = sshll.u32 %s4191_s7, 4  ;;  %s4104_s20 = int_to_ptr.vmem [resolvable:$false] %s4103_s20 }
  0x5c   : > { %p4101_p13 = pnand %p4099_p0, %p5120_p11  ;;  %s4105_s8 = scalar_lea.vmem %s4104_s20, 96 }
  0x5d   : > { %p4106_p5 = scmp.lt.s32.totalorder %s4348_s22, %s4104_s20  ;;  %p4107_p6 = scmp.lt.s32.totalorder %s4105_s8, %s4098_s6 }
  0x5e   : > { %p4102_p8 = pneg %p4101_p13 }
  0x5f   : > { %p4108_p9 = por %p4107_p6, %p4106_p5 }
  0x61   : > { %p4109_p12 = pnand %p4108_p9, %p4102_p8 }
  0x63   : > { %4112 = shalt.err (!%p4109_p12)
}
  0x64   : > { %3975 = dma.hbm_to_vmem [thread:$0]  (!%p5118_p10), %s4346_s17, 48, %s4348_s22, %s4270_s30  }
  0x65   : > { %p5121_p7 = scmp.ne.s32.totalorder %s5115_s4, 0 }
  0x66   : > { %p5122_p3 = scmp.eq.s32.totalorder (!%p5121_p7), %s4300_s25, 0 }
  0x67   : > { %192 = sbr.rel (%p5121_p7) target bundleno = 987 (0x3db), region = 32 }
  0x6e   : > { %4158 = dma.done.wait (%p5122_p3), [#allocation3], 36864   ;;  %p5123_p1 = pmov %p5122_p3 }
  0x6f   : > { %s198_s18 = sand.u32 1, %s4300_s25   ;;  %s4405_s23 = sand.u32 1, %s4175_s13  }
  0x70   : > { %4160 = vsyncadd (%p5123_p1), [#allocation3], 4294930432  ;;  %s3952_s24 = smul.u32 2304, %s4405_s23  ;;  %s199_s26 = scalar_lea.sflag [#allocation6], %s198_s18 }
  0x71   : > { %p5124_p10 = scmp.ne.s32.totalorder %s5112_s28, 0 }
  0x72   : > { %s4408_s21 = scalar_lea.vmem [#allocation5], %s3952_s24 }
  0x73   : > { %4162 = dma.done.wait (%p5124_p10), %s199_s26, 36912  }
  0x74   : > { %4164 = vsyncadd (%p5124_p10), %s199_s26, 4294930384  ;;  %v4192_v0 = vmov 0.0|0.0   ;;  %v531_v1 = vld [vmem:[%s4408_s21 + $0x8] sm:$0xff]  ;;  %v534_v2 = vld [vmem:[%s4408_s21 + $0x20] sm:$0xff]  ;;  %s3953_s30 = smul.u32 3, %s4405_s23  ;;  %s2954_s11 = scalar_lea.sflag [#allocation4], %s4405_s23 }
  0x75   : > { %3278 = vmatprep.subr.bf16.mxu1 %v4192_v0  ;;  %v532_v3 = vld [vmem:[%s4408_s21 + $0x10] sm:$0xff]  ;;  %v3086_v4 = vpack.c.bf16 %v534_v2, %v531_v1  ;;  %v535_v5 = vld [vmem:[%s4408_s21 + $0x28] sm:$0xff]  ;;  %v530_v6 = vld [vmem:[%s4408_s21] sm:$0xff]  ;;  %s3954_s4 = smul.u32 1152, %s4405_s23  ;;  %p5125_p4 = scmp.ne.s32.totalorder %s5113_s27, 0 }
  0x76   : > { %v533_v7 = vld [vmem:[%s4408_s21 + $0x18] sm:$0xff]  ;;  %v3279_v8 = vpack.c.bf16 %v535_v5, %v532_v3  ;;  %v540_v11 = vld [vmem:[%s4408_s21 + $0x50] sm:$0xff]  ;;  %v538_v12 = vld [vmem:[%s4408_s21 + $0x40] sm:$0xff]  ;;  %s211_s28 = scalar_lea.vmem [#allocation7], %s3953_s30  ;;  %s3085_s22 = smul.u32 384, %s4300_s25 }
  0x77   : > { %v3088_v9 = vpack.c.bf16 %v533_v7, %v530_v6  ;;  %v537_v10 = vld [vmem:[%s4408_s21 + $0x38] sm:$0xff]  ;;  %3087 = vmatprep.subr.bf16.mxu0 %v3086_v4  ;;  %v536_v15 = vld [vmem:[%s4408_s21 + $0x30] sm:$0xff]  ;;  %v539_v16 = vld [vmem:[%s4408_s21 + $0x48] sm:$0xff]  ;;  %s4761_s17 = scalar_lea.vmem [#allocation8], %s3954_s4  ;;  %s4193_s7 = smov [#allocation8]  }
  0x78   : > { %v3090_v13 = vpack.c.bf16 %v540_v11, %v537_v10  ;;  %v541_v14 = vld [vmem:[%s4408_s21 + $0x58] sm:$0xff]  ;;  %3280 = vmatpush1.bf16.msra.mxu1 %v3279_v8  ;;  %v3092_v18 = vpack.c.bf16 %v539_v16, %v536_v15  ;;  %v543_v19 = vld [vmem:[%s4408_s21 + $0x68] sm:$0xff]  ;;  %v546_v20 = vld [vmem:[%s4408_s21 + $0x80] sm:$0xff]  ;;  %s2967_s9 = sshll.u32 %s4761_s17, 4  ;;  %s5047_s10 = scalar_lea.hbm %s5102_s3, %s3085_s22  ;;  %s5051_s9 = int_to_ptr.vmem [resolvable:$true] %s2967_s9 }
  0x79   : > { %3089 = vmatpush1.bf16.msra.mxu0 %v3088_v9  ;;  %v3282_v17 = vpack.c.bf16 %v541_v14, %v538_v12  ;;  %v544_v21 = vld [vmem:[%s4408_s21 + $0x70] sm:$0xff]  ;;  %3281 = vmatprep.subr.bf16.mxu1 %v4192_v0  ;;  %v3094_v22 = vpack.c.bf16 %v546_v20, %v543_v19  ;;  %v547_v23 = vld [vmem:[%s4408_s21 + $0x88] sm:$0xff]  ;;  %v542_v24 = vld [vmem:[%s4408_s21 + $0x60] sm:$0xff]  ;;  %s4113_s6 = scalar_lea.vmem %s5051_s9, 18432  ;;  %s4117_s20 = sshll.u32 %s4193_s7, 4  ;;  %s4118_s20 = int_to_ptr.vmem [resolvable:$false] %s4117_s20 }
  0x7a   : > { %3091 = vmatprep.subr.bf16.mxu0 %v3090_v13  ;;  %v545_v25 = vld [vmem:[%s4408_s21 + $0x78] sm:$0xff]  ;;  %v552_v27 = vld [vmem:[%s4408_s21 + $0xb0] sm:$0xff]  ;;  %v3285_v28 = vpack.c.bf16 %v547_v23, %v544_v21  ;;  %v550_v30 = vld [vmem:[%s4408_s21 + $0xa0] sm:$0xff]  ;;  %p4114_p2 = scmp.ne.s32.totalorder %s5051_s9, %s4113_s6  ;;  %s4119_s8 = scalar_lea.vmem %s4118_s20, 36864 }
  0x7b   : > { %v549_v26 = vld [vmem:[%s4408_s21 + $0x98] sm:$0xff]  ;;  %v3096_v29 = vpack.c.bf16 %v545_v25, %v542_v24  ;;  %v548_v33 = vld [vmem:[%s4408_s21 + $0x90] sm:$0xff]  ;;  %v551_v34 = vld [vmem:[%s4408_s21 + $0xa8] sm:$0xff]  ;;  %p4120_p13 = scmp.lt.s32.totalorder %s5051_s9, %s4118_s20  ;;  %p4121_p8 = scmp.lt.s32.totalorder %s4119_s8, %s4113_s6 }
  0x7c   : > { %3283 = vmatpush1.bf16.msra.mxu1 %v3282_v17  ;;  %v3098_v31 = vpack.c.bf16 %v552_v27, %v549_v26  ;;  %v553_v32 = vld [vmem:[%s4408_s21 + $0xb8] sm:$0xff]  ;;  %v555_v35 = vld [vmem:[%s4408_s21 + $0xc8] sm:$0xff]  ;;  %v558_v36 = vld [vmem:[%s4408_s21 + $0xe0] sm:$0xff]  ;;  %v3100_v38 = vpack.c.bf16 %v551_v34, %v548_v33  ;;  %p4115_p0 = pnand %p4114_p2, %p5125_p4 }
  0x7d   : > { %3093 = vmatpush1.bf16.msra.mxu0 %v3092_v18  ;;  %3284 = vmatprep.subr.bf16.mxu1 %v4192_v0  ;;  %v3288_v37 = vpack.c.bf16 %v553_v32, %v550_v30  ;;  %v556_v39 = vld [vmem:[%s4408_s21 + $0xd0] sm:$0xff]  ;;  %v3102_v40 = vpack.c.bf16 %v558_v36, %v555_v35  ;;  %v559_v41 = vld [vmem:[%s4408_s21 + $0xe8] sm:$0xff]  ;;  %v554_v42 = vld [vmem:[%s4408_s21 + $0xc0] sm:$0xff]  ;;  %p4122_p5 = por %p4121_p8, %p4120_p13 }
  0x7e   : > { %3095 = vmatprep.subr.bf16.mxu0 %v3094_v22  ;;  %v557_v43 = vld [vmem:[%s4408_s21 + $0xd8] sm:$0xff]  ;;  %v564_v45 = vld [vmem:[%s4408_s21 + $0x110] sm:$0xff]  ;;  %v3291_v46 = vpack.c.bf16 %v559_v41, %v556_v39  ;;  %v562_v48 = vld [vmem:[%s4408_s21 + $0x100] sm:$0xff]  ;;  %p4116_p11 = pneg %p4115_p0 }
  0x7f   : > { %v561_v44 = vld [vmem:[%s4408_s21 + $0xf8] sm:$0xff]  ;;  %v3104_v47 = vpack.c.bf16 %v557_v43, %v554_v42  ;;  %v560_v51 = vld [vmem:[%s4408_s21 + $0xf0] sm:$0xff]  ;;  %v563_v52 = vld [vmem:[%s4408_s21 + $0x108] sm:$0xff] }
  0x80   : > { %3286 = vmatpush1.bf16.msra.mxu1 %v3285_v28  ;;  %v3106_v49 = vpack.c.bf16 %v564_v45, %v561_v44  ;;  %v565_v50 = vld [vmem:[%s4408_s21 + $0x118] sm:$0xff]  ;;  %v567_v53 = vld [vmem:[%s4408_s21 + $0x128] sm:$0xff]  ;;  %v570_v54 = vld [vmem:[%s4408_s21 + $0x140] sm:$0xff]  ;;  %v3108_v56 = vpack.c.bf16 %v563_v52, %v560_v51  ;;  %p4123_p6 = pnand %p4122_p5, %p4116_p11 }
  0x81   : > { %3097 = vmatpush1.bf16.msra.mxu0 %v3096_v29  ;;  %3287 = vmatprep.subr.bf16.mxu1 %v4192_v0  ;;  %v3294_v55 = vpack.c.bf16 %v565_v50, %v562_v48  ;;  %v568_v57 = vld [vmem:[%s4408_s21 + $0x130] sm:$0xff]  ;;  %v3110_v58 = vpack.c.bf16 %v570_v54, %v567_v53  ;;  %v571_v59 = vld [vmem:[%s4408_s21 + $0x148] sm:$0xff]  ;;  %v566_v60 = vld [vmem:[%s4408_s21 + $0x120] sm:$0xff] }
  0x82   : > { %3099 = vmatprep.subr.bf16.mxu0 %v3098_v31  ;;  %v569_v61 = vld [vmem:[%s4408_s21 + $0x138] sm:$0xff]  ;;  %v576_v63 = vld [vmem:[%s4408_s21 + $0x170] sm:$0xff]  ;;  %v3297_v1 = vpack.c.bf16 %v571_v59, %v568_v57  ;;  %v574_v3 = vld [vmem:[%s4408_s21 + $0x160] sm:$0xff] }
  0x83   : > { %v573_v62 = vld [vmem:[%s4408_s21 + $0x158] sm:$0xff]  ;;  %v3112_v2 = vpack.c.bf16 %v569_v61, %v566_v60  ;;  %v572_v6 = vld [vmem:[%s4408_s21 + $0x150] sm:$0xff]  ;;  %v575_v7 = vld [vmem:[%s4408_s21 + $0x168] sm:$0xff] }
  0x84   : > { %3289 = vmatpush1.bf16.msra.mxu1 %v3288_v37  ;;  %v3114_v4 = vpack.c.bf16 %v576_v63, %v573_v62  ;;  %v577_v5 = vld [vmem:[%s4408_s21 + $0x178] sm:$0xff]  ;;  %v579_v8 = vld [vmem:[%s4408_s21 + $0x188] sm:$0xff]  ;;  %v582_v9 = vld [vmem:[%s4408_s21 + $0x1a0] sm:$0xff]  ;;  %v3116_v11 = vpack.c.bf16 %v575_v7, %v572_v6 }
  0x85   : > { %3101 = vmatpush1.bf16.msra.mxu0 %v3100_v38  ;;  %3290 = vmatprep.subr.bf16.mxu1 %v4192_v0  ;;  %v3300_v10 = vpack.c.bf16 %v577_v5, %v574_v3  ;;  %v580_v12 = vld [vmem:[%s4408_s21 + $0x190] sm:$0xff]  ;;  %v3118_v13 = vpack.c.bf16 %v582_v9, %v579_v8  ;;  %v583_v14 = vld [vmem:[%s4408_s21 + $0x1a8] sm:$0xff]  ;;  %v578_v15 = vld [vmem:[%s4408_s21 + $0x180] sm:$0xff] }
  0x86   : > { %3103 = vmatprep.subr.bf16.mxu0 %v3102_v40  ;;  %v581_v16 = vld [vmem:[%s4408_s21 + $0x198] sm:$0xff]  ;;  %v588_v18 = vld [vmem:[%s4408_s21 + $0x1d0] sm:$0xff]  ;;  %v3303_v19 = vpack.c.bf16 %v583_v14, %v580_v12  ;;  %v586_v21 = vld [vmem:[%s4408_s21 + $0x1c0] sm:$0xff] }
  0x87   : > { %v585_v17 = vld [vmem:[%s4408_s21 + $0x1b8] sm:$0xff]  ;;  %v3120_v20 = vpack.c.bf16 %v581_v16, %v578_v15  ;;  %v243_v22 = vld [vmem:[#allocation2 + $0x8] sm:$0xff]  ;;  %v584_v25 = vld [vmem:[%s4408_s21 + $0x1b0] sm:$0xff] }
  0x88   : > { %3292 = vmatpush1.bf16.msra.mxu1 %v3291_v46  ;;  %v3122_v23 = vpack.c.bf16 %v588_v18, %v585_v17  ;;  %v589_v24 = vld [vmem:[%s4408_s21 + $0x1d8] sm:$0xff]  ;;  %v587_v26 = vld [vmem:[%s4408_s21 + $0x1c8] sm:$0xff]  ;;  %v594_v28 = vld [vmem:[%s4408_s21 + $0x200] sm:$0xff]  ;;  %1958 = vmatprep.mubr.f32.mxu1 %v243_v22 }
  0x89   : > { %3105 = vmatpush1.bf16.msra.mxu0 %v3104_v47  ;;  %3293 = vmatprep.subr.bf16.mxu1 %v4192_v0  ;;  %v591_v27 = vld [vmem:[%s4408_s21 + $0x1e8] sm:$0xff]  ;;  %v3306_v29 = vpack.c.bf16 %v589_v24, %v586_v21  ;;  %v3124_v30 = vpack.c.bf16 %v587_v26, %v584_v25  ;;  %v592_v31 = vld [vmem:[%s4408_s21 + $0x1f0] sm:$0xff]  ;;  %v590_v34 = vld [vmem:[%s4408_s21 + $0x1e0] sm:$0xff] }
  0x8a   : > { %3107 = vmatprep.subr.bf16.mxu0 %v3106_v49  ;;  %899 = vmatprep.mubr.f32.mxu0 %v243_v22  ;;  %v3126_v32 = vpack.c.bf16 %v594_v28, %v591_v27  ;;  %v595_v33 = vld [vmem:[%s4408_s21 + $0x208] sm:$0xff]  ;;  %v593_v35 = vld [vmem:[%s4408_s21 + $0x1f8] sm:$0xff]  ;;  %v600_v37 = vld [vmem:[%s4408_s21 + $0x230] sm:$0xff] }
  0x8b   : > { %v597_v36 = vld [vmem:[%s4408_s21 + $0x218] sm:$0xff]  ;;  %v3309_v38 = vpack.c.bf16 %v595_v33, %v592_v31  ;;  %v3128_v39 = vpack.c.bf16 %v593_v35, %v590_v34  ;;  %v598_v40 = vld [vmem:[%s4408_s21 + $0x220] sm:$0xff]  ;;  %v596_v43 = vld [vmem:[%s4408_s21 + $0x210] sm:$0xff] }
  0x8c   : > { %3295 = vmatpush1.bf16.msra.mxu1 %v3294_v55  ;;  %v3130_v41 = vpack.c.bf16 %v600_v37, %v597_v36  ;;  %v601_v42 = vld [vmem:[%s4408_s21 + $0x238] sm:$0xff]  ;;  %v599_v44 = vld [vmem:[%s4408_s21 + $0x228] sm:$0xff]  ;;  %v606_v46 = vld [vmem:[%s4408_s21 + $0x260] sm:$0xff] }
  0x8d   : > { %3109 = vmatpush1.bf16.msra.mxu0 %v3108_v56  ;;  %3296 = vmatprep.subr.bf16.mxu1 %v4192_v0  ;;  %v603_v45 = vld [vmem:[%s4408_s21 + $0x248] sm:$0xff]  ;;  %v3312_v47 = vpack.c.bf16 %v601_v42, %v598_v40  ;;  %v3132_v48 = vpack.c.bf16 %v599_v44, %v596_v43  ;;  %v604_v49 = vld [vmem:[%s4408_s21 + $0x250] sm:$0xff]  ;;  %v602_v52 = vld [vmem:[%s4408_s21 + $0x240] sm:$0xff] }
  0x8e   : > { %3111 = vmatprep.subr.bf16.mxu0 %v3110_v58  ;;  %v3134_v50 = vpack.c.bf16 %v606_v46, %v603_v45  ;;  %v607_v51 = vld [vmem:[%s4408_s21 + $0x268] sm:$0xff]  ;;  %v605_v53 = vld [vmem:[%s4408_s21 + $0x258] sm:$0xff]  ;;  %v612_v55 = vld [vmem:[%s4408_s21 + $0x290] sm:$0xff] }
  0x8f   : > { %v609_v54 = vld [vmem:[%s4408_s21 + $0x278] sm:$0xff]  ;;  %v3315_v56 = vpack.c.bf16 %v607_v51, %v604_v49  ;;  %v3136_v57 = vpack.c.bf16 %v605_v53, %v602_v52  ;;  %v610_v58 = vld [vmem:[%s4408_s21 + $0x280] sm:$0xff]  ;;  %v608_v61 = vld [vmem:[%s4408_s21 + $0x270] sm:$0xff] }
  0x90   : > { %3298 = vmatpush1.bf16.msra.mxu1 %v3297_v1  ;;  %v3138_v59 = vpack.c.bf16 %v612_v55, %v609_v54  ;;  %v613_v60 = vld [vmem:[%s4408_s21 + $0x298] sm:$0xff]  ;;  %v611_v62 = vld [vmem:[%s4408_s21 + $0x288] sm:$0xff]  ;;  %v618_v1 = vld [vmem:[%s4408_s21 + $0x2c0] sm:$0xff] }
  0x91   : > { %3113 = vmatpush1.bf16.msra.mxu0 %v3112_v2  ;;  %3299 = vmatprep.subr.bf16.mxu1 %v4192_v0  ;;  %v615_v63 = vld [vmem:[%s4408_s21 + $0x2a8] sm:$0xff]  ;;  %v3318_v2 = vpack.c.bf16 %v613_v60, %v610_v58  ;;  %v3140_v3 = vpack.c.bf16 %v611_v62, %v608_v61  ;;  %v614_v7 = vld [vmem:[%s4408_s21 + $0x2a0] sm:$0xff]  ;;  %v617_v8 = vld [vmem:[%s4408_s21 + $0x2b8] sm:$0xff] }
  0x92   : > { %3115 = vmatprep.subr.bf16.mxu0 %v3114_v4  ;;  %v616_v4 = vld [vmem:[%s4408_s21 + $0x2b0] sm:$0xff]  ;;  %v3142_v5 = vpack.c.bf16 %v618_v1, %v615_v63  ;;  %v619_v6 = vld [vmem:[%s4408_s21 + $0x2c8] sm:$0xff]  ;;  %v621_v9 = vld [vmem:[%s4408_s21 + $0x2d8] sm:$0xff]  ;;  %v3144_v12 = vpack.c.bf16 %v617_v8, %v614_v7 }
  0x93   : > { %v625_v15 = vld [vmem:[%s4408_s21 + $0x2f8] sm:$0xff]  ;;  %v620_v16 = vld [vmem:[%s4408_s21 + $0x2d0] sm:$0xff]  ;;  %v623_v17 = vld [vmem:[%s4408_s21 + $0x2e8] sm:$0xff] }
  0x94   : > { %3301 = vmatpush1.bf16.msra.mxu1 %v3300_v10  ;;  %v624_v10 = vld [vmem:[%s4408_s21 + $0x2f0] sm:$0xff]  ;;  %v627_v18 = vld [vmem:[%s4408_s21 + $0x308] sm:$0xff]  ;;  %v3148_v21 = vpack.c.bf16 %v623_v17, %v620_v16  ;;  %v629_v24 = vld [vmem:[%s4408_s21 + $0x318] sm:$0xff] }
  0x95   : > { %3117 = vmatpush1.bf16.msra.mxu0 %v3116_v11  ;;  %3302 = vmatprep.subr.bf16.mxu1 %v4192_v0  ;;  %v3321_v11 = vpack.c.bf16 %v619_v6, %v616_v4  ;;  %v3146_v14 = vpack.c.bf16 %v624_v10, %v621_v9  ;;  %v628_v25 = vld [vmem:[%s4408_s21 + $0x310] sm:$0xff]  ;;  %v631_v26 = vld [vmem:[%s4408_s21 + $0x328] sm:$0xff]  ;;  %v633_v27 = vld [vmem:[%s4408_s21 + $0x338] sm:$0xff] }
  0x96   : > { %3119 = vmatprep.subr.bf16.mxu0 %v3118_v13  ;;  %v622_v13 = vld [vmem:[%s4408_s21 + $0x2e0] sm:$0xff]  ;;  %v636_v28 = vld [vmem:[%s4408_s21 + $0x350] sm:$0xff]  ;;  %v249_v31 = vld [vmem:[#allocation2 + $0x38] sm:$0xff] }
  0x97   : > { %v632_v33 = vld [vmem:[%s4408_s21 + $0x330] sm:$0xff]  ;;  %v3154_v34 = vpack.c.bf16 %v636_v28, %v633_v27  ;;  %v635_v35 = vld [vmem:[%s4408_s21 + $0x348] sm:$0xff]  ;;  %v634_v36 = vld [vmem:[%s4408_s21 + $0x340] sm:$0xff] }
  0x98   : > { %3304 = vmatpush1.bf16.msra.mxu1 %v3303_v19  ;;  %v630_v19 = vld [vmem:[%s4408_s21 + $0x320] sm:$0xff]  ;;  %v637_v37 = vld [vmem:[%s4408_s21 + $0x358] sm:$0xff]  ;;  %v248_v40 = vld [vmem:[#allocation2 + $0x30] sm:$0xff]  ;;  %v3156_v42 = vpack.c.bf16 %v635_v35, %v632_v33 }
  0x99   : > { %3121 = vmatpush1.bf16.msra.mxu0 %v3120_v20  ;;  %3305 = vmatprep.subr.bf16.mxu1 %v4192_v0  ;;  %v3324_v20 = vpack.c.bf16 %v625_v15, %v622_v13  ;;  %v3150_v22 = vpack.c.bf16 %v630_v19, %v627_v18  ;;  %v3330_v43 = vpack.c.bf16 %v637_v37, %v634_v36  ;;  %v638_v44 = vld [vmem:[%s4408_s21 + $0x360] sm:$0xff]  ;;  %v641_v46 = vld [vmem:[%s4408_s21 + $0x378] sm:$0xff]  ;;  %v644_v55 = vld [vmem:[%s4408_s21 + $0x390] sm:$0xff] }
  0x9a   : > { %3123 = vmatprep.subr.bf16.mxu0 %v3122_v23  ;;  %v626_v23 = vld [vmem:[%s4408_s21 + $0x300] sm:$0xff]  ;;  %v645_v49 = vld [vmem:[%s4408_s21 + $0x398] sm:$0xff]  ;;  %v3160_v53 = vpack.c.bf16 %v641_v46, %v638_v44  ;;  %v651_v60 = vld [vmem:[%s4408_s21 + $0x3c8] sm:$0xff] }
  0x9b   : > { %v254_v51 = vld [vmem:[#allocation2 + $0x60] sm:$0xff]  ;;  %v261_v52 = vld [vmem:[#allocation2 + $0x98] sm:$0xff]  ;;  %v260_v62 = vld [vmem:[#allocation2 + $0x90] sm:$0xff] }
  0x9c   : > { %3307 = vmatpush1.bf16.msra.mxu1 %v3306_v29  ;;  %v242_v29 = vld [vmem:[#allocation2] sm:$0xff]  ;;  %v267_v63 = vld [vmem:[#allocation2 + $0xc8] sm:$0xff]  ;;  %v652_v6 = vld [vmem:[%s4408_s21 + $0x3d0] sm:$0xff] }
  0x9d   : > { %3125 = vmatpush1.bf16.msra.mxu0 %v3124_v30  ;;  %3308 = vmatprep.subr.bf16.mxu1 %v4192_v0  ;;  %v3152_v30 = vpack.c.bf16 %v629_v24, %v626_v23  ;;  %v646_v58 = vld [vmem:[%s4408_s21 + $0x3a0] sm:$0xff]  ;;  %v655_v7 = vld [vmem:[%s4408_s21 + $0x3e8] sm:$0xff]  ;;  %v657_v8 = vld [vmem:[%s4408_s21 + $0x3f8] sm:$0xff] }
  0x9e   : > { %3127 = vmatprep.subr.bf16.mxu0 %v3126_v32  ;;  %v3327_v32 = vpack.c.bf16 %v631_v26, %v628_v25  ;;  %v654_v61 = vld [vmem:[%s4408_s21 + $0x3e0] sm:$0xff]  ;;  %v660_v9 = vld [vmem:[%s4408_s21 + $0x410] sm:$0xff]  ;;  %v3339_v13 = vpack.c.bf16 %v655_v7, %v652_v6  ;;  %v659_v16 = vld [vmem:[%s4408_s21 + $0x408] sm:$0xff] }
  0x9f   : > { %v3166_v4 = vpack.c.bf16 %v654_v61, %v651_v60  ;;  %v266_v10 = vld [vmem:[#allocation2 + $0xc0] sm:$0xff]  ;;  %v3170_v15 = vpack.c.bf16 %v660_v9, %v657_v8  ;;  %v661_v18 = vld [vmem:[%s4408_s21 + $0x418] sm:$0xff]  ;;  %v663_v19 = vld [vmem:[%s4408_s21 + $0x428] sm:$0xff] }
  0xa0   : > { %3310 = vmatpush1.bf16.msra.mxu1 %v3309_v38  ;;  %v639_v38 = vld [vmem:[%s4408_s21 + $0x368] sm:$0xff]  ;;  %v658_v17 = vld [vmem:[%s4408_s21 + $0x400] sm:$0xff]  ;;  %v665_v27 = vld [vmem:[%s4408_s21 + $0x438] sm:$0xff] }
  0xa1   : > { %3129 = vmatpush1.bf16.msra.mxu0 %v3128_v39  ;;  %3311 = vmatprep.subr.bf16.mxu1 %v4192_v0  ;;  %v642_v39 = vld [vmem:[%s4408_s21 + $0x380] sm:$0xff]  ;;  %v3342_v24 = vpack.c.bf16 %v661_v18, %v658_v17  ;;  %v664_v28 = vld [vmem:[%s4408_s21 + $0x430] sm:$0xff]  ;;  %v285_v33 = vld [vmem:[#allocation2 + $0x158] sm:$0xff] }
  0xa2   : > { %3131 = vmatprep.subr.bf16.mxu0 %v3130_v41  ;;  %v255_v41 = vld [vmem:[#allocation2 + $0x68] sm:$0xff]  ;;  %v3158_v45 = vpack.c.bf16 %v642_v39, %v639_v38  ;;  %v662_v25 = vld [vmem:[%s4408_s21 + $0x420] sm:$0xff]  ;;  %v668_v36 = vld [vmem:[%s4408_s21 + $0x450] sm:$0xff] }
  0xa3   : > { %v671_v38 = vld [vmem:[%s4408_s21 + $0x468] sm:$0xff]  ;;  %v670_v39 = vld [vmem:[%s4408_s21 + $0x460] sm:$0xff]  ;;  %v689_v8 = vld [vmem:[%s4408_s21 + $0x4f8] sm:$0xff] }
  0xa4   : > { %3313 = vmatpush1.bf16.msra.mxu1 %v3312_v47  ;;  %v640_v47 = vld [vmem:[%s4408_s21 + $0x370] sm:$0xff]  ;;  %v291_v44 = vld [vmem:[#allocation2 + $0x188] sm:$0xff]  ;;  %v682_v61 = vld [vmem:[%s4408_s21 + $0x4c0] sm:$0xff] }
  0xa5   : > { %3133 = vmatpush1.bf16.msra.mxu0 %v3132_v48  ;;  %3314 = vmatprep.subr.bf16.mxu1 %v4192_v0  ;;  %v643_v48 = vld [vmem:[%s4408_s21 + $0x388] sm:$0xff]  ;;  %v686_v6 = vld [vmem:[%s4408_s21 + $0x4e0] sm:$0xff]  ;;  %v688_v9 = vld [vmem:[%s4408_s21 + $0x4f0] sm:$0xff] }
  0xa6   : > { %3135 = vmatprep.subr.bf16.mxu0 %v3134_v50  ;;  %v648_v50 = vld [vmem:[%s4408_s21 + $0x3b0] sm:$0xff]  ;;  %v3333_v54 = vpack.c.bf16 %v643_v48, %v640_v47  ;;  %v674_v47 = vld [vmem:[%s4408_s21 + $0x480] sm:$0xff]  ;;  %v683_v60 = vld [vmem:[%s4408_s21 + $0x4c8] sm:$0xff] }
  0xa7   : > { %v692_v17 = vld [vmem:[%s4408_s21 + $0x510] sm:$0xff] }
  0xa8   : > { %3316 = vmatpush1.bf16.msra.mxu1 %v3315_v56  ;;  %v3162_v56 = vpack.c.bf16 %v648_v50, %v645_v49  ;;  %v677_v49 = vld [vmem:[%s4408_s21 + $0x498] sm:$0xff]  ;;  %v676_v50 = vld [vmem:[%s4408_s21 + $0x490] sm:$0xff] }
  0xa9   : > { %3137 = vmatpush1.bf16.msra.mxu0 %v3136_v57  ;;  %3317 = vmatprep.subr.bf16.mxu1 %v4192_v0  ;;  %v647_v57 = vld [vmem:[%s4408_s21 + $0x3a8] sm:$0xff] }
  0xaa   : > { %3139 = vmatprep.subr.bf16.mxu0 %v3138_v59  ;;  %v649_v59 = vld [vmem:[%s4408_s21 + $0x3b8] sm:$0xff]  ;;  %v3164_v1 = vpack.c.bf16 %v647_v57, %v644_v55 }
  0xab   : > { %v297_v55 = vld [vmem:[#allocation2 + $0x1b8] sm:$0xff] }
  0xac   : > { %3319 = vmatpush1.bf16.msra.mxu1 %v3318_v2  ;;  %v3336_v2 = vpack.c.bf16 %v649_v59, %v646_v58  ;;  %v680_v58 = vld [vmem:[%s4408_s21 + $0x4b0] sm:$0xff] }
  0xad   : > { %3141 = vmatpush1.bf16.msra.mxu0 %v3140_v3  ;;  %3320 = vmatprep.subr.bf16.mxu1 %v4192_v0  ;;  %v650_v3 = vld [vmem:[%s4408_s21 + $0x3c0] sm:$0xff] }
  0xae   : > { %3143 = vmatprep.subr.bf16.mxu0 %v3142_v5  ;;  %v653_v5 = vld [vmem:[%s4408_s21 + $0x3d8] sm:$0xff] }
  0xb0   : > { %3322 = vmatpush1.bf16.msra.mxu1 %v3321_v11  ;;  %v273_v11 = vld [vmem:[#allocation2 + $0xf8] sm:$0xff] }
  0xb1   : > { %3145 = vmatpush1.bf16.msra.mxu0 %v3144_v12  ;;  %3323 = vmatprep.subr.bf16.mxu1 %v4192_v0  ;;  %v3168_v12 = vpack.c.bf16 %v653_v5, %v650_v3  ;;  %v303_v3 = vld [vmem:[#allocation2 + $0x1e8] sm:$0xff] }
  0xb2   : > { %3147 = vmatprep.subr.bf16.mxu0 %v3146_v14  ;;  %v656_v14 = vld [vmem:[%s4408_s21 + $0x3f0] sm:$0xff] }
  0xb3   : > { %v3172_v23 = vpack.c.bf16 %v659_v16, %v656_v14  ;;  %v309_v14 = vld [vmem:[#allocation2 + $0x218] sm:$0xff] }
  0xb4   : > { %3325 = vmatpush1.bf16.msra.mxu1 %v3324_v20  ;;  %v666_v20 = vld [vmem:[%s4408_s21 + $0x440] sm:$0xff] }
  0xb5   : > { %3149 = vmatpush1.bf16.msra.mxu0 %v3148_v21  ;;  %3326 = vmatprep.subr.bf16.mxu1 %v4192_v0  ;;  %v272_v21 = vld [vmem:[#allocation2 + $0xf0] sm:$0xff]  ;;  %v3174_v26 = vpack.c.bf16 %v666_v20, %v663_v19  ;;  %v695_v19 = vld [vmem:[%s4408_s21 + $0x528] sm:$0xff]  ;;  %v694_v20 = vld [vmem:[%s4408_s21 + $0x520] sm:$0xff] }
  0xb6   : > { %3151 = vmatprep.subr.bf16.mxu0 %v3150_v22  ;;  %v279_v22 = vld [vmem:[#allocation2 + $0x128] sm:$0xff] }
  0xb7   : > { %1959 = vmatmul.mubr.f32.vlgmr.msra.gmra.mrb[0].mxu1 %v242_v29 }
  0xb8   : > { %900 = vmatmul.mubr.f32.vlgmr.msra.gmra.mrb[0].mxu0 %v242_v29  ;;  %1963 = vmatprep.mubr.f32.mxu1 %v249_v31  ;;  %v667_v29 = vld [vmem:[%s4408_s21 + $0x448] sm:$0xff] }
  0xb9   : > { %3153 = vmatpush1.bf16.msra.mxu0 %v3152_v30  ;;  %3328 = vmatpush1.bf16.msra.mxu1 %v3327_v32  ;;  %v669_v30 = vld [vmem:[%s4408_s21 + $0x458] sm:$0xff]  ;;  %v278_v32 = vld [vmem:[#allocation2 + $0x120] sm:$0xff]  ;;  %v3345_v35 = vpack.c.bf16 %v667_v29, %v664_v28 }
  0xba   : > { %905 = vmatprep.mubr.f32.mxu0 %v249_v31  ;;  %3155 = vmatprep.subr.bf16.mxu0 %v3154_v34  ;;  %v672_v31 = vld [vmem:[%s4408_s21 + $0x470] sm:$0xff]  ;;  %v3176_v34 = vpack.c.bf16 %v665_v27, %v662_v25  ;;  %v315_v25 = vld [vmem:[#allocation2 + $0x248] sm:$0xff]  ;;  %v698_v28 = vld [vmem:[%s4408_s21 + $0x540] sm:$0xff] }
  0xbb   : > { %3329 = vmatprep.subr.bf16.mxu1 %v4192_v0  ;;  %1964 = vmatmul.mubr.f32.gmra.mrb[2].mxu1 %v248_v40  ;;  %v3178_v37 = vpack.c.bf16 %v672_v31, %v669_v30  ;;  %v701_v30 = vld [vmem:[%s4408_s21 + $0x558] sm:$0xff]  ;;  %v700_v31 = vld [vmem:[%s4408_s21 + $0x550] sm:$0xff] }
  0xbc   : > { %906 = vmatmul.mubr.f32.gmra.mrb[2].mxu0 %v248_v40  ;;  %1968 = vmatprep.mubr.f32.mxu1 %v255_v41  ;;  %v673_v40 = vld [vmem:[%s4408_s21 + $0x478] sm:$0xff] }
  0xbd   : > { %911 = vmatprep.mubr.f32.mxu0 %v255_v41  ;;  %3157 = vmatpush1.bf16.msra.mxu0 %v3156_v42  ;;  %v675_v41 = vld [vmem:[%s4408_s21 + $0x488] sm:$0xff]  ;;  %v678_v42 = vld [vmem:[%s4408_s21 + $0x4a0] sm:$0xff]  ;;  %v3348_v46 = vpack.c.bf16 %v673_v40, %v670_v39  ;;  %v704_v39 = vld [vmem:[%s4408_s21 + $0x570] sm:$0xff] }
  0xbe   : > { %3331 = vmatpush1.bf16.msra.mxu1 %v3330_v43  ;;  %3159 = vmatprep.subr.bf16.mxu0 %v3158_v45  ;;  %v284_v43 = vld [vmem:[#allocation2 + $0x150] sm:$0xff]  ;;  %v3180_v45 = vpack.c.bf16 %v671_v38, %v668_v36  ;;  %v3182_v48 = vpack.c.bf16 %v678_v42, %v675_v41  ;;  %v321_v36 = vld [vmem:[#allocation2 + $0x278] sm:$0xff]  ;;  %v707_v41 = vld [vmem:[%s4408_s21 + $0x588] sm:$0xff] }
  0xbf   : > { %3332 = vmatprep.subr.bf16.mxu1 %v4192_v0  ;;  %1969 = vmatmul.mubr.f32.gmra.mrb[4].mxu1 %v254_v51  ;;  %v706_v42 = vld [vmem:[%s4408_s21 + $0x580] sm:$0xff] }
  0xc0   : > { %912 = vmatmul.mubr.f32.gmra.mrb[4].mxu0 %v254_v51  ;;  %1973 = vmatprep.mubr.f32.mxu1 %v261_v52  ;;  %v679_v51 = vld [vmem:[%s4408_s21 + $0x4a8] sm:$0xff] }
  0xc1   : > { %917 = vmatprep.mubr.f32.mxu0 %v261_v52  ;;  %3161 = vmatpush1.bf16.msra.mxu0 %v3160_v53  ;;  %v681_v52 = vld [vmem:[%s4408_s21 + $0x4b8] sm:$0xff]  ;;  %v684_v53 = vld [vmem:[%s4408_s21 + $0x4d0] sm:$0xff]  ;;  %v3351_v57 = vpack.c.bf16 %v679_v51, %v676_v50  ;;  %v710_v50 = vld [vmem:[%s4408_s21 + $0x5a0] sm:$0xff] }
  0xc2   : > { %3334 = vmatpush1.bf16.msra.mxu1 %v3333_v54  ;;  %3163 = vmatprep.subr.bf16.mxu0 %v3162_v56  ;;  %v290_v54 = vld [vmem:[#allocation2 + $0x180] sm:$0xff]  ;;  %v3184_v56 = vpack.c.bf16 %v677_v49, %v674_v47  ;;  %v3186_v59 = vpack.c.bf16 %v684_v53, %v681_v52  ;;  %v327_v47 = vld [vmem:[#allocation2 + $0x2a8] sm:$0xff]  ;;  %v713_v52 = vld [vmem:[%s4408_s21 + $0x5b8] sm:$0xff] }
  0xc3   : > { %3335 = vmatprep.subr.bf16.mxu1 %v4192_v0  ;;  %1974 = vmatmul.mubr.f32.gmra.mrb[6].mxu1 %v260_v62  ;;  %v712_v53 = vld [vmem:[%s4408_s21 + $0x5b0] sm:$0xff] }
  0xc4   : > { %918 = vmatmul.mubr.f32.gmra.mrb[6].mxu0 %v260_v62  ;;  %1978 = vmatprep.mubr.f32.mxu1 %v267_v63  ;;  %v685_v62 = vld [vmem:[%s4408_s21 + $0x4d8] sm:$0xff] }
  0xc5   : > { %923 = vmatprep.mubr.f32.mxu0 %v267_v63  ;;  %3165 = vmatpush1.bf16.msra.mxu0 %v3164_v1  ;;  %v687_v63 = vld [vmem:[%s4408_s21 + $0x4e8] sm:$0xff]  ;;  %v690_v1 = vld [vmem:[%s4408_s21 + $0x500] sm:$0xff]  ;;  %v3354_v5 = vpack.c.bf16 %v685_v62, %v682_v61  ;;  %v716_v61 = vld [vmem:[%s4408_s21 + $0x5d0] sm:$0xff] }
  0xc6   : > { %3337 = vmatpush1.bf16.msra.mxu1 %v3336_v2  ;;  %3167 = vmatprep.subr.bf16.mxu0 %v3166_v4  ;;  %v296_v2 = vld [vmem:[#allocation2 + $0x1b0] sm:$0xff]  ;;  %v3188_v4 = vpack.c.bf16 %v683_v60, %v680_v58  ;;  %v3190_v7 = vpack.c.bf16 %v690_v1, %v687_v63  ;;  %v333_v58 = vld [vmem:[#allocation2 + $0x2d8] sm:$0xff]  ;;  %v719_v63 = vld [vmem:[%s4408_s21 + $0x5e8] sm:$0xff] }
  0xc7   : > { %3338 = vmatprep.subr.bf16.mxu1 %v4192_v0  ;;  %1979 = vmatmul.mubr.f32.gmra.mrb[8].mxu1 %v266_v10  ;;  %v718_v1 = vld [vmem:[%s4408_s21 + $0x5e0] sm:$0xff] }
  0xc8   : > { %924 = vmatmul.mubr.f32.gmra.mrb[8].mxu0 %v266_v10  ;;  %1983 = vmatprep.mubr.f32.mxu1 %v273_v11  ;;  %v691_v10 = vld [vmem:[%s4408_s21 + $0x508] sm:$0xff] }
  0xc9   : > { %929 = vmatprep.mubr.f32.mxu0 %v273_v11  ;;  %3169 = vmatpush1.bf16.msra.mxu0 %v3168_v12  ;;  %v693_v11 = vld [vmem:[%s4408_s21 + $0x518] sm:$0xff]  ;;  %v696_v12 = vld [vmem:[%s4408_s21 + $0x530] sm:$0xff]  ;;  %v3357_v16 = vpack.c.bf16 %v691_v10, %v688_v9  ;;  %v723_v9 = vld [vmem:[%s4408_s21 + $0x608] sm:$0xff] }
  0xca   : > { %3340 = vmatpush1.bf16.msra.mxu1 %v3339_v13  ;;  %3171 = vmatprep.subr.bf16.mxu0 %v3170_v15  ;;  %v302_v13 = vld [vmem:[#allocation2 + $0x1e0] sm:$0xff]  ;;  %v3192_v15 = vpack.c.bf16 %v689_v8, %v686_v6  ;;  %v3194_v18 = vpack.c.bf16 %v696_v12, %v693_v11  ;;  %v345_v8 = vld [vmem:[#allocation2 + $0x338] sm:$0xff]  ;;  %v344_v11 = vld [vmem:[#allocation2 + $0x330] sm:$0xff] }
  0xcb   : > { %3341 = vmatprep.subr.bf16.mxu1 %v4192_v0  ;;  %1984 = vmatmul.mubr.f32.gmra.mrb[10].mxu1 %v272_v21  ;;  %v726_v10 = vld [vmem:[%s4408_s21 + $0x620] sm:$0xff] }
  0xcc   : > { %930 = vmatmul.mubr.f32.gmra.mrb[10].mxu0 %v272_v21  ;;  %1988 = vmatprep.mubr.f32.mxu1 %v279_v22  ;;  %v697_v21 = vld [vmem:[%s4408_s21 + $0x538] sm:$0xff]  ;;  %v3214_v12 = vpack.c.bf16 %v726_v10, %v723_v9  ;;  %v524_v9 = vld [vmem:[#allocation2 + $0x8d0] sm:$0xff] }
  0xcd   : > { %935 = vmatprep.mubr.f32.mxu0 %v279_v22  ;;  %3173 = vmatpush1.bf16.msra.mxu0 %v3172_v23  ;;  %v699_v22 = vld [vmem:[%s4408_s21 + $0x548] sm:$0xff]  ;;  %v702_v23 = vld [vmem:[%s4408_s21 + $0x560] sm:$0xff]  ;;  %v3360_v27 = vpack.c.bf16 %v697_v21, %v694_v20  ;;  %v368_v20 = vld [vmem:[#allocation2 + $0x3f0] sm:$0xff] }
  0xce   : > { %3343 = vmatpush1.bf16.msra.mxu1 %v3342_v24  ;;  %3175 = vmatprep.subr.bf16.mxu0 %v3174_v26  ;;  %v308_v24 = vld [vmem:[#allocation2 + $0x210] sm:$0xff]  ;;  %v3196_v26 = vpack.c.bf16 %v695_v19, %v692_v17  ;;  %v3198_v29 = vpack.c.bf16 %v702_v23, %v699_v22  ;;  %v363_v17 = vld [vmem:[#allocation2 + $0x3c8] sm:$0xff]  ;;  %v369_v19 = vld [vmem:[#allocation2 + $0x3f8] sm:$0xff] }
  0xcf   : > { %3344 = vmatprep.subr.bf16.mxu1 %v4192_v0  ;;  %1989 = vmatmul.mubr.f32.gmra.mrb[12].mxu1 %v278_v32  ;;  %v375_v21 = vld [vmem:[#allocation2 + $0x428] sm:$0xff]  ;;  %v374_v22 = vld [vmem:[#allocation2 + $0x420] sm:$0xff]  ;;  %v381_v23 = vld [vmem:[#allocation2 + $0x458] sm:$0xff] }
  0xd0   : > { %936 = vmatmul.mubr.f32.gmra.mrb[12].mxu0 %v278_v32  ;;  %1993 = vmatprep.mubr.f32.mxu1 %v285_v33  ;;  %v703_v32 = vld [vmem:[%s4408_s21 + $0x568] sm:$0xff]  ;;  %v245_v10 = vld [vmem:[#allocation2 + $0x18] sm:$0xff] }
  0xd1   : > { %941 = vmatprep.mubr.f32.mxu0 %v285_v33  ;;  %3177 = vmatpush1.bf16.msra.mxu0 %v3176_v34  ;;  %v705_v33 = vld [vmem:[%s4408_s21 + $0x578] sm:$0xff]  ;;  %v708_v34 = vld [vmem:[%s4408_s21 + $0x590] sm:$0xff]  ;;  %v3363_v38 = vpack.c.bf16 %v703_v32, %v700_v31 }
  0xd2   : > { %3346 = vmatpush1.bf16.msra.mxu1 %v3345_v35  ;;  %3179 = vmatprep.subr.bf16.mxu0 %v3178_v37  ;;  %v314_v35 = vld [vmem:[#allocation2 + $0x240] sm:$0xff]  ;;  %v3200_v37 = vpack.c.bf16 %v701_v30, %v698_v28  ;;  %v3202_v40 = vpack.c.bf16 %v708_v34, %v705_v33  ;;  %v392_v28 = vld [vmem:[#allocation2 + $0x4b0] sm:$0xff]  ;;  %v405_v31 = vld [vmem:[#allocation2 + $0x518] sm:$0xff] }
  0xd3   : > { %3347 = vmatprep.subr.bf16.mxu1 %v4192_v0  ;;  %1994 = vmatmul.mubr.f32.gmra.mrb[14].mxu1 %v284_v43  ;;  %v398_v30 = vld [vmem:[#allocation2 + $0x4e0] sm:$0xff]  ;;  %v404_v32 = vld [vmem:[#allocation2 + $0x510] sm:$0xff]  ;;  %v411_v33 = vld [vmem:[#allocation2 + $0x548] sm:$0xff] }
  0xd4   : > { %942 = vmatmul.mubr.f32.gmra.mrb[14].mxu0 %v284_v43  ;;  %1998 = vmatprep.mubr.f32.mxu1 %v291_v44  ;;  %v709_v43 = vld [vmem:[%s4408_s21 + $0x598] sm:$0xff]  ;;  %v410_v34 = vld [vmem:[#allocation2 + $0x540] sm:$0xff] }
  0xd5   : > { %947 = vmatprep.mubr.f32.mxu0 %v291_v44  ;;  %3181 = vmatpush1.bf16.msra.mxu0 %v3180_v45  ;;  %v711_v44 = vld [vmem:[%s4408_s21 + $0x5a8] sm:$0xff]  ;;  %v714_v45 = vld [vmem:[%s4408_s21 + $0x5c0] sm:$0xff]  ;;  %v3366_v49 = vpack.c.bf16 %v709_v43, %v706_v42  ;;  %v441_v43 = vld [vmem:[#allocation2 + $0x638] sm:$0xff] }
  0xd6   : > { %3349 = vmatpush1.bf16.msra.mxu1 %v3348_v46  ;;  %3183 = vmatprep.subr.bf16.mxu0 %v3182_v48  ;;  %v320_v46 = vld [vmem:[#allocation2 + $0x270] sm:$0xff]  ;;  %v3204_v48 = vpack.c.bf16 %v707_v41, %v704_v39  ;;  %v3206_v51 = vpack.c.bf16 %v714_v45, %v711_v44  ;;  %v429_v39 = vld [vmem:[#allocation2 + $0x5d8] sm:$0xff]  ;;  %v435_v41 = vld [vmem:[#allocation2 + $0x608] sm:$0xff] }
  0xd7   : > { %3350 = vmatprep.subr.bf16.mxu1 %v4192_v0  ;;  %1999 = vmatmul.mubr.f32.gmra.mrb[16].mxu1 %v290_v54  ;;  %v434_v42 = vld [vmem:[#allocation2 + $0x600] sm:$0xff]  ;;  %v440_v44 = vld [vmem:[#allocation2 + $0x630] sm:$0xff]  ;;  %v447_v45 = vld [vmem:[#allocation2 + $0x668] sm:$0xff] }
  0xd8   : > { %948 = vmatmul.mubr.f32.gmra.mrb[16].mxu0 %v290_v54  ;;  %2003 = vmatprep.mubr.f32.mxu1 %v297_v55  ;;  %v715_v54 = vld [vmem:[%s4408_s21 + $0x5c8] sm:$0xff] }
  0xd9   : > { %953 = vmatprep.mubr.f32.mxu0 %v297_v55  ;;  %3185 = vmatpush1.bf16.msra.mxu0 %v3184_v56  ;;  %v717_v55 = vld [vmem:[%s4408_s21 + $0x5d8] sm:$0xff]  ;;  %v720_v56 = vld [vmem:[%s4408_s21 + $0x5f0] sm:$0xff]  ;;  %v3369_v60 = vpack.c.bf16 %v715_v54, %v712_v53  ;;  %v471_v53 = vld [vmem:[#allocation2 + $0x728] sm:$0xff] }
  0xda   : > { %3352 = vmatpush1.bf16.msra.mxu1 %v3351_v57  ;;  %3187 = vmatprep.subr.bf16.mxu0 %v3186_v59  ;;  %v326_v57 = vld [vmem:[#allocation2 + $0x2a0] sm:$0xff]  ;;  %v3208_v59 = vpack.c.bf16 %v713_v52, %v710_v50  ;;  %v3210_v62 = vpack.c.bf16 %v720_v56, %v717_v55  ;;  %v464_v52 = vld [vmem:[#allocation2 + $0x6f0] sm:$0xff]  ;;  %v477_v55 = vld [vmem:[#allocation2 + $0x758] sm:$0xff] }
  0xdb   : > { %3353 = vmatprep.subr.bf16.mxu1 %v4192_v0  ;;  %2004 = vmatmul.mubr.f32.gmra.mrb[18].mxu1 %v296_v2  ;;  %v458_v50 = vld [vmem:[#allocation2 + $0x6c0] sm:$0xff]  ;;  %v476_v56 = vld [vmem:[#allocation2 + $0x750] sm:$0xff] }
  0xdc   : > { %954 = vmatmul.mubr.f32.gmra.mrb[18].mxu0 %v296_v2  ;;  %2008 = vmatprep.mubr.f32.mxu1 %v303_v3  ;;  %v721_v2 = vld [vmem:[%s4408_s21 + $0x5f8] sm:$0xff]  ;;  %v470_v54 = vld [vmem:[#allocation2 + $0x720] sm:$0xff] }
  0xdd   : > { %959 = vmatprep.mubr.f32.mxu0 %v303_v3  ;;  %3189 = vmatpush1.bf16.msra.mxu0 %v3188_v4  ;;  %v332_v3 = vld [vmem:[#allocation2 + $0x2d0] sm:$0xff]  ;;  %v339_v4 = vld [vmem:[#allocation2 + $0x308] sm:$0xff]  ;;  %v3372_v6 = vpack.c.bf16 %v721_v2, %v718_v1 }
  0xde   : > { %3355 = vmatpush1.bf16.msra.mxu1 %v3354_v5  ;;  %3191 = vmatprep.subr.bf16.mxu0 %v3190_v7  ;;  %v3212_v5 = vpack.c.bf16 %v719_v63, %v716_v61  ;;  %v338_v7 = vld [vmem:[#allocation2 + $0x300] sm:$0xff]  ;;  %v495_v61 = vld [vmem:[#allocation2 + $0x7e8] sm:$0xff]  ;;  %v501_v63 = vld [vmem:[#allocation2 + $0x818] sm:$0xff] }
  0xdf   : > { %3356 = vmatprep.subr.bf16.mxu1 %v4192_v0  ;;  %2009 = vmatmul.mubr.f32.gmra.mrb[20].mxu1 %v302_v13  ;;  %v500_v1 = vld [vmem:[#allocation2 + $0x810] sm:$0xff]  ;;  %v507_v2 = vld [vmem:[#allocation2 + $0x848] sm:$0xff] }
  0xe0   : > { %960 = vmatmul.mubr.f32.gmra.mrb[20].mxu0 %v302_v13  ;;  %2013 = vmatprep.mubr.f32.mxu1 %v309_v14  ;;  %v351_v13 = vld [vmem:[#allocation2 + $0x368] sm:$0xff] }
  0xe1   : > { %965 = vmatprep.mubr.f32.mxu0 %v309_v14  ;;  %3193 = vmatpush1.bf16.msra.mxu0 %v3192_v15  ;;  %v350_v14 = vld [vmem:[#allocation2 + $0x360] sm:$0xff]  ;;  %v357_v15 = vld [vmem:[#allocation2 + $0x398] sm:$0xff] }
  0xe2   : > { %3358 = vmatpush1.bf16.msra.mxu1 %v3357_v16  ;;  %3195 = vmatprep.subr.bf16.mxu0 %v3194_v18  ;;  %v356_v16 = vld [vmem:[#allocation2 + $0x390] sm:$0xff]  ;;  %v362_v18 = vld [vmem:[#allocation2 + $0x3c0] sm:$0xff] }
  0xe3   : > { %3359 = vmatprep.subr.bf16.mxu1 %v4192_v0  ;;  %2014 = vmatmul.mubr.f32.gmra.mrb[22].mxu1 %v308_v24 }
  0xe4   : > { %966 = vmatmul.mubr.f32.gmra.mrb[22].mxu0 %v308_v24  ;;  %2018 = vmatprep.mubr.f32.mxu1 %v315_v25  ;;  %v380_v24 = vld [vmem:[#allocation2 + $0x450] sm:$0xff] }
  0xe5   : > { %971 = vmatprep.mubr.f32.mxu0 %v315_v25  ;;  %3197 = vmatpush1.bf16.msra.mxu0 %v3196_v26  ;;  %v387_v25 = vld [vmem:[#allocation2 + $0x488] sm:$0xff]  ;;  %v386_v26 = vld [vmem:[#allocation2 + $0x480] sm:$0xff] }
  0xe6   : > { %3361 = vmatpush1.bf16.msra.mxu1 %v3360_v27  ;;  %3199 = vmatprep.subr.bf16.mxu0 %v3198_v29  ;;  %v393_v27 = vld [vmem:[#allocation2 + $0x4b8] sm:$0xff]  ;;  %v399_v29 = vld [vmem:[#allocation2 + $0x4e8] sm:$0xff] }
  0xe7   : > { %3362 = vmatprep.subr.bf16.mxu1 %v4192_v0  ;;  %2019 = vmatmul.mubr.f32.gmra.mrb[24].mxu1 %v314_v35 }
  0xe8   : > { %972 = vmatmul.mubr.f32.gmra.mrb[24].mxu0 %v314_v35  ;;  %2023 = vmatprep.mubr.f32.mxu1 %v321_v36  ;;  %v417_v35 = vld [vmem:[#allocation2 + $0x578] sm:$0xff] }
  0xe9   : > { %977 = vmatprep.mubr.f32.mxu0 %v321_v36  ;;  %3201 = vmatpush1.bf16.msra.mxu0 %v3200_v37  ;;  %v416_v36 = vld [vmem:[#allocation2 + $0x570] sm:$0xff]  ;;  %v423_v37 = vld [vmem:[#allocation2 + $0x5a8] sm:$0xff] }
  0xea   : > { %3364 = vmatpush1.bf16.msra.mxu1 %v3363_v38  ;;  %3203 = vmatprep.subr.bf16.mxu0 %v3202_v40  ;;  %v422_v38 = vld [vmem:[#allocation2 + $0x5a0] sm:$0xff]  ;;  %v428_v40 = vld [vmem:[#allocation2 + $0x5d0] sm:$0xff] }
  0xeb   : > { %3365 = vmatprep.subr.bf16.mxu1 %v4192_v0  ;;  %2024 = vmatmul.mubr.f32.gmra.mrb[26].mxu1 %v320_v46 }
  0xec   : > { %978 = vmatmul.mubr.f32.gmra.mrb[26].mxu0 %v320_v46  ;;  %2028 = vmatprep.mubr.f32.mxu1 %v327_v47  ;;  %v446_v46 = vld [vmem:[#allocation2 + $0x660] sm:$0xff] }
  0xed   : > { %983 = vmatprep.mubr.f32.mxu0 %v327_v47  ;;  %3205 = vmatpush1.bf16.msra.mxu0 %v3204_v48  ;;  %v453_v47 = vld [vmem:[#allocation2 + $0x698] sm:$0xff]  ;;  %v452_v48 = vld [vmem:[#allocation2 + $0x690] sm:$0xff] }
  0xee   : > { %3367 = vmatpush1.bf16.msra.mxu1 %v3366_v49  ;;  %3207 = vmatprep.subr.bf16.mxu0 %v3206_v51  ;;  %v459_v49 = vld [vmem:[#allocation2 + $0x6c8] sm:$0xff]  ;;  %v465_v51 = vld [vmem:[#allocation2 + $0x6f8] sm:$0xff] }
  0xef   : > { %3368 = vmatprep.subr.bf16.mxu1 %v4192_v0  ;;  %2029 = vmatmul.mubr.f32.gmra.mrb[28].mxu1 %v326_v57 }
  0xf0   : > { %984 = vmatmul.mubr.f32.gmra.mrb[28].mxu0 %v326_v57  ;;  %2033 = vmatprep.mubr.f32.mxu1 %v333_v58  ;;  %v483_v57 = vld [vmem:[#allocation2 + $0x788] sm:$0xff] }
  0xf1   : > { %989 = vmatprep.mubr.f32.mxu0 %v333_v58  ;;  %3209 = vmatpush1.bf16.msra.mxu0 %v3208_v59  ;;  %v482_v58 = vld [vmem:[#allocation2 + $0x780] sm:$0xff]  ;;  %v489_v59 = vld [vmem:[#allocation2 + $0x7b8] sm:$0xff] }
  0xf2   : > { %3370 = vmatpush1.bf16.msra.mxu1 %v3369_v60  ;;  %3211 = vmatprep.subr.bf16.mxu0 %v3210_v62  ;;  %v488_v60 = vld [vmem:[#allocation2 + $0x7b0] sm:$0xff]  ;;  %v494_v62 = vld [vmem:[#allocation2 + $0x7e0] sm:$0xff] }
  0xf3   : > { %3371 = vmatprep.subr.bf16.mxu1 %v4192_v0  ;;  %2034 = vmatmul.mubr.f32.gmra.mrb[30].mxu1 %v332_v3 }
  0xf4   : > { %990 = vmatmul.mubr.f32.gmra.mrb[30].mxu0 %v332_v3  ;;  %2038 = vmatprep.mubr.f32.mxu1 %v339_v4  ;;  %v506_v3 = vld [vmem:[#allocation2 + $0x840] sm:$0xff] }
  0xf5   : > { %995 = vmatprep.mubr.f32.mxu0 %v339_v4  ;;  %3213 = vmatpush1.bf16.msra.mxu0 %v3212_v5  ;;  %v513_v4 = vld [vmem:[#allocation2 + $0x878] sm:$0xff]  ;;  %v512_v5 = vld [vmem:[#allocation2 + $0x870] sm:$0xff] }
  0xf6   : > { %3373 = vmatpush1.bf16.msra.mxu1 %v3372_v6  ;;  %3215 = vmatprep.subr.bf16.mxu0 %v3214_v12  ;;  %v519_v6 = vld [vmem:[#allocation2 + $0x8a8] sm:$0xff]  ;;  %v725_v12 = vld [vmem:[%s4408_s21 + $0x618] sm:$0xff] }
  0xf7   : > { %3374 = vmatprep.subr.bf16.mxu1 %v4192_v0  ;;  %2039 = vmatmul.mubr.f32.gmra.mrb[32].mxu1 %v338_v7 }
  0xf8   : > { %996 = vmatmul.mubr.f32.gmra.mrb[32].mxu0 %v338_v7  ;;  %2043 = vmatprep.mubr.f32.mxu1 %v345_v8  ;;  %v518_v7 = vld [vmem:[#allocation2 + $0x8a0] sm:$0xff] }
  0xf9   : > { %1001 = vmatprep.mubr.f32.mxu0 %v345_v8  ;;  %v525_v8 = vld [vmem:[#allocation2 + $0x8d8] sm:$0xff] }
  0xfb   : > { %2044 = vmatmul.mubr.f32.gmra.mrb[34].mxu1 %v344_v11 }
  0xfc   : > { %1002 = vmatmul.mubr.f32.gmra.mrb[34].mxu0 %v344_v11  ;;  %2048 = vmatprep.mubr.f32.mxu1 %v351_v13  ;;  %v722_v11 = vld [vmem:[%s4408_s21 + $0x600] sm:$0xff] }
  0xfd   : > { %1007 = vmatprep.mubr.f32.mxu0 %v351_v13  ;;  %v724_v13 = vld [vmem:[%s4408_s21 + $0x610] sm:$0xff] }
  0xff   : > { %2049 = vmatmul.mubr.f32.gmra.mrb[36].mxu1 %v350_v14 }
 0x100   : > { %1008 = vmatmul.mubr.f32.gmra.mrb[36].mxu0 %v350_v14  ;;  %2053 = vmatprep.mubr.f32.mxu1 %v357_v15  ;;  %v727_v14 = vld [vmem:[%s4408_s21 + $0x628] sm:$0xff] }
 0x101   : > { %1013 = vmatprep.mubr.f32.mxu0 %v357_v15  ;;  %v729_v15 = vld [vmem:[%s4408_s21 + $0x638] sm:$0xff] }
 0x103   : > { %2054 = vmatmul.mubr.f32.gmra.mrb[38].mxu1 %v356_v16 }
 0x104   : > { %1014 = vmatmul.mubr.f32.gmra.mrb[38].mxu0 %v356_v16  ;;  %2058 = vmatprep.mubr.f32.mxu1 %v363_v17  ;;  %v732_v16 = vld [vmem:[%s4408_s21 + $0x650] sm:$0xff] }
 0x105   : > { %1019 = vmatprep.mubr.f32.mxu0 %v363_v17  ;;  %v244_v17 = vld [vmem:[#allocation2 + $0x10] sm:$0xff] }
 0x107   : > { %2059 = vmatmul.mubr.f32.gmra.mrb[40].mxu1 %v362_v18 }
 0x108   : > { %1020 = vmatmul.mubr.f32.gmra.mrb[40].mxu0 %v362_v18  ;;  %2063 = vmatprep.mubr.f32.mxu1 %v369_v19  ;;  %v3216_v18 = vpack.c.bf16 %v725_v12, %v722_v11 }
 0x109   : > { %1025 = vmatprep.mubr.f32.mxu0 %v369_v19  ;;  %v251_v19 = vld [vmem:[#allocation2 + $0x48] sm:$0xff] }
 0x10b   : > { %2064 = vmatmul.mubr.f32.gmra.mrb[42].mxu1 %v368_v20 }
 0x10c   : > { %1026 = vmatmul.mubr.f32.gmra.mrb[42].mxu0 %v368_v20  ;;  %2068 = vmatprep.mubr.f32.mxu1 %v375_v21  ;;  %v3375_v20 = vpack.c.bf16 %v727_v14, %v724_v13  ;;  %v758_v13 = vld [vmem:[%s4408_s21 + $0x720] sm:$0xff] }
 0x10d   : > { %1031 = vmatprep.mubr.f32.mxu0 %v375_v21  ;;  %v728_v21 = vld [vmem:[%s4408_s21 + $0x630] sm:$0xff] }
 0x10f   : > { %2069 = vmatmul.mubr.f32.gmra.mrb[44].mxu1 %v374_v22 }
 0x110   : > { %1032 = vmatmul.mubr.f32.gmra.mrb[44].mxu0 %v374_v22  ;;  %2073 = vmatprep.mubr.f32.mxu1 %v381_v23  ;;  %v3218_v22 = vpack.c.bf16 %v732_v16, %v729_v15  ;;  %v761_v15 = vld [vmem:[%s4408_s21 + $0x738] sm:$0xff]  ;;  %v760_v16 = vld [vmem:[%s4408_s21 + $0x730] sm:$0xff] }
 0x111   : > { %1037 = vmatprep.mubr.f32.mxu0 %v381_v23  ;;  %v731_v23 = vld [vmem:[%s4408_s21 + $0x648] sm:$0xff] }
 0x113   : > { %2074 = vmatmul.mubr.f32.gmra.mrb[46].mxu1 %v380_v24 }
 0x114   : > { %1038 = vmatmul.mubr.f32.gmra.mrb[46].mxu0 %v380_v24  ;;  %2078 = vmatprep.mubr.f32.mxu1 %v387_v25  ;;  %v730_v24 = vld [vmem:[%s4408_s21 + $0x640] sm:$0xff] }
 0x115   : > { %1043 = vmatprep.mubr.f32.mxu0 %v387_v25  ;;  %v733_v25 = vld [vmem:[%s4408_s21 + $0x658] sm:$0xff] }
 0x117   : > { %2079 = vmatmul.mubr.f32.gmra.mrb[48].mxu1 %v386_v26 }
 0x118   : > { %1044 = vmatmul.mubr.f32.gmra.mrb[48].mxu0 %v386_v26  ;;  %2083 = vmatprep.mubr.f32.mxu1 %v393_v27  ;;  %v735_v26 = vld [vmem:[%s4408_s21 + $0x668] sm:$0xff] }
 0x119   : > { %1049 = vmatprep.mubr.f32.mxu0 %v393_v27  ;;  %v738_v27 = vld [vmem:[%s4408_s21 + $0x680] sm:$0xff] }
 0x11b   : > { %2084 = vmatmul.mubr.f32.gmra.mrb[50].mxu1 %v392_v28 }
 0x11c   : > { %1050 = vmatmul.mubr.f32.gmra.mrb[50].mxu0 %v392_v28  ;;  %2088 = vmatprep.mubr.f32.mxu1 %v399_v29  ;;  %v250_v28 = vld [vmem:[#allocation2 + $0x40] sm:$0xff] }
 0x11d   : > { %1055 = vmatprep.mubr.f32.mxu0 %v399_v29  ;;  %v257_v29 = vld [vmem:[#allocation2 + $0x78] sm:$0xff] }
 0x11f   : > { %2089 = vmatmul.mubr.f32.gmra.mrb[52].mxu1 %v398_v30 }
 0x120   : > { %1056 = vmatmul.mubr.f32.gmra.mrb[52].mxu0 %v398_v30  ;;  %2093 = vmatprep.mubr.f32.mxu1 %v405_v31  ;;  %v3220_v30 = vpack.c.bf16 %v731_v23, %v728_v21  ;;  %v287_v21 = vld [vmem:[#allocation2 + $0x168] sm:$0xff] }
 0x121   : > { %1061 = vmatprep.mubr.f32.mxu0 %v405_v31  ;;  %v3378_v31 = vpack.c.bf16 %v733_v25, %v730_v24  ;;  %v764_v24 = vld [vmem:[%s4408_s21 + $0x750] sm:$0xff] }
 0x123   : > { %2094 = vmatmul.mubr.f32.gmra.mrb[54].mxu1 %v404_v32 }
 0x124   : > { %1062 = vmatmul.mubr.f32.gmra.mrb[54].mxu0 %v404_v32  ;;  %2098 = vmatprep.mubr.f32.mxu1 %v411_v33  ;;  %v734_v32 = vld [vmem:[%s4408_s21 + $0x660] sm:$0xff] }
 0x125   : > { %1067 = vmatprep.mubr.f32.mxu0 %v411_v33  ;;  %v3222_v33 = vpack.c.bf16 %v738_v27, %v735_v26  ;;  %v767_v26 = vld [vmem:[%s4408_s21 + $0x768] sm:$0xff]  ;;  %v766_v27 = vld [vmem:[%s4408_s21 + $0x760] sm:$0xff] }
 0x127   : > { %2099 = vmatmul.mubr.f32.gmra.mrb[56].mxu1 %v410_v34 }
 0x128   : > { %1068 = vmatmul.mubr.f32.gmra.mrb[56].mxu0 %v410_v34  ;;  %2103 = vmatprep.mubr.f32.mxu1 %v417_v35  ;;  %v737_v34 = vld [vmem:[%s4408_s21 + $0x678] sm:$0xff] }
 0x129   : > { %1073 = vmatprep.mubr.f32.mxu0 %v417_v35  ;;  %v736_v35 = vld [vmem:[%s4408_s21 + $0x670] sm:$0xff] }
 0x12b   : > { %2104 = vmatmul.mubr.f32.gmra.mrb[58].mxu1 %v416_v36 }
 0x12c   : > { %1074 = vmatmul.mubr.f32.gmra.mrb[58].mxu0 %v416_v36  ;;  %2108 = vmatprep.mubr.f32.mxu1 %v423_v37  ;;  %v739_v36 = vld [vmem:[%s4408_s21 + $0x688] sm:$0xff] }
 0x12d   : > { %1079 = vmatprep.mubr.f32.mxu0 %v423_v37  ;;  %v741_v37 = vld [vmem:[%s4408_s21 + $0x698] sm:$0xff] }
 0x12f   : > { %2109 = vmatmul.mubr.f32.gmra.mrb[60].mxu1 %v422_v38 }
 0x130   : > { %1080 = vmatmul.mubr.f32.gmra.mrb[60].mxu0 %v422_v38  ;;  %2113 = vmatprep.mubr.f32.mxu1 %v429_v39  ;;  %v744_v38 = vld [vmem:[%s4408_s21 + $0x6b0] sm:$0xff] }
 0x131   : > { %1085 = vmatprep.mubr.f32.mxu0 %v429_v39  ;;  %v256_v39 = vld [vmem:[#allocation2 + $0x70] sm:$0xff] }
 0x133   : > { %2114 = vmatmul.mubr.f32.gmra.mrb[62].mxu1 %v428_v40 }
 0x134   : > { %1086 = vmatmul.mubr.f32.gmra.mrb[62].mxu0 %v428_v40  ;;  %2118 = vmatprep.mubr.f32.mxu1 %v435_v41  ;;  %v263_v40 = vld [vmem:[#allocation2 + $0xa8] sm:$0xff] }
 0x135   : > { %1091 = vmatprep.mubr.f32.mxu0 %v435_v41  ;;  %v3224_v41 = vpack.c.bf16 %v737_v34, %v734_v32  ;;  %v293_v32 = vld [vmem:[#allocation2 + $0x198] sm:$0xff] }
 0x137   : > { %2119 = vmatmul.mubr.f32.gmra.mrb[64].mxu1 %v434_v42 }
 0x138   : > { %1092 = vmatmul.mubr.f32.gmra.mrb[64].mxu0 %v434_v42  ;;  %2123 = vmatprep.mubr.f32.mxu1 %v441_v43  ;;  %v3381_v42 = vpack.c.bf16 %v739_v36, %v736_v35  ;;  %v770_v35 = vld [vmem:[%s4408_s21 + $0x780] sm:$0xff] }
 0x139   : > { %1097 = vmatprep.mubr.f32.mxu0 %v441_v43  ;;  %v740_v43 = vld [vmem:[%s4408_s21 + $0x690] sm:$0xff] }
 0x13b   : > { %2124 = vmatmul.mubr.f32.gmra.mrb[66].mxu1 %v440_v44 }
 0x13c   : > { %1098 = vmatmul.mubr.f32.gmra.mrb[66].mxu0 %v440_v44  ;;  %2128 = vmatprep.mubr.f32.mxu1 %v447_v45  ;;  %v3226_v44 = vpack.c.bf16 %v744_v38, %v741_v37  ;;  %v773_v37 = vld [vmem:[%s4408_s21 + $0x798] sm:$0xff]  ;;  %v772_v38 = vld [vmem:[%s4408_s21 + $0x790] sm:$0xff] }
 0x13d   : > { %1103 = vmatprep.mubr.f32.mxu0 %v447_v45  ;;  %v743_v45 = vld [vmem:[%s4408_s21 + $0x6a8] sm:$0xff] }
 0x13f   : > { %2129 = vmatmul.mubr.f32.gmra.mrb[68].mxu1 %v446_v46 }
 0x140   : > { %1104 = vmatmul.mubr.f32.gmra.mrb[68].mxu0 %v446_v46  ;;  %2133 = vmatprep.mubr.f32.mxu1 %v453_v47  ;;  %v742_v46 = vld [vmem:[%s4408_s21 + $0x6a0] sm:$0xff] }
 0x141   : > { %1109 = vmatprep.mubr.f32.mxu0 %v453_v47  ;;  %v745_v47 = vld [vmem:[%s4408_s21 + $0x6b8] sm:$0xff] }
 0x143   : > { %2134 = vmatmul.mubr.f32.gmra.mrb[70].mxu1 %v452_v48 }
 0x144   : > { %1110 = vmatmul.mubr.f32.gmra.mrb[70].mxu0 %v452_v48  ;;  %2138 = vmatprep.mubr.f32.mxu1 %v459_v49  ;;  %v747_v48 = vld [vmem:[%s4408_s21 + $0x6c8] sm:$0xff] }
 0x145   : > { %1115 = vmatprep.mubr.f32.mxu0 %v459_v49  ;;  %v750_v49 = vld [vmem:[%s4408_s21 + $0x6e0] sm:$0xff] }
 0x147   : > { %2139 = vmatmul.mubr.f32.gmra.mrb[72].mxu1 %v458_v50 }
 0x148   : > { %1116 = vmatmul.mubr.f32.gmra.mrb[72].mxu0 %v458_v50  ;;  %2143 = vmatprep.mubr.f32.mxu1 %v465_v51  ;;  %v262_v50 = vld [vmem:[#allocation2 + $0xa0] sm:$0xff] }
 0x149   : > { %1121 = vmatprep.mubr.f32.mxu0 %v465_v51  ;;  %v269_v51 = vld [vmem:[#allocation2 + $0xd8] sm:$0xff] }
 0x14b   : > { %2144 = vmatmul.mubr.f32.gmra.mrb[74].mxu1 %v464_v52 }
 0x14c   : > { %1122 = vmatmul.mubr.f32.gmra.mrb[74].mxu0 %v464_v52  ;;  %2148 = vmatprep.mubr.f32.mxu1 %v471_v53  ;;  %v3228_v52 = vpack.c.bf16 %v743_v45, %v740_v43  ;;  %v299_v43 = vld [vmem:[#allocation2 + $0x1c8] sm:$0xff] }
 0x14d   : > { %1127 = vmatprep.mubr.f32.mxu0 %v471_v53  ;;  %v3384_v53 = vpack.c.bf16 %v745_v47, %v742_v46  ;;  %v776_v46 = vld [vmem:[%s4408_s21 + $0x7b0] sm:$0xff] }
 0x14f   : > { %2149 = vmatmul.mubr.f32.gmra.mrb[76].mxu1 %v470_v54 }
 0x150   : > { %1128 = vmatmul.mubr.f32.gmra.mrb[76].mxu0 %v470_v54  ;;  %2153 = vmatprep.mubr.f32.mxu1 %v477_v55  ;;  %v746_v54 = vld [vmem:[%s4408_s21 + $0x6c0] sm:$0xff] }
 0x151   : > { %1133 = vmatprep.mubr.f32.mxu0 %v477_v55  ;;  %v3230_v55 = vpack.c.bf16 %v750_v49, %v747_v48  ;;  %v779_v48 = vld [vmem:[%s4408_s21 + $0x7c8] sm:$0xff]  ;;  %v778_v49 = vld [vmem:[%s4408_s21 + $0x7c0] sm:$0xff] }
 0x153   : > { %2154 = vmatmul.mubr.f32.gmra.mrb[78].mxu1 %v476_v56 }
 0x154   : > { %1134 = vmatmul.mubr.f32.gmra.mrb[78].mxu0 %v476_v56  ;;  %2158 = vmatprep.mubr.f32.mxu1 %v483_v57  ;;  %v749_v56 = vld [vmem:[%s4408_s21 + $0x6d8] sm:$0xff] }
 0x155   : > { %1139 = vmatprep.mubr.f32.mxu0 %v483_v57  ;;  %v748_v57 = vld [vmem:[%s4408_s21 + $0x6d0] sm:$0xff] }
 0x157   : > { %2159 = vmatmul.mubr.f32.gmra.mrb[80].mxu1 %v482_v58 }
 0x158   : > { %1140 = vmatmul.mubr.f32.gmra.mrb[80].mxu0 %v482_v58  ;;  %2163 = vmatprep.mubr.f32.mxu1 %v489_v59  ;;  %v751_v58 = vld [vmem:[%s4408_s21 + $0x6e8] sm:$0xff] }
 0x159   : > { %1145 = vmatprep.mubr.f32.mxu0 %v489_v59  ;;  %v753_v59 = vld [vmem:[%s4408_s21 + $0x6f8] sm:$0xff] }
 0x15b   : > { %2164 = vmatmul.mubr.f32.gmra.mrb[82].mxu1 %v488_v60 }
 0x15c   : > { %1146 = vmatmul.mubr.f32.gmra.mrb[82].mxu0 %v488_v60  ;;  %2168 = vmatprep.mubr.f32.mxu1 %v495_v61  ;;  %v756_v60 = vld [vmem:[%s4408_s21 + $0x710] sm:$0xff] }
 0x15d   : > { %1151 = vmatprep.mubr.f32.mxu0 %v495_v61  ;;  %v268_v61 = vld [vmem:[#allocation2 + $0xd0] sm:$0xff] }
 0x15f   : > { %2169 = vmatmul.mubr.f32.gmra.mrb[84].mxu1 %v494_v62 }
 0x160   : > { %1152 = vmatmul.mubr.f32.gmra.mrb[84].mxu0 %v494_v62  ;;  %2173 = vmatprep.mubr.f32.mxu1 %v501_v63  ;;  %v275_v62 = vld [vmem:[#allocation2 + $0x108] sm:$0xff] }
 0x161   : > { %1157 = vmatprep.mubr.f32.mxu0 %v501_v63  ;;  %v3232_v63 = vpack.c.bf16 %v749_v56, %v746_v54  ;;  %v305_v54 = vld [vmem:[#allocation2 + $0x1f8] sm:$0xff] }
 0x163   : > { %2174 = vmatmul.mubr.f32.gmra.mrb[86].mxu1 %v500_v1 }
 0x164   : > { %1158 = vmatmul.mubr.f32.gmra.mrb[86].mxu0 %v500_v1  ;;  %2178 = vmatprep.mubr.f32.mxu1 %v507_v2  ;;  %v3387_v1 = vpack.c.bf16 %v751_v58, %v748_v57  ;;  %v782_v57 = vld [vmem:[%s4408_s21 + $0x7e0] sm:$0xff] }
 0x165   : > { %1163 = vmatprep.mubr.f32.mxu0 %v507_v2  ;;  %v752_v2 = vld [vmem:[%s4408_s21 + $0x6f0] sm:$0xff] }
 0x167   : > { %2179 = vmatmul.mubr.f32.gmra.mrb[88].mxu1 %v506_v3 }
 0x168   : > { %1164 = vmatmul.mubr.f32.gmra.mrb[88].mxu0 %v506_v3  ;;  %2183 = vmatprep.mubr.f32.mxu1 %v513_v4  ;;  %v3234_v3 = vpack.c.bf16 %v756_v60, %v753_v59  ;;  %v785_v59 = vld [vmem:[%s4408_s21 + $0x7f8] sm:$0xff]  ;;  %v784_v60 = vld [vmem:[%s4408_s21 + $0x7f0] sm:$0xff] }
 0x169   : > { %1169 = vmatprep.mubr.f32.mxu0 %v513_v4  ;;  %v755_v4 = vld [vmem:[%s4408_s21 + $0x708] sm:$0xff] }
 0x16a   : > { %v3236_v11 = vpack.c.bf16 %v755_v4, %v752_v2  ;;  %v311_v2 = vld [vmem:[#allocation2 + $0x228] sm:$0xff] }
 0x16b   : > { %2184 = vmatmul.mubr.f32.gmra.mrb[90].mxu1 %v512_v5 }
 0x16c   : > { %1170 = vmatmul.mubr.f32.gmra.mrb[90].mxu0 %v512_v5  ;;  %2188 = vmatprep.mubr.f32.mxu1 %v519_v6  ;;  %v754_v5 = vld [vmem:[%s4408_s21 + $0x700] sm:$0xff] }
 0x16d   : > { %1175 = vmatprep.mubr.f32.mxu0 %v519_v6  ;;  %v757_v6 = vld [vmem:[%s4408_s21 + $0x718] sm:$0xff] }
 0x16e   : > { %v3390_v12 = vpack.c.bf16 %v757_v6, %v754_v5  ;;  %v788_v5 = vld [vmem:[%s4408_s21 + $0x810] sm:$0xff] }
 0x16f   : > { %2189 = vmatmul.mubr.f32.gmra.mrb[92].mxu1 %v518_v7 }
 0x170   : > { %1176 = vmatmul.mubr.f32.gmra.mrb[92].mxu0 %v518_v7  ;;  %2193 = vmatprep.mubr.f32.mxu1 %v525_v8  ;;  %v759_v7 = vld [vmem:[%s4408_s21 + $0x728] sm:$0xff] }
 0x171   : > { %1181 = vmatprep.mubr.f32.mxu0 %v525_v8  ;;  %v762_v8 = vld [vmem:[%s4408_s21 + $0x740] sm:$0xff] }
 0x172   : > { %v3238_v14 = vpack.c.bf16 %v762_v8, %v759_v7  ;;  %v791_v7 = vld [vmem:[%s4408_s21 + $0x828] sm:$0xff]  ;;  %v790_v8 = vld [vmem:[%s4408_s21 + $0x820] sm:$0xff] }
 0x173   : > { %2194 = vmatmul.mubr.f32.gmra.mrb[94].mxu1 %v524_v9 }
 0x174   : > { %1182 = vmatmul.mubr.f32.gmra.mrb[94].mxu0 %v524_v9  ;;  %2263 = vmatprep.mubr.f32.mxu1 %v245_v10  ;;  %v274_v9 = vld [vmem:[#allocation2 + $0x100] sm:$0xff] }
 0x175   : > { %1252 = vmatprep.mubr.f32.mxu0 %v245_v10  ;;  %v281_v10 = vld [vmem:[#allocation2 + $0x138] sm:$0xff] }
 0x177   : > { %2264 = vmatmul.mubr.f32.vlgmr.msra.gmra.mrb[0].mxu1 %v244_v17 }
 0x178   : > { %1253 = vmatmul.mubr.f32.vlgmr.msra.gmra.mrb[0].mxu0 %v244_v17  ;;  %2268 = vmatprep.mubr.f32.mxu1 %v251_v19  ;;  %v763_v17 = vld [vmem:[%s4408_s21 + $0x748] sm:$0xff] }
 0x179   : > { %3217 = vmatpush1.bf16.msra.mxu0 %v3216_v18  ;;  %3376 = vmatpush1.bf16.msra.mxu1 %v3375_v20  ;;  %v765_v18 = vld [vmem:[%s4408_s21 + $0x758] sm:$0xff]  ;;  %v280_v20 = vld [vmem:[#allocation2 + $0x130] sm:$0xff]  ;;  %v3393_v23 = vpack.c.bf16 %v763_v17, %v760_v16  ;;  %v794_v16 = vld [vmem:[%s4408_s21 + $0x840] sm:$0xff] }
 0x17a   : > { %1258 = vmatprep.mubr.f32.mxu0 %v251_v19  ;;  %3219 = vmatprep.subr.bf16.mxu0 %v3218_v22  ;;  %v768_v19 = vld [vmem:[%s4408_s21 + $0x770] sm:$0xff]  ;;  %v3240_v22 = vpack.c.bf16 %v761_v15, %v758_v13  ;;  %v317_v13 = vld [vmem:[#allocation2 + $0x258] sm:$0xff] }
 0x17b   : > { %3377 = vmatprep.subr.bf16.mxu1 %v4192_v0  ;;  %2269 = vmatmul.mubr.f32.gmra.mrb[2].mxu1 %v250_v28  ;;  %v3242_v25 = vpack.c.bf16 %v768_v19, %v765_v18  ;;  %v797_v18 = vld [vmem:[%s4408_s21 + $0x858] sm:$0xff]  ;;  %v796_v19 = vld [vmem:[%s4408_s21 + $0x850] sm:$0xff] }
 0x17c   : > { %1259 = vmatmul.mubr.f32.gmra.mrb[2].mxu0 %v250_v28  ;;  %2273 = vmatprep.mubr.f32.mxu1 %v257_v29  ;;  %v769_v28 = vld [vmem:[%s4408_s21 + $0x778] sm:$0xff] }
 0x17d   : > { %1264 = vmatprep.mubr.f32.mxu0 %v257_v29  ;;  %3221 = vmatpush1.bf16.msra.mxu0 %v3220_v30  ;;  %v771_v29 = vld [vmem:[%s4408_s21 + $0x788] sm:$0xff]  ;;  %v774_v30 = vld [vmem:[%s4408_s21 + $0x7a0] sm:$0xff]  ;;  %v3396_v34 = vpack.c.bf16 %v769_v28, %v766_v27  ;;  %v800_v27 = vld [vmem:[%s4408_s21 + $0x870] sm:$0xff] }
 0x17e   : > { %3379 = vmatpush1.bf16.msra.mxu1 %v3378_v31  ;;  %3223 = vmatprep.subr.bf16.mxu0 %v3222_v33  ;;  %v286_v31 = vld [vmem:[#allocation2 + $0x160] sm:$0xff]  ;;  %v3244_v33 = vpack.c.bf16 %v767_v26, %v764_v24  ;;  %v3246_v36 = vpack.c.bf16 %v774_v30, %v771_v29  ;;  %v323_v24 = vld [vmem:[#allocation2 + $0x288] sm:$0xff] }
 0x17f   : > { %3380 = vmatprep.subr.bf16.mxu1 %v4192_v0  ;;  %2274 = vmatmul.mubr.f32.gmra.mrb[4].mxu1 %v256_v39  ;;  %v803_v29 = vld [vmem:[%s4408_s21 + $0x888] sm:$0xff]  ;;  %v802_v30 = vld [vmem:[%s4408_s21 + $0x880] sm:$0xff] }
 0x180   : > { %1265 = vmatmul.mubr.f32.gmra.mrb[4].mxu0 %v256_v39  ;;  %2278 = vmatprep.mubr.f32.mxu1 %v263_v40  ;;  %v775_v39 = vld [vmem:[%s4408_s21 + $0x7a8] sm:$0xff] }
 0x181   : > { %1270 = vmatprep.mubr.f32.mxu0 %v263_v40  ;;  %3225 = vmatpush1.bf16.msra.mxu0 %v3224_v41  ;;  %v777_v40 = vld [vmem:[%s4408_s21 + $0x7b8] sm:$0xff]  ;;  %v780_v41 = vld [vmem:[%s4408_s21 + $0x7d0] sm:$0xff]  ;;  %v3399_v45 = vpack.c.bf16 %v775_v39, %v772_v38  ;;  %v806_v38 = vld [vmem:[%s4408_s21 + $0x8a0] sm:$0xff] }
 0x182   : > { %3382 = vmatpush1.bf16.msra.mxu1 %v3381_v42  ;;  %3227 = vmatprep.subr.bf16.mxu0 %v3226_v44  ;;  %v292_v42 = vld [vmem:[#allocation2 + $0x190] sm:$0xff]  ;;  %v3248_v44 = vpack.c.bf16 %v773_v37, %v770_v35  ;;  %v3250_v47 = vpack.c.bf16 %v780_v41, %v777_v40  ;;  %v329_v35 = vld [vmem:[#allocation2 + $0x2b8] sm:$0xff] }
 0x183   : > { %3383 = vmatprep.subr.bf16.mxu1 %v4192_v0  ;;  %2279 = vmatmul.mubr.f32.gmra.mrb[6].mxu1 %v262_v50  ;;  %v809_v40 = vld [vmem:[%s4408_s21 + $0x8b8] sm:$0xff]  ;;  %v808_v41 = vld [vmem:[%s4408_s21 + $0x8b0] sm:$0xff] }
 0x184   : > { %1271 = vmatmul.mubr.f32.gmra.mrb[6].mxu0 %v262_v50  ;;  %2283 = vmatprep.mubr.f32.mxu1 %v269_v51  ;;  %v781_v50 = vld [vmem:[%s4408_s21 + $0x7d8] sm:$0xff] }
 0x185   : > { %1276 = vmatprep.mubr.f32.mxu0 %v269_v51  ;;  %3229 = vmatpush1.bf16.msra.mxu0 %v3228_v52  ;;  %v783_v51 = vld [vmem:[%s4408_s21 + $0x7e8] sm:$0xff]  ;;  %v786_v52 = vld [vmem:[%s4408_s21 + $0x800] sm:$0xff]  ;;  %v3402_v56 = vpack.c.bf16 %v781_v50, %v778_v49  ;;  %v812_v49 = vld [vmem:[%s4408_s21 + $0x8d0] sm:$0xff] }
 0x186   : > { %3385 = vmatpush1.bf16.msra.mxu1 %v3384_v53  ;;  %3231 = vmatprep.subr.bf16.mxu0 %v3230_v55  ;;  %v298_v53 = vld [vmem:[#allocation2 + $0x1c0] sm:$0xff]  ;;  %v3252_v55 = vpack.c.bf16 %v779_v48, %v776_v46  ;;  %v3254_v58 = vpack.c.bf16 %v786_v52, %v783_v51  ;;  %v335_v46 = vld [vmem:[#allocation2 + $0x2e8] sm:$0xff] }
 0x187   : > { %3386 = vmatprep.subr.bf16.mxu1 %v4192_v0  ;;  %2284 = vmatmul.mubr.f32.gmra.mrb[8].mxu1 %v268_v61  ;;  %v815_v51 = vld [vmem:[%s4408_s21 + $0x8e8] sm:$0xff]  ;;  %v814_v52 = vld [vmem:[%s4408_s21 + $0x8e0] sm:$0xff] }
 0x188   : > { %1277 = vmatmul.mubr.f32.gmra.mrb[8].mxu0 %v268_v61  ;;  %2288 = vmatprep.mubr.f32.mxu1 %v275_v62  ;;  %v787_v61 = vld [vmem:[%s4408_s21 + $0x808] sm:$0xff] }
 0x189   : > { %1282 = vmatprep.mubr.f32.mxu0 %v275_v62  ;;  %3233 = vmatpush1.bf16.msra.mxu0 %v3232_v63  ;;  %v789_v62 = vld [vmem:[%s4408_s21 + $0x818] sm:$0xff]  ;;  %v792_v63 = vld [vmem:[%s4408_s21 + $0x830] sm:$0xff]  ;;  %v3405_v4 = vpack.c.bf16 %v787_v61, %v784_v60  ;;  %v346_v60 = vld [vmem:[#allocation2 + $0x340] sm:$0xff] }
 0x18a   : > { %3388 = vmatpush1.bf16.msra.mxu1 %v3387_v1  ;;  %3235 = vmatprep.subr.bf16.mxu0 %v3234_v3  ;;  %v304_v1 = vld [vmem:[#allocation2 + $0x1f0] sm:$0xff]  ;;  %v3256_v3 = vpack.c.bf16 %v785_v59, %v782_v57  ;;  %v3258_v6 = vpack.c.bf16 %v792_v63, %v789_v62  ;;  %v347_v59 = vld [vmem:[#allocation2 + $0x348] sm:$0xff]  ;;  %v353_v61 = vld [vmem:[#allocation2 + $0x378] sm:$0xff] }
 0x18b   : > { %3389 = vmatprep.subr.bf16.mxu1 %v4192_v0  ;;  %2289 = vmatmul.mubr.f32.gmra.mrb[10].mxu1 %v274_v9  ;;  %v352_v62 = vld [vmem:[#allocation2 + $0x370] sm:$0xff]  ;;  %v358_v63 = vld [vmem:[#allocation2 + $0x3a0] sm:$0xff] }
 0x18c   : > { %1283 = vmatmul.mubr.f32.gmra.mrb[10].mxu0 %v274_v9  ;;  %2293 = vmatprep.mubr.f32.mxu1 %v281_v10  ;;  %v793_v9 = vld [vmem:[%s4408_s21 + $0x838] sm:$0xff] }
 0x18d   : > { %1288 = vmatprep.mubr.f32.mxu0 %v281_v10  ;;  %3237 = vmatpush1.bf16.msra.mxu0 %v3236_v11  ;;  %v795_v10 = vld [vmem:[%s4408_s21 + $0x848] sm:$0xff]  ;;  %v798_v11 = vld [vmem:[%s4408_s21 + $0x860] sm:$0xff]  ;;  %v3408_v15 = vpack.c.bf16 %v793_v9, %v790_v8  ;;  %v389_v9 = vld [vmem:[#allocation2 + $0x498] sm:$0xff] }
 0x18e   : > { %3391 = vmatpush1.bf16.msra.mxu1 %v3390_v12  ;;  %3239 = vmatprep.subr.bf16.mxu0 %v3238_v14  ;;  %v310_v12 = vld [vmem:[#allocation2 + $0x220] sm:$0xff]  ;;  %v3260_v14 = vpack.c.bf16 %v791_v7, %v788_v5  ;;  %v3262_v17 = vpack.c.bf16 %v798_v11, %v795_v10  ;;  %v377_v5 = vld [vmem:[#allocation2 + $0x438] sm:$0xff]  ;;  %v383_v7 = vld [vmem:[#allocation2 + $0x468] sm:$0xff] }
 0x18f   : > { %3392 = vmatprep.subr.bf16.mxu1 %v4192_v0  ;;  %2294 = vmatmul.mubr.f32.gmra.mrb[12].mxu1 %v280_v20  ;;  %v382_v8 = vld [vmem:[#allocation2 + $0x460] sm:$0xff]  ;;  %v388_v10 = vld [vmem:[#allocation2 + $0x490] sm:$0xff]  ;;  %v395_v11 = vld [vmem:[#allocation2 + $0x4c8] sm:$0xff] }
 0x190   : > { %1289 = vmatmul.mubr.f32.gmra.mrb[12].mxu0 %v280_v20  ;;  %2298 = vmatprep.mubr.f32.mxu1 %v287_v21  ;;  %v799_v20 = vld [vmem:[%s4408_s21 + $0x868] sm:$0xff] }
 0x191   : > { %1294 = vmatprep.mubr.f32.mxu0 %v287_v21  ;;  %3241 = vmatpush1.bf16.msra.mxu0 %v3240_v22  ;;  %v801_v21 = vld [vmem:[%s4408_s21 + $0x878] sm:$0xff]  ;;  %v804_v22 = vld [vmem:[%s4408_s21 + $0x890] sm:$0xff]  ;;  %v3411_v26 = vpack.c.bf16 %v799_v20, %v796_v19  ;;  %v419_v19 = vld [vmem:[#allocation2 + $0x588] sm:$0xff] }
 0x192   : > { %3394 = vmatpush1.bf16.msra.mxu1 %v3393_v23  ;;  %3243 = vmatprep.subr.bf16.mxu0 %v3242_v25  ;;  %v316_v23 = vld [vmem:[#allocation2 + $0x250] sm:$0xff]  ;;  %v3264_v25 = vpack.c.bf16 %v797_v18, %v794_v16  ;;  %v3266_v28 = vpack.c.bf16 %v804_v22, %v801_v21  ;;  %v406_v16 = vld [vmem:[#allocation2 + $0x520] sm:$0xff]  ;;  %v425_v21 = vld [vmem:[#allocation2 + $0x5b8] sm:$0xff] }
 0x193   : > { %3395 = vmatprep.subr.bf16.mxu1 %v4192_v0  ;;  %2299 = vmatmul.mubr.f32.gmra.mrb[14].mxu1 %v286_v31  ;;  %v412_v18 = vld [vmem:[#allocation2 + $0x550] sm:$0xff]  ;;  %v418_v20 = vld [vmem:[#allocation2 + $0x580] sm:$0xff] }
 0x194   : > { %1295 = vmatmul.mubr.f32.gmra.mrb[14].mxu0 %v286_v31  ;;  %2303 = vmatprep.mubr.f32.mxu1 %v293_v32  ;;  %v805_v31 = vld [vmem:[%s4408_s21 + $0x898] sm:$0xff]  ;;  %v424_v22 = vld [vmem:[#allocation2 + $0x5b0] sm:$0xff] }
 0x195   : > { %1300 = vmatprep.mubr.f32.mxu0 %v293_v32  ;;  %3245 = vmatpush1.bf16.msra.mxu0 %v3244_v33  ;;  %v807_v32 = vld [vmem:[%s4408_s21 + $0x8a8] sm:$0xff]  ;;  %v810_v33 = vld [vmem:[%s4408_s21 + $0x8c0] sm:$0xff]  ;;  %v3414_v37 = vpack.c.bf16 %v805_v31, %v802_v30  ;;  %v448_v30 = vld [vmem:[#allocation2 + $0x670] sm:$0xff] }
 0x196   : > { %3397 = vmatpush1.bf16.msra.mxu1 %v3396_v34  ;;  %3247 = vmatprep.subr.bf16.mxu0 %v3246_v36  ;;  %v322_v34 = vld [vmem:[#allocation2 + $0x280] sm:$0xff]  ;;  %v3268_v36 = vpack.c.bf16 %v803_v29, %v800_v27  ;;  %v3270_v39 = vpack.c.bf16 %v810_v33, %v807_v32  ;;  %v443_v27 = vld [vmem:[#allocation2 + $0x648] sm:$0xff]  ;;  %v449_v29 = vld [vmem:[#allocation2 + $0x678] sm:$0xff] }
 0x197   : > { %3398 = vmatprep.subr.bf16.mxu1 %v4192_v0  ;;  %2304 = vmatmul.mubr.f32.gmra.mrb[16].mxu1 %v292_v42  ;;  %v455_v31 = vld [vmem:[#allocation2 + $0x6a8] sm:$0xff]  ;;  %v454_v32 = vld [vmem:[#allocation2 + $0x6a0] sm:$0xff]  ;;  %v461_v33 = vld [vmem:[#allocation2 + $0x6d8] sm:$0xff] }
 0x198   : > { %1301 = vmatmul.mubr.f32.gmra.mrb[16].mxu0 %v292_v42  ;;  %2308 = vmatprep.mubr.f32.mxu1 %v299_v43  ;;  %v811_v42 = vld [vmem:[%s4408_s21 + $0x8c8] sm:$0xff] }
 0x199   : > { %1306 = vmatprep.mubr.f32.mxu0 %v299_v43  ;;  %3249 = vmatpush1.bf16.msra.mxu0 %v3248_v44  ;;  %v813_v43 = vld [vmem:[%s4408_s21 + $0x8d8] sm:$0xff]  ;;  %v816_v44 = vld [vmem:[%s4408_s21 + $0x8f0] sm:$0xff]  ;;  %v3417_v48 = vpack.c.bf16 %v811_v42, %v808_v41 }
 0x19a   : > { %3400 = vmatpush1.bf16.msra.mxu1 %v3399_v45  ;;  %3251 = vmatprep.subr.bf16.mxu0 %v3250_v47  ;;  %v328_v45 = vld [vmem:[#allocation2 + $0x2b0] sm:$0xff]  ;;  %v3272_v47 = vpack.c.bf16 %v809_v40, %v806_v38  ;;  %v3274_v50 = vpack.c.bf16 %v816_v44, %v813_v43  ;;  %v478_v40 = vld [vmem:[#allocation2 + $0x760] sm:$0xff]  ;;  %v485_v41 = vld [vmem:[#allocation2 + $0x798] sm:$0xff] }
 0x19b   : > { %3401 = vmatprep.subr.bf16.mxu1 %v4192_v0  ;;  %2309 = vmatmul.mubr.f32.gmra.mrb[18].mxu1 %v298_v53  ;;  %v472_v38 = vld [vmem:[#allocation2 + $0x730] sm:$0xff]  ;;  %v491_v43 = vld [vmem:[#allocation2 + $0x7c8] sm:$0xff]  ;;  %v490_v44 = vld [vmem:[#allocation2 + $0x7c0] sm:$0xff] }
 0x19c   : > { %1307 = vmatmul.mubr.f32.gmra.mrb[18].mxu0 %v298_v53  ;;  %2313 = vmatprep.mubr.f32.mxu1 %v305_v54  ;;  %v817_v53 = vld [vmem:[%s4408_s21 + $0x8f8] sm:$0xff]  ;;  %v484_v42 = vld [vmem:[#allocation2 + $0x790] sm:$0xff] }
 0x19d   : > { %1312 = vmatprep.mubr.f32.mxu0 %v305_v54  ;;  %3253 = vmatpush1.bf16.msra.mxu0 %v3252_v55  ;;  %v334_v54 = vld [vmem:[#allocation2 + $0x2e0] sm:$0xff]  ;;  %v341_v55 = vld [vmem:[#allocation2 + $0x318] sm:$0xff]  ;;  %v3420_v57 = vpack.c.bf16 %v817_v53, %v814_v52 }
 0x19e   : > { %3403 = vmatpush1.bf16.msra.mxu1 %v3402_v56  ;;  %3255 = vmatprep.subr.bf16.mxu0 %v3254_v58  ;;  %v3276_v56 = vpack.c.bf16 %v815_v51, %v812_v49  ;;  %v340_v58 = vld [vmem:[#allocation2 + $0x310] sm:$0xff]  ;;  %v509_v49 = vld [vmem:[#allocation2 + $0x858] sm:$0xff]  ;;  %v515_v51 = vld [vmem:[#allocation2 + $0x888] sm:$0xff] }
 0x19f   : > { %3404 = vmatprep.subr.bf16.mxu1 %v4192_v0  ;;  %2314 = vmatmul.mubr.f32.gmra.mrb[20].mxu1 %v304_v1  ;;  %v514_v52 = vld [vmem:[#allocation2 + $0x880] sm:$0xff]  ;;  %v521_v53 = vld [vmem:[#allocation2 + $0x8b8] sm:$0xff] }
 0x1a0   : > { %1313 = vmatmul.mubr.f32.gmra.mrb[20].mxu0 %v304_v1  ;;  %2318 = vmatprep.mubr.f32.mxu1 %v311_v2  ;;  %v365_v1 = vld [vmem:[#allocation2 + $0x3d8] sm:$0xff] }
 0x1a1   : > { %1318 = vmatprep.mubr.f32.mxu0 %v311_v2  ;;  %3257 = vmatpush1.bf16.msra.mxu0 %v3256_v3  ;;  %v364_v2 = vld [vmem:[#allocation2 + $0x3d0] sm:$0xff]  ;;  %v371_v3 = vld [vmem:[#allocation2 + $0x408] sm:$0xff] }
 0x1a2   : > { %3406 = vmatpush1.bf16.msra.mxu1 %v3405_v4  ;;  %3259 = vmatprep.subr.bf16.mxu0 %v3258_v6  ;;  %v370_v4 = vld [vmem:[#allocation2 + $0x400] sm:$0xff]  ;;  %v376_v6 = vld [vmem:[#allocation2 + $0x430] sm:$0xff] }
 0x1a3   : > { %3407 = vmatprep.subr.bf16.mxu1 %v4192_v0  ;;  %2319 = vmatmul.mubr.f32.gmra.mrb[22].mxu1 %v310_v12 }
 0x1a4   : > { %1319 = vmatmul.mubr.f32.gmra.mrb[22].mxu0 %v310_v12  ;;  %2323 = vmatprep.mubr.f32.mxu1 %v317_v13  ;;  %v394_v12 = vld [vmem:[#allocation2 + $0x4c0] sm:$0xff] }
 0x1a5   : > { %1324 = vmatprep.mubr.f32.mxu0 %v317_v13  ;;  %3261 = vmatpush1.bf16.msra.mxu0 %v3260_v14  ;;  %v401_v13 = vld [vmem:[#allocation2 + $0x4f8] sm:$0xff]  ;;  %v400_v14 = vld [vmem:[#allocation2 + $0x4f0] sm:$0xff] }
 0x1a6   : > { %3409 = vmatpush1.bf16.msra.mxu1 %v3408_v15  ;;  %3263 = vmatprep.subr.bf16.mxu0 %v3262_v17  ;;  %v407_v15 = vld [vmem:[#allocation2 + $0x528] sm:$0xff]  ;;  %v413_v17 = vld [vmem:[#allocation2 + $0x558] sm:$0xff] }
 0x1a7   : > { %3410 = vmatprep.subr.bf16.mxu1 %v4192_v0  ;;  %2324 = vmatmul.mubr.f32.gmra.mrb[24].mxu1 %v316_v23 }
 0x1a8   : > { %1325 = vmatmul.mubr.f32.gmra.mrb[24].mxu0 %v316_v23  ;;  %2328 = vmatprep.mubr.f32.mxu1 %v323_v24  ;;  %v431_v23 = vld [vmem:[#allocation2 + $0x5e8] sm:$0xff] }
 0x1a9   : > { %1330 = vmatprep.mubr.f32.mxu0 %v323_v24  ;;  %3265 = vmatpush1.bf16.msra.mxu0 %v3264_v25  ;;  %v430_v24 = vld [vmem:[#allocation2 + $0x5e0] sm:$0xff]  ;;  %v437_v25 = vld [vmem:[#allocation2 + $0x618] sm:$0xff] }
 0x1aa   : > { %3412 = vmatpush1.bf16.msra.mxu1 %v3411_v26  ;;  %3267 = vmatprep.subr.bf16.mxu0 %v3266_v28  ;;  %v436_v26 = vld [vmem:[#allocation2 + $0x610] sm:$0xff]  ;;  %v442_v28 = vld [vmem:[#allocation2 + $0x640] sm:$0xff] }
 0x1ab   : > { %3413 = vmatprep.subr.bf16.mxu1 %v4192_v0  ;;  %2329 = vmatmul.mubr.f32.gmra.mrb[26].mxu1 %v322_v34 }
 0x1ac   : > { %1331 = vmatmul.mubr.f32.gmra.mrb[26].mxu0 %v322_v34  ;;  %2333 = vmatprep.mubr.f32.mxu1 %v329_v35  ;;  %v460_v34 = vld [vmem:[#allocation2 + $0x6d0] sm:$0xff] }
 0x1ad   : > { %1336 = vmatprep.mubr.f32.mxu0 %v329_v35  ;;  %3269 = vmatpush1.bf16.msra.mxu0 %v3268_v36  ;;  %v467_v35 = vld [vmem:[#allocation2 + $0x708] sm:$0xff]  ;;  %v466_v36 = vld [vmem:[#allocation2 + $0x700] sm:$0xff] }
 0x1ae   : > { %3415 = vmatpush1.bf16.msra.mxu1 %v3414_v37  ;;  %3271 = vmatprep.subr.bf16.mxu0 %v3270_v39  ;;  %v473_v37 = vld [vmem:[#allocation2 + $0x738] sm:$0xff]  ;;  %v479_v39 = vld [vmem:[#allocation2 + $0x768] sm:$0xff] }
 0x1af   : > { %3416 = vmatprep.subr.bf16.mxu1 %v4192_v0  ;;  %2334 = vmatmul.mubr.f32.gmra.mrb[28].mxu1 %v328_v45 }
 0x1b0   : > { %1337 = vmatmul.mubr.f32.gmra.mrb[28].mxu0 %v328_v45  ;;  %2338 = vmatprep.mubr.f32.mxu1 %v335_v46  ;;  %v497_v45 = vld [vmem:[#allocation2 + $0x7f8] sm:$0xff] }
 0x1b1   : > { %1342 = vmatprep.mubr.f32.mxu0 %v335_v46  ;;  %3273 = vmatpush1.bf16.msra.mxu0 %v3272_v47  ;;  %v496_v46 = vld [vmem:[#allocation2 + $0x7f0] sm:$0xff]  ;;  %v503_v47 = vld [vmem:[#allocation2 + $0x828] sm:$0xff] }
 0x1b2   : > { %3418 = vmatpush1.bf16.msra.mxu1 %v3417_v48  ;;  %3275 = vmatprep.subr.bf16.mxu0 %v3274_v50  ;;  %v502_v48 = vld [vmem:[#allocation2 + $0x820] sm:$0xff]  ;;  %v508_v50 = vld [vmem:[#allocation2 + $0x850] sm:$0xff] }
 0x1b3   : > { %3419 = vmatprep.subr.bf16.mxu1 %v4192_v0  ;;  %2339 = vmatmul.mubr.f32.gmra.mrb[30].mxu1 %v334_v54  ;;  %v359_v0 = vld [vmem:[#allocation2 + $0x3a8] sm:$0xff] }
 0x1b4   : > { %1343 = vmatmul.mubr.f32.gmra.mrb[30].mxu0 %v334_v54  ;;  %2343 = vmatprep.mubr.f32.mxu1 %v341_v55  ;;  %v520_v54 = vld [vmem:[#allocation2 + $0x8b0] sm:$0xff] }
 0x1b5   : > { %1348 = vmatprep.mubr.f32.mxu0 %v341_v55  ;;  %3277 = vmatpush1.bf16.msra.mxu0 %v3276_v56  ;;  %v527_v55 = vld [vmem:[#allocation2 + $0x8e8] sm:$0xff]  ;;  %v526_v56 = vld [vmem:[#allocation2 + $0x8e0] sm:$0xff] }
 0x1b6   : > { %3421 = vmatpush1.bf16.msra.mxu1 %v3420_v57  ;;  %v247_v57 = vld [vmem:[#allocation2 + $0x28] sm:$0xff] }
 0x1b7   : > { %2344 = vmatmul.mubr.f32.gmra.mrb[32].mxu1 %v340_v58 }
 0x1b8   : > { %1349 = vmatmul.mubr.f32.gmra.mrb[32].mxu0 %v340_v58  ;;  %2348 = vmatprep.mubr.f32.mxu1 %v347_v59  ;;  %v246_v58 = vld [vmem:[#allocation2 + $0x20] sm:$0xff] }
 0x1b9   : > { %1354 = vmatprep.mubr.f32.mxu0 %v347_v59  ;;  %v253_v59 = vld [vmem:[#allocation2 + $0x58] sm:$0xff] }
 0x1bb   : > { %2349 = vmatmul.mubr.f32.gmra.mrb[34].mxu1 %v346_v60 }
 0x1bc   : > { %1355 = vmatmul.mubr.f32.gmra.mrb[34].mxu0 %v346_v60  ;;  %2353 = vmatprep.mubr.f32.mxu1 %v353_v61  ;;  %v252_v60 = vld [vmem:[#allocation2 + $0x50] sm:$0xff] }
 0x1bd   : > { %1360 = vmatprep.mubr.f32.mxu0 %v353_v61  ;;  %v259_v61 = vld [vmem:[#allocation2 + $0x88] sm:$0xff] }
 0x1bf   : > { %2354 = vmatmul.mubr.f32.gmra.mrb[36].mxu1 %v352_v62 }
 0x1c0   : > { %1361 = vmatmul.mubr.f32.gmra.mrb[36].mxu0 %v352_v62  ;;  %2358 = vmatprep.mubr.f32.mxu1 %v359_v0  ;;  %v258_v62 = vld [vmem:[#allocation2 + $0x80] sm:$0xff] }
 0x1c1   : > { %1366 = vmatprep.mubr.f32.mxu0 %v359_v0  ;;  %v265_v0 = vld [vmem:[#allocation2 + $0xb8] sm:$0xff] }
 0x1c3   : > { %2359 = vmatmul.mubr.f32.gmra.mrb[38].mxu1 %v358_v63 }
 0x1c4   : > { %1367 = vmatmul.mubr.f32.gmra.mrb[38].mxu0 %v358_v63  ;;  %2363 = vmatprep.mubr.f32.mxu1 %v365_v1  ;;  %v264_v63 = vld [vmem:[#allocation2 + $0xb0] sm:$0xff] }
 0x1c5   : > { %1372 = vmatprep.mubr.f32.mxu0 %v365_v1  ;;  %v271_v1 = vld [vmem:[#allocation2 + $0xe8] sm:$0xff] }
 0x1c7   : > { %2364 = vmatmul.mubr.f32.gmra.mrb[40].mxu1 %v364_v2 }
 0x1c8   : > { %1373 = vmatmul.mubr.f32.gmra.mrb[40].mxu0 %v364_v2  ;;  %2368 = vmatprep.mubr.f32.mxu1 %v371_v3  ;;  %v270_v2 = vld [vmem:[#allocation2 + $0xe0] sm:$0xff] }
 0x1c9   : > { %1378 = vmatprep.mubr.f32.mxu0 %v371_v3  ;;  %v277_v3 = vld [vmem:[#allocation2 + $0x118] sm:$0xff] }
 0x1cb   : > { %2369 = vmatmul.mubr.f32.gmra.mrb[42].mxu1 %v370_v4 }
 0x1cc   : > { %1379 = vmatmul.mubr.f32.gmra.mrb[42].mxu0 %v370_v4  ;;  %2373 = vmatprep.mubr.f32.mxu1 %v377_v5  ;;  %v276_v4 = vld [vmem:[#allocation2 + $0x110] sm:$0xff] }
 0x1cd   : > { %1384 = vmatprep.mubr.f32.mxu0 %v377_v5  ;;  %v283_v5 = vld [vmem:[#allocation2 + $0x148] sm:$0xff] }
 0x1cf   : > { %2374 = vmatmul.mubr.f32.gmra.mrb[44].mxu1 %v376_v6 }
 0x1d0   : > { %1385 = vmatmul.mubr.f32.gmra.mrb[44].mxu0 %v376_v6  ;;  %2378 = vmatprep.mubr.f32.mxu1 %v383_v7  ;;  %v282_v6 = vld [vmem:[#allocation2 + $0x140] sm:$0xff] }
 0x1d1   : > { %1390 = vmatprep.mubr.f32.mxu0 %v383_v7  ;;  %v289_v7 = vld [vmem:[#allocation2 + $0x178] sm:$0xff] }
 0x1d3   : > { %2379 = vmatmul.mubr.f32.gmra.mrb[46].mxu1 %v382_v8 }
 0x1d4   : > { %1391 = vmatmul.mubr.f32.gmra.mrb[46].mxu0 %v382_v8  ;;  %2383 = vmatprep.mubr.f32.mxu1 %v389_v9  ;;  %v288_v8 = vld [vmem:[#allocation2 + $0x170] sm:$0xff] }
 0x1d5   : > { %1396 = vmatprep.mubr.f32.mxu0 %v389_v9  ;;  %v295_v9 = vld [vmem:[#allocation2 + $0x1a8] sm:$0xff] }
 0x1d7   : > { %2384 = vmatmul.mubr.f32.gmra.mrb[48].mxu1 %v388_v10 }
 0x1d8   : > { %1397 = vmatmul.mubr.f32.gmra.mrb[48].mxu0 %v388_v10  ;;  %2388 = vmatprep.mubr.f32.mxu1 %v395_v11  ;;  %v294_v10 = vld [vmem:[#allocation2 + $0x1a0] sm:$0xff] }
 0x1d9   : > { %1402 = vmatprep.mubr.f32.mxu0 %v395_v11  ;;  %v301_v11 = vld [vmem:[#allocation2 + $0x1d8] sm:$0xff] }
 0x1db   : > { %2389 = vmatmul.mubr.f32.gmra.mrb[50].mxu1 %v394_v12 }
 0x1dc   : > { %1403 = vmatmul.mubr.f32.gmra.mrb[50].mxu0 %v394_v12  ;;  %2393 = vmatprep.mubr.f32.mxu1 %v401_v13  ;;  %v300_v12 = vld [vmem:[#allocation2 + $0x1d0] sm:$0xff] }
 0x1dd   : > { %1408 = vmatprep.mubr.f32.mxu0 %v401_v13  ;;  %v307_v13 = vld [vmem:[#allocation2 + $0x208] sm:$0xff] }
 0x1df   : > { %2394 = vmatmul.mubr.f32.gmra.mrb[52].mxu1 %v400_v14 }
 0x1e0   : > { %1409 = vmatmul.mubr.f32.gmra.mrb[52].mxu0 %v400_v14  ;;  %2398 = vmatprep.mubr.f32.mxu1 %v407_v15  ;;  %v306_v14 = vld [vmem:[#allocation2 + $0x200] sm:$0xff] }
 0x1e1   : > { %1414 = vmatprep.mubr.f32.mxu0 %v407_v15  ;;  %v313_v15 = vld [vmem:[#allocation2 + $0x238] sm:$0xff] }
 0x1e3   : > { %2399 = vmatmul.mubr.f32.gmra.mrb[54].mxu1 %v406_v16 }
 0x1e4   : > { %1415 = vmatmul.mubr.f32.gmra.mrb[54].mxu0 %v406_v16  ;;  %2403 = vmatprep.mubr.f32.mxu1 %v413_v17  ;;  %v312_v16 = vld [vmem:[#allocation2 + $0x230] sm:$0xff] }
 0x1e5   : > { %1420 = vmatprep.mubr.f32.mxu0 %v413_v17  ;;  %v319_v17 = vld [vmem:[#allocation2 + $0x268] sm:$0xff] }
 0x1e7   : > { %2404 = vmatmul.mubr.f32.gmra.mrb[56].mxu1 %v412_v18 }
 0x1e8   : > { %1421 = vmatmul.mubr.f32.gmra.mrb[56].mxu0 %v412_v18  ;;  %2408 = vmatprep.mubr.f32.mxu1 %v419_v19  ;;  %v318_v18 = vld [vmem:[#allocation2 + $0x260] sm:$0xff] }
 0x1e9   : > { %1426 = vmatprep.mubr.f32.mxu0 %v419_v19  ;;  %v325_v19 = vld [vmem:[#allocation2 + $0x298] sm:$0xff] }
 0x1eb   : > { %2409 = vmatmul.mubr.f32.gmra.mrb[58].mxu1 %v418_v20 }
 0x1ec   : > { %1427 = vmatmul.mubr.f32.gmra.mrb[58].mxu0 %v418_v20  ;;  %2413 = vmatprep.mubr.f32.mxu1 %v425_v21  ;;  %v324_v20 = vld [vmem:[#allocation2 + $0x290] sm:$0xff] }
 0x1ed   : > { %1432 = vmatprep.mubr.f32.mxu0 %v425_v21  ;;  %v331_v21 = vld [vmem:[#allocation2 + $0x2c8] sm:$0xff] }
 0x1ef   : > { %2414 = vmatmul.mubr.f32.gmra.mrb[60].mxu1 %v424_v22 }
 0x1f0   : > { %1433 = vmatmul.mubr.f32.gmra.mrb[60].mxu0 %v424_v22  ;;  %2418 = vmatprep.mubr.f32.mxu1 %v431_v23  ;;  %v330_v22 = vld [vmem:[#allocation2 + $0x2c0] sm:$0xff] }
 0x1f1   : > { %1438 = vmatprep.mubr.f32.mxu0 %v431_v23  ;;  %v337_v23 = vld [vmem:[#allocation2 + $0x2f8] sm:$0xff] }
 0x1f3   : > { %2419 = vmatmul.mubr.f32.gmra.mrb[62].mxu1 %v430_v24 }
 0x1f4   : > { %1439 = vmatmul.mubr.f32.gmra.mrb[62].mxu0 %v430_v24  ;;  %2423 = vmatprep.mubr.f32.mxu1 %v437_v25  ;;  %v336_v24 = vld [vmem:[#allocation2 + $0x2f0] sm:$0xff] }
 0x1f5   : > { %1444 = vmatprep.mubr.f32.mxu0 %v437_v25  ;;  %v343_v25 = vld [vmem:[#allocation2 + $0x328] sm:$0xff] }
 0x1f7   : > { %2424 = vmatmul.mubr.f32.gmra.mrb[64].mxu1 %v436_v26 }
 0x1f8   : > { %1445 = vmatmul.mubr.f32.gmra.mrb[64].mxu0 %v436_v26  ;;  %2428 = vmatprep.mubr.f32.mxu1 %v443_v27  ;;  %v342_v26 = vld [vmem:[#allocation2 + $0x320] sm:$0xff] }
 0x1f9   : > { %1450 = vmatprep.mubr.f32.mxu0 %v443_v27  ;;  %v349_v27 = vld [vmem:[#allocation2 + $0x358] sm:$0xff] }
 0x1fb   : > { %2429 = vmatmul.mubr.f32.gmra.mrb[66].mxu1 %v442_v28 }
 0x1fc   : > { %1451 = vmatmul.mubr.f32.gmra.mrb[66].mxu0 %v442_v28  ;;  %2433 = vmatprep.mubr.f32.mxu1 %v449_v29  ;;  %v348_v28 = vld [vmem:[#allocation2 + $0x350] sm:$0xff] }
 0x1fd   : > { %1456 = vmatprep.mubr.f32.mxu0 %v449_v29  ;;  %v355_v29 = vld [vmem:[#allocation2 + $0x388] sm:$0xff] }
 0x1ff   : > { %2434 = vmatmul.mubr.f32.gmra.mrb[68].mxu1 %v448_v30 }
 0x200   : > { %1457 = vmatmul.mubr.f32.gmra.mrb[68].mxu0 %v448_v30  ;;  %2438 = vmatprep.mubr.f32.mxu1 %v455_v31  ;;  %v354_v30 = vld [vmem:[#allocation2 + $0x380] sm:$0xff] }
 0x201   : > { %1462 = vmatprep.mubr.f32.mxu0 %v455_v31  ;;  %v361_v31 = vld [vmem:[#allocation2 + $0x3b8] sm:$0xff] }
 0x203   : > { %2439 = vmatmul.mubr.f32.gmra.mrb[70].mxu1 %v454_v32 }
 0x204   : > { %1463 = vmatmul.mubr.f32.gmra.mrb[70].mxu0 %v454_v32  ;;  %2443 = vmatprep.mubr.f32.mxu1 %v461_v33  ;;  %v360_v32 = vld [vmem:[#allocation2 + $0x3b0] sm:$0xff] }
 0x205   : > { %1468 = vmatprep.mubr.f32.mxu0 %v461_v33  ;;  %v367_v33 = vld [vmem:[#allocation2 + $0x3e8] sm:$0xff] }
 0x207   : > { %2444 = vmatmul.mubr.f32.gmra.mrb[72].mxu1 %v460_v34 }
 0x208   : > { %1469 = vmatmul.mubr.f32.gmra.mrb[72].mxu0 %v460_v34  ;;  %2448 = vmatprep.mubr.f32.mxu1 %v467_v35  ;;  %v366_v34 = vld [vmem:[#allocation2 + $0x3e0] sm:$0xff] }
 0x209   : > { %1474 = vmatprep.mubr.f32.mxu0 %v467_v35  ;;  %v373_v35 = vld [vmem:[#allocation2 + $0x418] sm:$0xff] }
 0x20b   : > { %2449 = vmatmul.mubr.f32.gmra.mrb[74].mxu1 %v466_v36 }
 0x20c   : > { %1475 = vmatmul.mubr.f32.gmra.mrb[74].mxu0 %v466_v36  ;;  %2453 = vmatprep.mubr.f32.mxu1 %v473_v37  ;;  %v372_v36 = vld [vmem:[#allocation2 + $0x410] sm:$0xff] }
 0x20d   : > { %1480 = vmatprep.mubr.f32.mxu0 %v473_v37  ;;  %v379_v37 = vld [vmem:[#allocation2 + $0x448] sm:$0xff] }
 0x20f   : > { %2454 = vmatmul.mubr.f32.gmra.mrb[76].mxu1 %v472_v38 }
 0x210   : > { %1481 = vmatmul.mubr.f32.gmra.mrb[76].mxu0 %v472_v38  ;;  %2458 = vmatprep.mubr.f32.mxu1 %v479_v39  ;;  %v378_v38 = vld [vmem:[#allocation2 + $0x440] sm:$0xff] }
 0x211   : > { %1486 = vmatprep.mubr.f32.mxu0 %v479_v39  ;;  %v385_v39 = vld [vmem:[#allocation2 + $0x478] sm:$0xff] }
 0x213   : > { %2459 = vmatmul.mubr.f32.gmra.mrb[78].mxu1 %v478_v40 }
 0x214   : > { %1487 = vmatmul.mubr.f32.gmra.mrb[78].mxu0 %v478_v40  ;;  %2463 = vmatprep.mubr.f32.mxu1 %v485_v41  ;;  %v384_v40 = vld [vmem:[#allocation2 + $0x470] sm:$0xff] }
 0x215   : > { %1492 = vmatprep.mubr.f32.mxu0 %v485_v41  ;;  %v391_v41 = vld [vmem:[#allocation2 + $0x4a8] sm:$0xff] }
 0x217   : > { %2464 = vmatmul.mubr.f32.gmra.mrb[80].mxu1 %v484_v42 }
 0x218   : > { %1493 = vmatmul.mubr.f32.gmra.mrb[80].mxu0 %v484_v42  ;;  %2468 = vmatprep.mubr.f32.mxu1 %v491_v43  ;;  %v390_v42 = vld [vmem:[#allocation2 + $0x4a0] sm:$0xff] }
 0x219   : > { %1498 = vmatprep.mubr.f32.mxu0 %v491_v43  ;;  %v397_v43 = vld [vmem:[#allocation2 + $0x4d8] sm:$0xff] }
 0x21b   : > { %2469 = vmatmul.mubr.f32.gmra.mrb[82].mxu1 %v490_v44 }
 0x21c   : > { %1499 = vmatmul.mubr.f32.gmra.mrb[82].mxu0 %v490_v44  ;;  %2473 = vmatprep.mubr.f32.mxu1 %v497_v45  ;;  %v396_v44 = vld [vmem:[#allocation2 + $0x4d0] sm:$0xff] }
 0x21d   : > { %1504 = vmatprep.mubr.f32.mxu0 %v497_v45  ;;  %v403_v45 = vld [vmem:[#allocation2 + $0x508] sm:$0xff] }
 0x21f   : > { %2474 = vmatmul.mubr.f32.gmra.mrb[84].mxu1 %v496_v46 }
 0x220   : > { %1505 = vmatmul.mubr.f32.gmra.mrb[84].mxu0 %v496_v46  ;;  %2478 = vmatprep.mubr.f32.mxu1 %v503_v47  ;;  %v402_v46 = vld [vmem:[#allocation2 + $0x500] sm:$0xff] }
 0x221   : > { %1510 = vmatprep.mubr.f32.mxu0 %v503_v47  ;;  %v409_v47 = vld [vmem:[#allocation2 + $0x538] sm:$0xff] }
 0x223   : > { %2479 = vmatmul.mubr.f32.gmra.mrb[86].mxu1 %v502_v48 }
 0x224   : > { %1511 = vmatmul.mubr.f32.gmra.mrb[86].mxu0 %v502_v48  ;;  %2483 = vmatprep.mubr.f32.mxu1 %v509_v49  ;;  %v408_v48 = vld [vmem:[#allocation2 + $0x530] sm:$0xff] }
 0x225   : > { %1516 = vmatprep.mubr.f32.mxu0 %v509_v49  ;;  %v415_v49 = vld [vmem:[#allocation2 + $0x568] sm:$0xff] }
 0x227   : > { %2484 = vmatmul.mubr.f32.gmra.mrb[88].mxu1 %v508_v50 }
 0x228   : > { %1517 = vmatmul.mubr.f32.gmra.mrb[88].mxu0 %v508_v50  ;;  %2488 = vmatprep.mubr.f32.mxu1 %v515_v51  ;;  %v414_v50 = vld [vmem:[#allocation2 + $0x560] sm:$0xff] }
 0x229   : > { %1522 = vmatprep.mubr.f32.mxu0 %v515_v51  ;;  %v421_v51 = vld [vmem:[#allocation2 + $0x598] sm:$0xff] }
 0x22b   : > { %2489 = vmatmul.mubr.f32.gmra.mrb[90].mxu1 %v514_v52 }
 0x22c   : > { %1523 = vmatmul.mubr.f32.gmra.mrb[90].mxu0 %v514_v52  ;;  %2493 = vmatprep.mubr.f32.mxu1 %v521_v53  ;;  %v420_v52 = vld [vmem:[#allocation2 + $0x590] sm:$0xff] }
 0x22d   : > { %1528 = vmatprep.mubr.f32.mxu0 %v521_v53  ;;  %v427_v53 = vld [vmem:[#allocation2 + $0x5c8] sm:$0xff] }
 0x22f   : > { %2494 = vmatmul.mubr.f32.gmra.mrb[92].mxu1 %v520_v54 }
 0x230   : > { %1529 = vmatmul.mubr.f32.gmra.mrb[92].mxu0 %v520_v54  ;;  %2498 = vmatprep.mubr.f32.mxu1 %v527_v55  ;;  %v426_v54 = vld [vmem:[#allocation2 + $0x5c0] sm:$0xff] }
 0x231   : > { %1534 = vmatprep.mubr.f32.mxu0 %v527_v55  ;;  %v433_v55 = vld [vmem:[#allocation2 + $0x5f8] sm:$0xff] }
 0x233   : > { %2499 = vmatmul.mubr.f32.gmra.mrb[94].mxu1 %v526_v56 }
 0x234   : > { %1535 = vmatmul.mubr.f32.gmra.mrb[94].mxu0 %v526_v56  ;;  %2568 = vmatprep.mubr.f32.mxu1 %v247_v57  ;;  %v432_v56 = vld [vmem:[#allocation2 + $0x5f0] sm:$0xff] }
 0x235   : > { %1605 = vmatprep.mubr.f32.mxu0 %v247_v57  ;;  %v439_v57 = vld [vmem:[#allocation2 + $0x628] sm:$0xff] }
 0x237   : > { %2569 = vmatmul.mubr.f32.vlgmr.msra.gmra.mrb[0].mxu1 %v246_v58 }
 0x238   : > { %1606 = vmatmul.mubr.f32.vlgmr.msra.gmra.mrb[0].mxu0 %v246_v58  ;;  %2573 = vmatprep.mubr.f32.mxu1 %v253_v59  ;;  %v438_v58 = vld [vmem:[#allocation2 + $0x620] sm:$0xff] }
 0x239   : > { %1611 = vmatprep.mubr.f32.mxu0 %v253_v59  ;;  %v445_v59 = vld [vmem:[#allocation2 + $0x658] sm:$0xff] }
 0x23b   : > { %2574 = vmatmul.mubr.f32.gmra.mrb[2].mxu1 %v252_v60 }
 0x23c   : > { %1612 = vmatmul.mubr.f32.gmra.mrb[2].mxu0 %v252_v60  ;;  %2578 = vmatprep.mubr.f32.mxu1 %v259_v61  ;;  %v444_v60 = vld [vmem:[#allocation2 + $0x650] sm:$0xff] }
 0x23d   : > { %1617 = vmatprep.mubr.f32.mxu0 %v259_v61  ;;  %v451_v61 = vld [vmem:[#allocation2 + $0x688] sm:$0xff] }
 0x23f   : > { %2579 = vmatmul.mubr.f32.gmra.mrb[4].mxu1 %v258_v62 }
 0x240   : > { %1618 = vmatmul.mubr.f32.gmra.mrb[4].mxu0 %v258_v62  ;;  %2583 = vmatprep.mubr.f32.mxu1 %v265_v0  ;;  %v450_v62 = vld [vmem:[#allocation2 + $0x680] sm:$0xff] }
 0x241   : > { %1623 = vmatprep.mubr.f32.mxu0 %v265_v0  ;;  %v457_v0 = vld [vmem:[#allocation2 + $0x6b8] sm:$0xff] }
 0x243   : > { %2584 = vmatmul.mubr.f32.gmra.mrb[6].mxu1 %v264_v63 }
 0x244   : > { %1624 = vmatmul.mubr.f32.gmra.mrb[6].mxu0 %v264_v63  ;;  %2588 = vmatprep.mubr.f32.mxu1 %v271_v1  ;;  %v456_v63 = vld [vmem:[#allocation2 + $0x6b0] sm:$0xff] }
 0x245   : > { %1629 = vmatprep.mubr.f32.mxu0 %v271_v1  ;;  %v463_v1 = vld [vmem:[#allocation2 + $0x6e8] sm:$0xff] }
 0x247   : > { %2589 = vmatmul.mubr.f32.gmra.mrb[8].mxu1 %v270_v2 }
 0x248   : > { %1630 = vmatmul.mubr.f32.gmra.mrb[8].mxu0 %v270_v2  ;;  %2593 = vmatprep.mubr.f32.mxu1 %v277_v3  ;;  %v462_v2 = vld [vmem:[#allocation2 + $0x6e0] sm:$0xff] }
 0x249   : > { %1635 = vmatprep.mubr.f32.mxu0 %v277_v3  ;;  %v469_v3 = vld [vmem:[#allocation2 + $0x718] sm:$0xff] }
 0x24b   : > { %2594 = vmatmul.mubr.f32.gmra.mrb[10].mxu1 %v276_v4 }
 0x24c   : > { %1636 = vmatmul.mubr.f32.gmra.mrb[10].mxu0 %v276_v4  ;;  %2598 = vmatprep.mubr.f32.mxu1 %v283_v5  ;;  %v468_v4 = vld [vmem:[#allocation2 + $0x710] sm:$0xff] }
 0x24d   : > { %1641 = vmatprep.mubr.f32.mxu0 %v283_v5  ;;  %v475_v5 = vld [vmem:[#allocation2 + $0x748] sm:$0xff] }
 0x24f   : > { %2599 = vmatmul.mubr.f32.gmra.mrb[12].mxu1 %v282_v6 }
 0x250   : > { %1642 = vmatmul.mubr.f32.gmra.mrb[12].mxu0 %v282_v6  ;;  %2603 = vmatprep.mubr.f32.mxu1 %v289_v7  ;;  %v474_v6 = vld [vmem:[#allocation2 + $0x740] sm:$0xff] }
 0x251   : > { %1647 = vmatprep.mubr.f32.mxu0 %v289_v7  ;;  %v481_v7 = vld [vmem:[#allocation2 + $0x778] sm:$0xff] }
 0x253   : > { %2604 = vmatmul.mubr.f32.gmra.mrb[14].mxu1 %v288_v8 }
 0x254   : > { %1648 = vmatmul.mubr.f32.gmra.mrb[14].mxu0 %v288_v8  ;;  %2608 = vmatprep.mubr.f32.mxu1 %v295_v9  ;;  %v480_v8 = vld [vmem:[#allocation2 + $0x770] sm:$0xff] }
 0x255   : > { %1653 = vmatprep.mubr.f32.mxu0 %v295_v9  ;;  %v487_v9 = vld [vmem:[#allocation2 + $0x7a8] sm:$0xff] }
 0x257   : > { %2609 = vmatmul.mubr.f32.gmra.mrb[16].mxu1 %v294_v10 }
 0x258   : > { %1654 = vmatmul.mubr.f32.gmra.mrb[16].mxu0 %v294_v10  ;;  %2613 = vmatprep.mubr.f32.mxu1 %v301_v11  ;;  %v486_v10 = vld [vmem:[#allocation2 + $0x7a0] sm:$0xff] }
 0x259   : > { %1659 = vmatprep.mubr.f32.mxu0 %v301_v11  ;;  %v493_v11 = vld [vmem:[#allocation2 + $0x7d8] sm:$0xff] }
 0x25b   : > { %2614 = vmatmul.mubr.f32.gmra.mrb[18].mxu1 %v300_v12 }
 0x25c   : > { %1660 = vmatmul.mubr.f32.gmra.mrb[18].mxu0 %v300_v12  ;;  %2618 = vmatprep.mubr.f32.mxu1 %v307_v13  ;;  %v492_v12 = vld [vmem:[#allocation2 + $0x7d0] sm:$0xff] }
 0x25d   : > { %1665 = vmatprep.mubr.f32.mxu0 %v307_v13  ;;  %v499_v13 = vld [vmem:[#allocation2 + $0x808] sm:$0xff] }
 0x25f   : > { %2619 = vmatmul.mubr.f32.gmra.mrb[20].mxu1 %v306_v14 }
 0x260   : > { %1666 = vmatmul.mubr.f32.gmra.mrb[20].mxu0 %v306_v14  ;;  %2623 = vmatprep.mubr.f32.mxu1 %v313_v15  ;;  %v498_v14 = vld [vmem:[#allocation2 + $0x800] sm:$0xff] }
 0x261   : > { %1671 = vmatprep.mubr.f32.mxu0 %v313_v15  ;;  %v505_v15 = vld [vmem:[#allocation2 + $0x838] sm:$0xff] }
 0x263   : > { %2624 = vmatmul.mubr.f32.gmra.mrb[22].mxu1 %v312_v16 }
 0x264   : > { %1672 = vmatmul.mubr.f32.gmra.mrb[22].mxu0 %v312_v16  ;;  %2628 = vmatprep.mubr.f32.mxu1 %v319_v17  ;;  %v504_v16 = vld [vmem:[#allocation2 + $0x830] sm:$0xff] }
 0x265   : > { %1677 = vmatprep.mubr.f32.mxu0 %v319_v17  ;;  %v511_v17 = vld [vmem:[#allocation2 + $0x868] sm:$0xff] }
 0x267   : > { %2629 = vmatmul.mubr.f32.gmra.mrb[24].mxu1 %v318_v18 }
 0x268   : > { %1678 = vmatmul.mubr.f32.gmra.mrb[24].mxu0 %v318_v18  ;;  %2633 = vmatprep.mubr.f32.mxu1 %v325_v19  ;;  %v510_v18 = vld [vmem:[#allocation2 + $0x860] sm:$0xff] }
 0x269   : > { %1683 = vmatprep.mubr.f32.mxu0 %v325_v19  ;;  %v517_v19 = vld [vmem:[#allocation2 + $0x898] sm:$0xff] }
 0x26b   : > { %2634 = vmatmul.mubr.f32.gmra.mrb[26].mxu1 %v324_v20 }
 0x26c   : > { %1684 = vmatmul.mubr.f32.gmra.mrb[26].mxu0 %v324_v20  ;;  %2638 = vmatprep.mubr.f32.mxu1 %v331_v21  ;;  %v516_v20 = vld [vmem:[#allocation2 + $0x890] sm:$0xff] }
 0x26d   : > { %1689 = vmatprep.mubr.f32.mxu0 %v331_v21  ;;  %v523_v21 = vld [vmem:[#allocation2 + $0x8c8] sm:$0xff] }
 0x26f   : > { %2639 = vmatmul.mubr.f32.gmra.mrb[28].mxu1 %v330_v22 }
 0x270   : > { %1690 = vmatmul.mubr.f32.gmra.mrb[28].mxu0 %v330_v22  ;;  %2643 = vmatprep.mubr.f32.mxu1 %v337_v23  ;;  %v522_v22 = vld [vmem:[#allocation2 + $0x8c0] sm:$0xff] }
 0x271   : > { %1695 = vmatprep.mubr.f32.mxu0 %v337_v23  ;;  %v529_v23 = vld [vmem:[#allocation2 + $0x8f8] sm:$0xff] }
 0x273   : > { %2644 = vmatmul.mubr.f32.gmra.mrb[30].mxu1 %v336_v24 }
 0x274   : > { %1696 = vmatmul.mubr.f32.gmra.mrb[30].mxu0 %v336_v24  ;;  %2648 = vmatprep.mubr.f32.mxu1 %v343_v25  ;;  %v528_v24 = vld [vmem:[#allocation2 + $0x8f0] sm:$0xff] }
 0x275   : > { %1701 = vmatprep.mubr.f32.mxu0 %v343_v25  ;;  %v820_v25 = vlaneseq }
 0x277   : > { %2649 = vmatmul.mubr.f32.gmra.mrb[32].mxu1 %v342_v26 }
 0x278   : > { %1702 = vmatmul.mubr.f32.gmra.mrb[32].mxu0 %v342_v26  ;;  %2653 = vmatprep.mubr.f32.mxu1 %v349_v27  ;;  %v821_v26 = vshrl.u32 %v820_v25, 7 }
 0x279   : > { %1707 = vmatprep.mubr.f32.mxu0 %v349_v27 }
 0x27a   : > { %v830_v27 = vsub.s32 2, %v821_v26 }
 0x27b   : > { %2654 = vmatmul.mubr.f32.gmra.mrb[34].mxu1 %v348_v28 }
 0x27c   : > { %1708 = vmatmul.mubr.f32.gmra.mrb[34].mxu0 %v348_v28  ;;  %2658 = vmatprep.mubr.f32.mxu1 %v355_v29  ;;  %v822_v28 = vsub.s32 0, %v821_v26 }
 0x27d   : > { %1713 = vmatprep.mubr.f32.mxu0 %v355_v29  ;;  %v818_v29 = vld [vmem:[%s211_s28] sm:$0x7] }
 0x27f   : > { %2659 = vmatmul.mubr.f32.gmra.mrb[36].mxu1 %v354_v30 }
 0x280   : > { %1714 = vmatmul.mubr.f32.gmra.mrb[36].mxu0 %v354_v30  ;;  %2663 = vmatprep.mubr.f32.mxu1 %v361_v31  ;;  %v826_v30 = vsub.s32 1, %v821_v26 }
 0x281   : > { %1719 = vmatprep.mubr.f32.mxu0 %v361_v31  ;;  %v4752_v31 = vrot.slane %v818_v29, %v830_v27 }
 0x283   : > { %2664 = vmatmul.mubr.f32.gmra.mrb[38].mxu1 %v360_v32 }
 0x284   : > { %1720 = vmatmul.mubr.f32.gmra.mrb[38].mxu0 %v360_v32  ;;  %2668 = vmatprep.mubr.f32.mxu1 %v367_v33  ;;  %v4754_v32 = vrot.slane %v818_v29, %v822_v28 }
 0x285   : > { %1725 = vmatprep.mubr.f32.mxu0 %v367_v33  ;;  %v4756_v33 = vrot.slane %v818_v29, %v826_v30 }
 0x287   : > { %2669 = vmatmul.mubr.f32.gmra.mrb[40].mxu1 %v366_v34 }
 0x288   : > { %1726 = vmatmul.mubr.f32.gmra.mrb[40].mxu0 %v366_v34  ;;  %2673 = vmatprep.mubr.f32.mxu1 %v373_v35 }
 0x289   : > { %1731 = vmatprep.mubr.f32.mxu0 %v373_v35 }
 0x28b   : > { %2674 = vmatmul.mubr.f32.gmra.mrb[42].mxu1 %v372_v36 }
 0x28c   : > { %1732 = vmatmul.mubr.f32.gmra.mrb[42].mxu0 %v372_v36  ;;  %2678 = vmatprep.mubr.f32.mxu1 %v379_v37 }
 0x28d   : > { %1737 = vmatprep.mubr.f32.mxu0 %v379_v37 }
 0x28f   : > { %2679 = vmatmul.mubr.f32.gmra.mrb[44].mxu1 %v378_v38 }
 0x290   : > { %1738 = vmatmul.mubr.f32.gmra.mrb[44].mxu0 %v378_v38  ;;  %2683 = vmatprep.mubr.f32.mxu1 %v385_v39 }
 0x291   : > { %1743 = vmatprep.mubr.f32.mxu0 %v385_v39 }
 0x293   : > { %2684 = vmatmul.mubr.f32.gmra.mrb[46].mxu1 %v384_v40 }
 0x294   : > { %1744 = vmatmul.mubr.f32.gmra.mrb[46].mxu0 %v384_v40  ;;  %2688 = vmatprep.mubr.f32.mxu1 %v391_v41 }
 0x295   : > { %1749 = vmatprep.mubr.f32.mxu0 %v391_v41 }
 0x297   : > { %2689 = vmatmul.mubr.f32.gmra.mrb[48].mxu1 %v390_v42 }
 0x298   : > { %1750 = vmatmul.mubr.f32.gmra.mrb[48].mxu0 %v390_v42  ;;  %2693 = vmatprep.mubr.f32.mxu1 %v397_v43 }
 0x299   : > { %1755 = vmatprep.mubr.f32.mxu0 %v397_v43 }
 0x29b   : > { %2694 = vmatmul.mubr.f32.gmra.mrb[50].mxu1 %v396_v44 }
 0x29c   : > { %1756 = vmatmul.mubr.f32.gmra.mrb[50].mxu0 %v396_v44  ;;  %2698 = vmatprep.mubr.f32.mxu1 %v403_v45 }
 0x29d   : > { %1761 = vmatprep.mubr.f32.mxu0 %v403_v45 }
 0x29f   : > { %2699 = vmatmul.mubr.f32.gmra.mrb[52].mxu1 %v402_v46 }
 0x2a0   : > { %1762 = vmatmul.mubr.f32.gmra.mrb[52].mxu0 %v402_v46  ;;  %2703 = vmatprep.mubr.f32.mxu1 %v409_v47 }
 0x2a1   : > { %1767 = vmatprep.mubr.f32.mxu0 %v409_v47 }
 0x2a3   : > { %2704 = vmatmul.mubr.f32.gmra.mrb[54].mxu1 %v408_v48 }
 0x2a4   : > { %1768 = vmatmul.mubr.f32.gmra.mrb[54].mxu0 %v408_v48  ;;  %2708 = vmatprep.mubr.f32.mxu1 %v415_v49 }
 0x2a5   : > { %1773 = vmatprep.mubr.f32.mxu0 %v415_v49 }
 0x2a7   : > { %2709 = vmatmul.mubr.f32.gmra.mrb[56].mxu1 %v414_v50 }
 0x2a8   : > { %1774 = vmatmul.mubr.f32.gmra.mrb[56].mxu0 %v414_v50  ;;  %2713 = vmatprep.mubr.f32.mxu1 %v421_v51 }
 0x2a9   : > { %1779 = vmatprep.mubr.f32.mxu0 %v421_v51 }
 0x2ab   : > { %2714 = vmatmul.mubr.f32.gmra.mrb[58].mxu1 %v420_v52 }
 0x2ac   : > { %1780 = vmatmul.mubr.f32.gmra.mrb[58].mxu0 %v420_v52  ;;  %2718 = vmatprep.mubr.f32.mxu1 %v427_v53 }
 0x2ad   : > { %1785 = vmatprep.mubr.f32.mxu0 %v427_v53 }
 0x2af   : > { %2719 = vmatmul.mubr.f32.gmra.mrb[60].mxu1 %v426_v54 }
 0x2b0   : > { %1786 = vmatmul.mubr.f32.gmra.mrb[60].mxu0 %v426_v54  ;;  %2723 = vmatprep.mubr.f32.mxu1 %v433_v55 }
 0x2b1   : > { %1791 = vmatprep.mubr.f32.mxu0 %v433_v55 }
 0x2b3   : > { %2724 = vmatmul.mubr.f32.gmra.mrb[62].mxu1 %v432_v56 }
 0x2b4   : > { %1792 = vmatmul.mubr.f32.gmra.mrb[62].mxu0 %v432_v56  ;;  %2728 = vmatprep.mubr.f32.mxu1 %v439_v57 }
 0x2b5   : > { %1797 = vmatprep.mubr.f32.mxu0 %v439_v57 }
 0x2b7   : > { %2729 = vmatmul.mubr.f32.gmra.mrb[64].mxu1 %v438_v58 }
 0x2b8   : > { %1798 = vmatmul.mubr.f32.gmra.mrb[64].mxu0 %v438_v58  ;;  %2733 = vmatprep.mubr.f32.mxu1 %v445_v59 }
 0x2b9   : > { %1803 = vmatprep.mubr.f32.mxu0 %v445_v59 }
 0x2bb   : > { %2734 = vmatmul.mubr.f32.gmra.mrb[66].mxu1 %v444_v60 }
 0x2bc   : > { %1804 = vmatmul.mubr.f32.gmra.mrb[66].mxu0 %v444_v60  ;;  %2738 = vmatprep.mubr.f32.mxu1 %v451_v61 }
 0x2bd   : > { %1809 = vmatprep.mubr.f32.mxu0 %v451_v61 }
 0x2bf   : > { %2739 = vmatmul.mubr.f32.gmra.mrb[68].mxu1 %v450_v62 }
 0x2c0   : > { %1810 = vmatmul.mubr.f32.gmra.mrb[68].mxu0 %v450_v62  ;;  %2743 = vmatprep.mubr.f32.mxu1 %v457_v0 }
 0x2c1   : > { %1815 = vmatprep.mubr.f32.mxu0 %v457_v0 }
 0x2c3   : > { %2744 = vmatmul.mubr.f32.gmra.mrb[70].mxu1 %v456_v63 }
 0x2c4   : > { %1816 = vmatmul.mubr.f32.gmra.mrb[70].mxu0 %v456_v63  ;;  %2748 = vmatprep.mubr.f32.mxu1 %v463_v1 }
 0x2c5   : > { %1821 = vmatprep.mubr.f32.mxu0 %v463_v1 }
 0x2c7   : > { %2749 = vmatmul.mubr.f32.gmra.mrb[72].mxu1 %v462_v2 }
 0x2c8   : > { %1822 = vmatmul.mubr.f32.gmra.mrb[72].mxu0 %v462_v2  ;;  %2753 = vmatprep.mubr.f32.mxu1 %v469_v3 }
 0x2c9   : > { %1827 = vmatprep.mubr.f32.mxu0 %v469_v3 }
 0x2cb   : > { %2754 = vmatmul.mubr.f32.gmra.mrb[74].mxu1 %v468_v4 }
 0x2cc   : > { %1828 = vmatmul.mubr.f32.gmra.mrb[74].mxu0 %v468_v4  ;;  %2758 = vmatprep.mubr.f32.mxu1 %v475_v5 }
 0x2cd   : > { %1833 = vmatprep.mubr.f32.mxu0 %v475_v5 }
 0x2cf   : > { %2759 = vmatmul.mubr.f32.gmra.mrb[76].mxu1 %v474_v6 }
 0x2d0   : > { %1834 = vmatmul.mubr.f32.gmra.mrb[76].mxu0 %v474_v6  ;;  %2763 = vmatprep.mubr.f32.mxu1 %v481_v7 }
 0x2d1   : > { %1839 = vmatprep.mubr.f32.mxu0 %v481_v7 }
 0x2d3   : > { %2764 = vmatmul.mubr.f32.gmra.mrb[78].mxu1 %v480_v8 }
 0x2d4   : > { %1840 = vmatmul.mubr.f32.gmra.mrb[78].mxu0 %v480_v8  ;;  %2768 = vmatprep.mubr.f32.mxu1 %v487_v9 }
 0x2d5   : > { %1845 = vmatprep.mubr.f32.mxu0 %v487_v9 }
 0x2d7   : > { %2769 = vmatmul.mubr.f32.gmra.mrb[80].mxu1 %v486_v10 }
 0x2d8   : > { %1846 = vmatmul.mubr.f32.gmra.mrb[80].mxu0 %v486_v10  ;;  %2773 = vmatprep.mubr.f32.mxu1 %v493_v11 }
 0x2d9   : > { %1851 = vmatprep.mubr.f32.mxu0 %v493_v11 }
 0x2db   : > { %2774 = vmatmul.mubr.f32.gmra.mrb[82].mxu1 %v492_v12 }
 0x2dc   : > { %1852 = vmatmul.mubr.f32.gmra.mrb[82].mxu0 %v492_v12  ;;  %2778 = vmatprep.mubr.f32.mxu1 %v499_v13 }
 0x2dd   : > { %1857 = vmatprep.mubr.f32.mxu0 %v499_v13 }
 0x2df   : > { %2779 = vmatmul.mubr.f32.gmra.mrb[84].mxu1 %v498_v14 }
 0x2e0   : > { %1858 = vmatmul.mubr.f32.gmra.mrb[84].mxu0 %v498_v14  ;;  %2783 = vmatprep.mubr.f32.mxu1 %v505_v15 }
 0x2e1   : > { %1863 = vmatprep.mubr.f32.mxu0 %v505_v15 }
 0x2e3   : > { %2784 = vmatmul.mubr.f32.gmra.mrb[86].mxu1 %v504_v16 }
 0x2e4   : > { %1864 = vmatmul.mubr.f32.gmra.mrb[86].mxu0 %v504_v16  ;;  %2788 = vmatprep.mubr.f32.mxu1 %v511_v17 }
 0x2e5   : > { %1869 = vmatprep.mubr.f32.mxu0 %v511_v17 }
 0x2e7   : > { %2789 = vmatmul.mubr.f32.gmra.mrb[88].mxu1 %v510_v18 }
 0x2e8   : > { %1870 = vmatmul.mubr.f32.gmra.mrb[88].mxu0 %v510_v18  ;;  %2793 = vmatprep.mubr.f32.mxu1 %v517_v19 }
 0x2e9   : > { %1875 = vmatprep.mubr.f32.mxu0 %v517_v19 }
 0x2eb   : > { %2794 = vmatmul.mubr.f32.gmra.mrb[90].mxu1 %v516_v20 }
 0x2ec   : > { %1876 = vmatmul.mubr.f32.gmra.mrb[90].mxu0 %v516_v20  ;;  %2798 = vmatprep.mubr.f32.mxu1 %v523_v21 }
 0x2ed   : > { %1881 = vmatprep.mubr.f32.mxu0 %v523_v21 }
 0x2ef   : > { %2799 = vmatmul.mubr.f32.gmra.mrb[92].mxu1 %v522_v22 }
 0x2f0   : > { %1882 = vmatmul.mubr.f32.gmra.mrb[92].mxu0 %v522_v22  ;;  %2803 = vmatprep.mubr.f32.mxu1 %v529_v23 }
 0x2f1   : > { %1887 = vmatprep.mubr.f32.mxu0 %v529_v23 }
 0x2f3   : > { %2804 = vmatmul.mubr.f32.gmra.mrb[94].mxu1 %v528_v24 }
 0x2f4   : > { %1888 = vmatmul.mubr.f32.gmra.mrb[94].mxu0 %v528_v24 }
 0x30a   : > { %v2570_v34 = vpop.f32.mrb[0].mxu1 }
 0x30b   : > { %v1607_v35 = vpop.f32.mrb[0].mxu0  ;;  %v3518_v36 = vadd.f32 %v2570_v34, %v4752_v31  ;;  %v2572_v38 = vpop.f32.mrb[1].mxu1 }
 0x30c   : > { %v3422_v37 = vadd.f32 %v1607_v35, %v4754_v32  ;;  %v1609_v39 = vpop.f32.mrb[1].mxu0 }
 0x30d   : > { %v3423_v40 = vadd.f32 %v1609_v39, %v4756_v33  ;;  %2811 = vst [vmem:[%s4761_s17 + $0x10] sm:$0xff] %v3518_v36 }
 0x30e   : > { %2809 = vst [vmem:[%s4761_s17] sm:$0xff] %v3422_v37  ;;  %v2575_v41 = vpop.f32.mrb[2].mxu1 }
 0x30f   : > { %2810 = vst [vmem:[%s4761_s17 + $0x8] sm:$0xff] %v3423_v40  ;;  %v1613_v42 = vpop.f32.mrb[2].mxu0  ;;  %v3519_v43 = vadd.f32 %v2575_v41, %v4752_v31  ;;  %v2577_v45 = vpop.f32.mrb[3].mxu1 }
 0x310   : > { %v3424_v44 = vadd.f32 %v1613_v42, %v4754_v32  ;;  %v1615_v46 = vpop.f32.mrb[3].mxu0 }
 0x311   : > { %v3425_v47 = vadd.f32 %v1615_v46, %v4756_v33  ;;  %2814 = vst [vmem:[%s4761_s17 + $0x28] sm:$0xff] %v3519_v43 }
 0x312   : > { %2812 = vst [vmem:[%s4761_s17 + $0x18] sm:$0xff] %v3424_v44  ;;  %v2580_v48 = vpop.f32.mrb[4].mxu1 }
 0x313   : > { %2813 = vst [vmem:[%s4761_s17 + $0x20] sm:$0xff] %v3425_v47  ;;  %v1619_v49 = vpop.f32.mrb[4].mxu0  ;;  %v3520_v50 = vadd.f32 %v2580_v48, %v4752_v31  ;;  %v2582_v52 = vpop.f32.mrb[5].mxu1 }
 0x314   : > { %v3426_v51 = vadd.f32 %v1619_v49, %v4754_v32  ;;  %v1621_v53 = vpop.f32.mrb[5].mxu0 }
 0x315   : > { %v3427_v54 = vadd.f32 %v1621_v53, %v4756_v33  ;;  %2817 = vst [vmem:[%s4761_s17 + $0x40] sm:$0xff] %v3520_v50 }
 0x316   : > { %2815 = vst [vmem:[%s4761_s17 + $0x30] sm:$0xff] %v3426_v51  ;;  %v2585_v55 = vpop.f32.mrb[6].mxu1 }
 0x317   : > { %2816 = vst [vmem:[%s4761_s17 + $0x38] sm:$0xff] %v3427_v54  ;;  %v1625_v56 = vpop.f32.mrb[6].mxu0  ;;  %v3521_v57 = vadd.f32 %v2585_v55, %v4752_v31  ;;  %v2587_v59 = vpop.f32.mrb[7].mxu1 }
 0x318   : > { %v3428_v58 = vadd.f32 %v1625_v56, %v4754_v32  ;;  %v1627_v60 = vpop.f32.mrb[7].mxu0 }
 0x319   : > { %v3429_v61 = vadd.f32 %v1627_v60, %v4756_v33  ;;  %2820 = vst [vmem:[%s4761_s17 + $0x58] sm:$0xff] %v3521_v57 }
 0x31a   : > { %2818 = vst [vmem:[%s4761_s17 + $0x48] sm:$0xff] %v3428_v58  ;;  %v2590_v62 = vpop.f32.mrb[8].mxu1 }
 0x31b   : > { %2819 = vst [vmem:[%s4761_s17 + $0x50] sm:$0xff] %v3429_v61  ;;  %v1631_v0 = vpop.f32.mrb[8].mxu0  ;;  %v3522_v63 = vadd.f32 %v2590_v62, %v4752_v31  ;;  %v2592_v2 = vpop.f32.mrb[9].mxu1 }
 0x31c   : > { %v3430_v1 = vadd.f32 %v1631_v0, %v4754_v32  ;;  %v1633_v3 = vpop.f32.mrb[9].mxu0 }
 0x31d   : > { %v3431_v4 = vadd.f32 %v1633_v3, %v4756_v33  ;;  %2823 = vst [vmem:[%s4761_s17 + $0x70] sm:$0xff] %v3522_v63 }
 0x31e   : > { %2821 = vst [vmem:[%s4761_s17 + $0x60] sm:$0xff] %v3430_v1  ;;  %v2595_v5 = vpop.f32.mrb[10].mxu1 }
 0x31f   : > { %2822 = vst [vmem:[%s4761_s17 + $0x68] sm:$0xff] %v3431_v4  ;;  %v1637_v6 = vpop.f32.mrb[10].mxu0  ;;  %v3523_v7 = vadd.f32 %v2595_v5, %v4752_v31  ;;  %v2597_v9 = vpop.f32.mrb[11].mxu1 }
 0x320   : > { %v3432_v8 = vadd.f32 %v1637_v6, %v4754_v32  ;;  %v1639_v10 = vpop.f32.mrb[11].mxu0 }
 0x321   : > { %v3433_v11 = vadd.f32 %v1639_v10, %v4756_v33  ;;  %2826 = vst [vmem:[%s4761_s17 + $0x88] sm:$0xff] %v3523_v7 }
 0x322   : > { %2824 = vst [vmem:[%s4761_s17 + $0x78] sm:$0xff] %v3432_v8  ;;  %v2600_v12 = vpop.f32.mrb[12].mxu1 }
 0x323   : > { %2825 = vst [vmem:[%s4761_s17 + $0x80] sm:$0xff] %v3433_v11  ;;  %v1643_v13 = vpop.f32.mrb[12].mxu0  ;;  %v3524_v14 = vadd.f32 %v2600_v12, %v4752_v31  ;;  %v2602_v16 = vpop.f32.mrb[13].mxu1 }
 0x324   : > { %v3434_v15 = vadd.f32 %v1643_v13, %v4754_v32  ;;  %v1645_v17 = vpop.f32.mrb[13].mxu0 }
 0x325   : > { %v3435_v18 = vadd.f32 %v1645_v17, %v4756_v33  ;;  %2829 = vst [vmem:[%s4761_s17 + $0xa0] sm:$0xff] %v3524_v14 }
 0x326   : > { %2827 = vst [vmem:[%s4761_s17 + $0x90] sm:$0xff] %v3434_v15  ;;  %v2605_v19 = vpop.f32.mrb[14].mxu1 }
 0x327   : > { %2828 = vst [vmem:[%s4761_s17 + $0x98] sm:$0xff] %v3435_v18  ;;  %v1649_v20 = vpop.f32.mrb[14].mxu0  ;;  %v3525_v21 = vadd.f32 %v2605_v19, %v4752_v31  ;;  %v2607_v23 = vpop.f32.mrb[15].mxu1 }
 0x328   : > { %v3436_v22 = vadd.f32 %v1649_v20, %v4754_v32  ;;  %v1651_v24 = vpop.f32.mrb[15].mxu0 }
 0x329   : > { %v3437_v25 = vadd.f32 %v1651_v24, %v4756_v33  ;;  %2832 = vst [vmem:[%s4761_s17 + $0xb8] sm:$0xff] %v3525_v21 }
 0x32a   : > { %2830 = vst [vmem:[%s4761_s17 + $0xa8] sm:$0xff] %v3436_v22  ;;  %v2610_v26 = vpop.f32.mrb[16].mxu1 }
 0x32b   : > { %2831 = vst [vmem:[%s4761_s17 + $0xb0] sm:$0xff] %v3437_v25  ;;  %v1655_v27 = vpop.f32.mrb[16].mxu0  ;;  %v3526_v28 = vadd.f32 %v2610_v26, %v4752_v31  ;;  %v2612_v30 = vpop.f32.mrb[17].mxu1 }
 0x32c   : > { %v3438_v29 = vadd.f32 %v1655_v27, %v4754_v32  ;;  %v1657_v34 = vpop.f32.mrb[17].mxu0 }
 0x32d   : > { %v3439_v35 = vadd.f32 %v1657_v34, %v4756_v33  ;;  %2835 = vst [vmem:[%s4761_s17 + $0xd0] sm:$0xff] %v3526_v28 }
 0x32e   : > { %2833 = vst [vmem:[%s4761_s17 + $0xc0] sm:$0xff] %v3438_v29  ;;  %v2615_v36 = vpop.f32.mrb[18].mxu1 }
 0x32f   : > { %2834 = vst [vmem:[%s4761_s17 + $0xc8] sm:$0xff] %v3439_v35  ;;  %v1661_v37 = vpop.f32.mrb[18].mxu0  ;;  %v3527_v38 = vadd.f32 %v2615_v36, %v4752_v31  ;;  %v2617_v40 = vpop.f32.mrb[19].mxu1 }
 0x330   : > { %v3440_v39 = vadd.f32 %v1661_v37, %v4754_v32  ;;  %v1663_v41 = vpop.f32.mrb[19].mxu0 }
 0x331   : > { %v3441_v42 = vadd.f32 %v1663_v41, %v4756_v33  ;;  %2838 = vst [vmem:[%s4761_s17 + $0xe8] sm:$0xff] %v3527_v38 }
 0x332   : > { %2836 = vst [vmem:[%s4761_s17 + $0xd8] sm:$0xff] %v3440_v39  ;;  %v2620_v43 = vpop.f32.mrb[20].mxu1 }
 0x333   : > { %2837 = vst [vmem:[%s4761_s17 + $0xe0] sm:$0xff] %v3441_v42  ;;  %v1667_v44 = vpop.f32.mrb[20].mxu0  ;;  %v3528_v45 = vadd.f32 %v2620_v43, %v4752_v31  ;;  %v2622_v47 = vpop.f32.mrb[21].mxu1 }
 0x334   : > { %v3442_v46 = vadd.f32 %v1667_v44, %v4754_v32  ;;  %v1669_v48 = vpop.f32.mrb[21].mxu0 }
 0x335   : > { %v3443_v49 = vadd.f32 %v1669_v48, %v4756_v33  ;;  %2841 = vst [vmem:[%s4761_s17 + $0x100] sm:$0xff] %v3528_v45 }
 0x336   : > { %2839 = vst [vmem:[%s4761_s17 + $0xf0] sm:$0xff] %v3442_v46  ;;  %v2625_v50 = vpop.f32.mrb[22].mxu1 }
 0x337   : > { %2840 = vst [vmem:[%s4761_s17 + $0xf8] sm:$0xff] %v3443_v49  ;;  %v1673_v51 = vpop.f32.mrb[22].mxu0  ;;  %v3529_v52 = vadd.f32 %v2625_v50, %v4752_v31  ;;  %v2627_v54 = vpop.f32.mrb[23].mxu1 }
 0x338   : > { %v3444_v53 = vadd.f32 %v1673_v51, %v4754_v32  ;;  %v1675_v55 = vpop.f32.mrb[23].mxu0 }
 0x339   : > { %v3445_v56 = vadd.f32 %v1675_v55, %v4756_v33  ;;  %2844 = vst [vmem:[%s4761_s17 + $0x118] sm:$0xff] %v3529_v52 }
 0x33a   : > { %2842 = vst [vmem:[%s4761_s17 + $0x108] sm:$0xff] %v3444_v53  ;;  %v2630_v57 = vpop.f32.mrb[24].mxu1 }
 0x33b   : > { %2843 = vst [vmem:[%s4761_s17 + $0x110] sm:$0xff] %v3445_v56  ;;  %v1679_v58 = vpop.f32.mrb[24].mxu0  ;;  %v3530_v59 = vadd.f32 %v2630_v57, %v4752_v31  ;;  %v2632_v61 = vpop.f32.mrb[25].mxu1 }
 0x33c   : > { %v3446_v60 = vadd.f32 %v1679_v58, %v4754_v32  ;;  %v1681_v62 = vpop.f32.mrb[25].mxu0 }
 0x33d   : > { %v3447_v0 = vadd.f32 %v1681_v62, %v4756_v33  ;;  %2847 = vst [vmem:[%s4761_s17 + $0x130] sm:$0xff] %v3530_v59 }
 0x33e   : > { %2845 = vst [vmem:[%s4761_s17 + $0x120] sm:$0xff] %v3446_v60  ;;  %v2635_v63 = vpop.f32.mrb[26].mxu1 }
 0x33f   : > { %2846 = vst [vmem:[%s4761_s17 + $0x128] sm:$0xff] %v3447_v0  ;;  %v1685_v1 = vpop.f32.mrb[26].mxu0  ;;  %v3531_v2 = vadd.f32 %v2635_v63, %v4752_v31  ;;  %v2637_v4 = vpop.f32.mrb[27].mxu1 }
 0x340   : > { %v3448_v3 = vadd.f32 %v1685_v1, %v4754_v32  ;;  %v1687_v5 = vpop.f32.mrb[27].mxu0 }
 0x341   : > { %v3449_v6 = vadd.f32 %v1687_v5, %v4756_v33  ;;  %2850 = vst [vmem:[%s4761_s17 + $0x148] sm:$0xff] %v3531_v2 }
 0x342   : > { %2848 = vst [vmem:[%s4761_s17 + $0x138] sm:$0xff] %v3448_v3  ;;  %v2640_v7 = vpop.f32.mrb[28].mxu1 }
 0x343   : > { %2849 = vst [vmem:[%s4761_s17 + $0x140] sm:$0xff] %v3449_v6  ;;  %v1691_v8 = vpop.f32.mrb[28].mxu0  ;;  %v3532_v9 = vadd.f32 %v2640_v7, %v4752_v31  ;;  %v2642_v11 = vpop.f32.mrb[29].mxu1 }
 0x344   : > { %v3450_v10 = vadd.f32 %v1691_v8, %v4754_v32  ;;  %v1693_v12 = vpop.f32.mrb[29].mxu0 }
 0x345   : > { %v3451_v13 = vadd.f32 %v1693_v12, %v4756_v33  ;;  %2853 = vst [vmem:[%s4761_s17 + $0x160] sm:$0xff] %v3532_v9 }
 0x346   : > { %2851 = vst [vmem:[%s4761_s17 + $0x150] sm:$0xff] %v3450_v10  ;;  %v2645_v14 = vpop.f32.mrb[30].mxu1 }
 0x347   : > { %2852 = vst [vmem:[%s4761_s17 + $0x158] sm:$0xff] %v3451_v13  ;;  %v1697_v15 = vpop.f32.mrb[30].mxu0  ;;  %v3533_v16 = vadd.f32 %v2645_v14, %v4752_v31  ;;  %v2647_v18 = vpop.f32.mrb[31].mxu1 }
 0x348   : > { %v3452_v17 = vadd.f32 %v1697_v15, %v4754_v32  ;;  %v1699_v19 = vpop.f32.mrb[31].mxu0 }
 0x349   : > { %v3453_v20 = vadd.f32 %v1699_v19, %v4756_v33  ;;  %2856 = vst [vmem:[%s4761_s17 + $0x178] sm:$0xff] %v3533_v16 }
 0x34a   : > { %2854 = vst [vmem:[%s4761_s17 + $0x168] sm:$0xff] %v3452_v17  ;;  %v2650_v21 = vpop.f32.mrb[32].mxu1 }
 0x34b   : > { %2855 = vst [vmem:[%s4761_s17 + $0x170] sm:$0xff] %v3453_v20  ;;  %v1703_v22 = vpop.f32.mrb[32].mxu0  ;;  %v3534_v23 = vadd.f32 %v2650_v21, %v4752_v31  ;;  %v2652_v25 = vpop.f32.mrb[33].mxu1 }
 0x34c   : > { %v3454_v24 = vadd.f32 %v1703_v22, %v4754_v32  ;;  %v1705_v26 = vpop.f32.mrb[33].mxu0 }
 0x34d   : > { %v3455_v27 = vadd.f32 %v1705_v26, %v4756_v33  ;;  %2859 = vst [vmem:[%s4761_s17 + $0x190] sm:$0xff] %v3534_v23 }
 0x34e   : > { %2857 = vst [vmem:[%s4761_s17 + $0x180] sm:$0xff] %v3454_v24  ;;  %v2655_v28 = vpop.f32.mrb[34].mxu1 }
 0x34f   : > { %2858 = vst [vmem:[%s4761_s17 + $0x188] sm:$0xff] %v3455_v27  ;;  %v1709_v29 = vpop.f32.mrb[34].mxu0  ;;  %v3535_v30 = vadd.f32 %v2655_v28, %v4752_v31  ;;  %v2657_v35 = vpop.f32.mrb[35].mxu1 }
 0x350   : > { %v3456_v34 = vadd.f32 %v1709_v29, %v4754_v32  ;;  %v1711_v36 = vpop.f32.mrb[35].mxu0 }
 0x351   : > { %v3457_v37 = vadd.f32 %v1711_v36, %v4756_v33  ;;  %2862 = vst [vmem:[%s4761_s17 + $0x1a8] sm:$0xff] %v3535_v30 }
 0x352   : > { %2860 = vst [vmem:[%s4761_s17 + $0x198] sm:$0xff] %v3456_v34  ;;  %v2660_v38 = vpop.f32.mrb[36].mxu1 }
 0x353   : > { %2861 = vst [vmem:[%s4761_s17 + $0x1a0] sm:$0xff] %v3457_v37  ;;  %v1715_v39 = vpop.f32.mrb[36].mxu0  ;;  %v3536_v40 = vadd.f32 %v2660_v38, %v4752_v31  ;;  %v2662_v42 = vpop.f32.mrb[37].mxu1 }
 0x354   : > { %v3458_v41 = vadd.f32 %v1715_v39, %v4754_v32  ;;  %v1717_v43 = vpop.f32.mrb[37].mxu0 }
 0x355   : > { %v3459_v44 = vadd.f32 %v1717_v43, %v4756_v33  ;;  %2865 = vst [vmem:[%s4761_s17 + $0x1c0] sm:$0xff] %v3536_v40 }
 0x356   : > { %2863 = vst [vmem:[%s4761_s17 + $0x1b0] sm:$0xff] %v3458_v41  ;;  %v2665_v45 = vpop.f32.mrb[38].mxu1 }
 0x357   : > { %2864 = vst [vmem:[%s4761_s17 + $0x1b8] sm:$0xff] %v3459_v44  ;;  %v1721_v46 = vpop.f32.mrb[38].mxu0  ;;  %v3537_v47 = vadd.f32 %v2665_v45, %v4752_v31  ;;  %v2667_v49 = vpop.f32.mrb[39].mxu1 }
 0x358   : > { %v3460_v48 = vadd.f32 %v1721_v46, %v4754_v32  ;;  %v1723_v50 = vpop.f32.mrb[39].mxu0 }
 0x359   : > { %v3461_v51 = vadd.f32 %v1723_v50, %v4756_v33  ;;  %2868 = vst [vmem:[%s4761_s17 + $0x1d8] sm:$0xff] %v3537_v47 }
 0x35a   : > { %2866 = vst [vmem:[%s4761_s17 + $0x1c8] sm:$0xff] %v3460_v48  ;;  %v2670_v52 = vpop.f32.mrb[40].mxu1 }
 0x35b   : > { %2867 = vst [vmem:[%s4761_s17 + $0x1d0] sm:$0xff] %v3461_v51  ;;  %v1727_v53 = vpop.f32.mrb[40].mxu0  ;;  %v3538_v54 = vadd.f32 %v2670_v52, %v4752_v31  ;;  %v2672_v56 = vpop.f32.mrb[41].mxu1 }
 0x35c   : > { %v3462_v55 = vadd.f32 %v1727_v53, %v4754_v32  ;;  %v1729_v57 = vpop.f32.mrb[41].mxu0 }
 0x35d   : > { %v3463_v58 = vadd.f32 %v1729_v57, %v4756_v33  ;;  %2871 = vst [vmem:[%s4761_s17 + $0x1f0] sm:$0xff] %v3538_v54 }
 0x35e   : > { %2869 = vst [vmem:[%s4761_s17 + $0x1e0] sm:$0xff] %v3462_v55  ;;  %v2675_v59 = vpop.f32.mrb[42].mxu1 }
 0x35f   : > { %2870 = vst [vmem:[%s4761_s17 + $0x1e8] sm:$0xff] %v3463_v58  ;;  %v1733_v60 = vpop.f32.mrb[42].mxu0  ;;  %v3539_v61 = vadd.f32 %v2675_v59, %v4752_v31  ;;  %v2677_v0 = vpop.f32.mrb[43].mxu1 }
 0x360   : > { %v3464_v62 = vadd.f32 %v1733_v60, %v4754_v32  ;;  %v1735_v63 = vpop.f32.mrb[43].mxu0 }
 0x361   : > { %v3465_v1 = vadd.f32 %v1735_v63, %v4756_v33  ;;  %2874 = vst [vmem:[%s4761_s17 + $0x208] sm:$0xff] %v3539_v61 }
 0x362   : > { %2872 = vst [vmem:[%s4761_s17 + $0x1f8] sm:$0xff] %v3464_v62  ;;  %v2680_v2 = vpop.f32.mrb[44].mxu1 }
 0x363   : > { %2873 = vst [vmem:[%s4761_s17 + $0x200] sm:$0xff] %v3465_v1  ;;  %v1739_v3 = vpop.f32.mrb[44].mxu0  ;;  %v3540_v4 = vadd.f32 %v2680_v2, %v4752_v31  ;;  %v2682_v6 = vpop.f32.mrb[45].mxu1 }
 0x364   : > { %v3466_v5 = vadd.f32 %v1739_v3, %v4754_v32  ;;  %v1741_v7 = vpop.f32.mrb[45].mxu0 }
 0x365   : > { %v3467_v8 = vadd.f32 %v1741_v7, %v4756_v33  ;;  %2877 = vst [vmem:[%s4761_s17 + $0x220] sm:$0xff] %v3540_v4 }
 0x366   : > { %2875 = vst [vmem:[%s4761_s17 + $0x210] sm:$0xff] %v3466_v5  ;;  %v2685_v9 = vpop.f32.mrb[46].mxu1 }
 0x367   : > { %2876 = vst [vmem:[%s4761_s17 + $0x218] sm:$0xff] %v3467_v8  ;;  %v1745_v10 = vpop.f32.mrb[46].mxu0  ;;  %v3541_v11 = vadd.f32 %v2685_v9, %v4752_v31  ;;  %v2687_v13 = vpop.f32.mrb[47].mxu1 }
 0x368   : > { %v3468_v12 = vadd.f32 %v1745_v10, %v4754_v32  ;;  %v1747_v14 = vpop.f32.mrb[47].mxu0 }
 0x369   : > { %v3469_v15 = vadd.f32 %v1747_v14, %v4756_v33  ;;  %2880 = vst [vmem:[%s4761_s17 + $0x238] sm:$0xff] %v3541_v11 }
 0x36a   : > { %2878 = vst [vmem:[%s4761_s17 + $0x228] sm:$0xff] %v3468_v12  ;;  %v2690_v16 = vpop.f32.mrb[48].mxu1 }
 0x36b   : > { %2879 = vst [vmem:[%s4761_s17 + $0x230] sm:$0xff] %v3469_v15  ;;  %v1751_v17 = vpop.f32.mrb[48].mxu0  ;;  %v3542_v18 = vadd.f32 %v2690_v16, %v4752_v31  ;;  %v2692_v20 = vpop.f32.mrb[49].mxu1 }
 0x36c   : > { %v3470_v19 = vadd.f32 %v1751_v17, %v4754_v32  ;;  %v1753_v21 = vpop.f32.mrb[49].mxu0 }
 0x36d   : > { %v3471_v22 = vadd.f32 %v1753_v21, %v4756_v33  ;;  %2883 = vst [vmem:[%s4761_s17 + $0x250] sm:$0xff] %v3542_v18 }
 0x36e   : > { %2881 = vst [vmem:[%s4761_s17 + $0x240] sm:$0xff] %v3470_v19  ;;  %v2695_v23 = vpop.f32.mrb[50].mxu1 }
 0x36f   : > { %2882 = vst [vmem:[%s4761_s17 + $0x248] sm:$0xff] %v3471_v22  ;;  %v1757_v24 = vpop.f32.mrb[50].mxu0  ;;  %v3543_v25 = vadd.f32 %v2695_v23, %v4752_v31  ;;  %v2697_v27 = vpop.f32.mrb[51].mxu1 }
 0x370   : > { %v3472_v26 = vadd.f32 %v1757_v24, %v4754_v32  ;;  %v1759_v28 = vpop.f32.mrb[51].mxu0 }
 0x371   : > { %v3473_v29 = vadd.f32 %v1759_v28, %v4756_v33  ;;  %2886 = vst [vmem:[%s4761_s17 + $0x268] sm:$0xff] %v3543_v25 }
 0x372   : > { %2884 = vst [vmem:[%s4761_s17 + $0x258] sm:$0xff] %v3472_v26  ;;  %v2700_v30 = vpop.f32.mrb[52].mxu1 }
 0x373   : > { %2885 = vst [vmem:[%s4761_s17 + $0x260] sm:$0xff] %v3473_v29  ;;  %v1763_v34 = vpop.f32.mrb[52].mxu0  ;;  %v3544_v35 = vadd.f32 %v2700_v30, %v4752_v31  ;;  %v2702_v37 = vpop.f32.mrb[53].mxu1 }
 0x374   : > { %v3474_v36 = vadd.f32 %v1763_v34, %v4754_v32  ;;  %v1765_v38 = vpop.f32.mrb[53].mxu0 }
 0x375   : > { %v3475_v39 = vadd.f32 %v1765_v38, %v4756_v33  ;;  %2889 = vst [vmem:[%s4761_s17 + $0x280] sm:$0xff] %v3544_v35 }
 0x376   : > { %2887 = vst [vmem:[%s4761_s17 + $0x270] sm:$0xff] %v3474_v36  ;;  %v2705_v40 = vpop.f32.mrb[54].mxu1 }
 0x377   : > { %2888 = vst [vmem:[%s4761_s17 + $0x278] sm:$0xff] %v3475_v39  ;;  %v1769_v41 = vpop.f32.mrb[54].mxu0  ;;  %v3545_v42 = vadd.f32 %v2705_v40, %v4752_v31  ;;  %v2707_v44 = vpop.f32.mrb[55].mxu1 }
 0x378   : > { %v3476_v43 = vadd.f32 %v1769_v41, %v4754_v32  ;;  %v1771_v45 = vpop.f32.mrb[55].mxu0 }
 0x379   : > { %v3477_v46 = vadd.f32 %v1771_v45, %v4756_v33  ;;  %2892 = vst [vmem:[%s4761_s17 + $0x298] sm:$0xff] %v3545_v42 }
 0x37a   : > { %2890 = vst [vmem:[%s4761_s17 + $0x288] sm:$0xff] %v3476_v43  ;;  %v2710_v47 = vpop.f32.mrb[56].mxu1 }
 0x37b   : > { %2891 = vst [vmem:[%s4761_s17 + $0x290] sm:$0xff] %v3477_v46  ;;  %v1775_v48 = vpop.f32.mrb[56].mxu0  ;;  %v3546_v49 = vadd.f32 %v2710_v47, %v4752_v31  ;;  %v2712_v51 = vpop.f32.mrb[57].mxu1 }
 0x37c   : > { %v3478_v50 = vadd.f32 %v1775_v48, %v4754_v32  ;;  %v1777_v52 = vpop.f32.mrb[57].mxu0 }
 0x37d   : > { %v3479_v53 = vadd.f32 %v1777_v52, %v4756_v33  ;;  %2895 = vst [vmem:[%s4761_s17 + $0x2b0] sm:$0xff] %v3546_v49 }
 0x37e   : > { %2893 = vst [vmem:[%s4761_s17 + $0x2a0] sm:$0xff] %v3478_v50  ;;  %v2715_v54 = vpop.f32.mrb[58].mxu1 }
 0x37f   : > { %2894 = vst [vmem:[%s4761_s17 + $0x2a8] sm:$0xff] %v3479_v53  ;;  %v1781_v55 = vpop.f32.mrb[58].mxu0  ;;  %v3547_v56 = vadd.f32 %v2715_v54, %v4752_v31  ;;  %v2717_v58 = vpop.f32.mrb[59].mxu1 }
 0x380   : > { %v3480_v57 = vadd.f32 %v1781_v55, %v4754_v32  ;;  %v1783_v59 = vpop.f32.mrb[59].mxu0 }
 0x381   : > { %v3481_v60 = vadd.f32 %v1783_v59, %v4756_v33  ;;  %2898 = vst [vmem:[%s4761_s17 + $0x2c8] sm:$0xff] %v3547_v56 }
 0x382   : > { %2896 = vst [vmem:[%s4761_s17 + $0x2b8] sm:$0xff] %v3480_v57  ;;  %v2720_v61 = vpop.f32.mrb[60].mxu1 }
 0x383   : > { %2897 = vst [vmem:[%s4761_s17 + $0x2c0] sm:$0xff] %v3481_v60  ;;  %v1787_v62 = vpop.f32.mrb[60].mxu0  ;;  %v3548_v0 = vadd.f32 %v2720_v61, %v4752_v31  ;;  %v2722_v1 = vpop.f32.mrb[61].mxu1 }
 0x384   : > { %v3482_v63 = vadd.f32 %v1787_v62, %v4754_v32  ;;  %v1789_v2 = vpop.f32.mrb[61].mxu0 }
 0x385   : > { %v3483_v3 = vadd.f32 %v1789_v2, %v4756_v33  ;;  %2901 = vst [vmem:[%s4761_s17 + $0x2e0] sm:$0xff] %v3548_v0 }
 0x386   : > { %2899 = vst [vmem:[%s4761_s17 + $0x2d0] sm:$0xff] %v3482_v63  ;;  %v2725_v4 = vpop.f32.mrb[62].mxu1 }
 0x387   : > { %2900 = vst [vmem:[%s4761_s17 + $0x2d8] sm:$0xff] %v3483_v3  ;;  %v1793_v5 = vpop.f32.mrb[62].mxu0  ;;  %v3549_v6 = vadd.f32 %v2725_v4, %v4752_v31  ;;  %v2727_v8 = vpop.f32.mrb[63].mxu1 }
 0x388   : > { %v3484_v7 = vadd.f32 %v1793_v5, %v4754_v32  ;;  %v1795_v9 = vpop.f32.mrb[63].mxu0 }
 0x389   : > { %v3485_v10 = vadd.f32 %v1795_v9, %v4756_v33  ;;  %2904 = vst [vmem:[%s4761_s17 + $0x2f8] sm:$0xff] %v3549_v6 }
 0x38a   : > { %2902 = vst [vmem:[%s4761_s17 + $0x2e8] sm:$0xff] %v3484_v7  ;;  %v2730_v11 = vpop.f32.mrb[64].mxu1 }
 0x38b   : > { %2903 = vst [vmem:[%s4761_s17 + $0x2f0] sm:$0xff] %v3485_v10  ;;  %v1799_v12 = vpop.f32.mrb[64].mxu0  ;;  %v3550_v13 = vadd.f32 %v2730_v11, %v4752_v31  ;;  %v2732_v15 = vpop.f32.mrb[65].mxu1 }
 0x38c   : > { %v3486_v14 = vadd.f32 %v1799_v12, %v4754_v32  ;;  %v1801_v16 = vpop.f32.mrb[65].mxu0 }
 0x38d   : > { %v3487_v17 = vadd.f32 %v1801_v16, %v4756_v33  ;;  %2907 = vst [vmem:[%s4761_s17 + $0x310] sm:$0xff] %v3550_v13 }
 0x38e   : > { %2905 = vst [vmem:[%s4761_s17 + $0x300] sm:$0xff] %v3486_v14  ;;  %v2735_v18 = vpop.f32.mrb[66].mxu1 }
 0x38f   : > { %2906 = vst [vmem:[%s4761_s17 + $0x308] sm:$0xff] %v3487_v17  ;;  %v1805_v19 = vpop.f32.mrb[66].mxu0  ;;  %v3551_v20 = vadd.f32 %v2735_v18, %v4752_v31  ;;  %v2737_v22 = vpop.f32.mrb[67].mxu1 }
 0x390   : > { %v3488_v21 = vadd.f32 %v1805_v19, %v4754_v32  ;;  %v1807_v23 = vpop.f32.mrb[67].mxu0 }
 0x391   : > { %v3489_v24 = vadd.f32 %v1807_v23, %v4756_v33  ;;  %2910 = vst [vmem:[%s4761_s17 + $0x328] sm:$0xff] %v3551_v20 }
 0x392   : > { %2908 = vst [vmem:[%s4761_s17 + $0x318] sm:$0xff] %v3488_v21  ;;  %v2740_v25 = vpop.f32.mrb[68].mxu1 }
 0x393   : > { %2909 = vst [vmem:[%s4761_s17 + $0x320] sm:$0xff] %v3489_v24  ;;  %v1811_v26 = vpop.f32.mrb[68].mxu0  ;;  %v3552_v27 = vadd.f32 %v2740_v25, %v4752_v31  ;;  %v2742_v29 = vpop.f32.mrb[69].mxu1 }
 0x394   : > { %v3490_v28 = vadd.f32 %v1811_v26, %v4754_v32  ;;  %v1813_v30 = vpop.f32.mrb[69].mxu0 }
 0x395   : > { %v3491_v34 = vadd.f32 %v1813_v30, %v4756_v33  ;;  %2913 = vst [vmem:[%s4761_s17 + $0x340] sm:$0xff] %v3552_v27 }
 0x396   : > { %2911 = vst [vmem:[%s4761_s17 + $0x330] sm:$0xff] %v3490_v28  ;;  %v2745_v35 = vpop.f32.mrb[70].mxu1 }
 0x397   : > { %2912 = vst [vmem:[%s4761_s17 + $0x338] sm:$0xff] %v3491_v34  ;;  %v1817_v36 = vpop.f32.mrb[70].mxu0  ;;  %v3553_v37 = vadd.f32 %v2745_v35, %v4752_v31  ;;  %v2747_v39 = vpop.f32.mrb[71].mxu1 }
 0x398   : > { %v3492_v38 = vadd.f32 %v1817_v36, %v4754_v32  ;;  %v1819_v40 = vpop.f32.mrb[71].mxu0 }
 0x399   : > { %v3493_v41 = vadd.f32 %v1819_v40, %v4756_v33  ;;  %2916 = vst [vmem:[%s4761_s17 + $0x358] sm:$0xff] %v3553_v37 }
 0x39a   : > { %2914 = vst [vmem:[%s4761_s17 + $0x348] sm:$0xff] %v3492_v38  ;;  %v2750_v42 = vpop.f32.mrb[72].mxu1 }
 0x39b   : > { %2915 = vst [vmem:[%s4761_s17 + $0x350] sm:$0xff] %v3493_v41  ;;  %v1823_v43 = vpop.f32.mrb[72].mxu0  ;;  %v3554_v44 = vadd.f32 %v2750_v42, %v4752_v31  ;;  %v2752_v46 = vpop.f32.mrb[73].mxu1 }
 0x39c   : > { %v3494_v45 = vadd.f32 %v1823_v43, %v4754_v32  ;;  %v1825_v47 = vpop.f32.mrb[73].mxu0 }
 0x39d   : > { %v3495_v48 = vadd.f32 %v1825_v47, %v4756_v33  ;;  %2919 = vst [vmem:[%s4761_s17 + $0x370] sm:$0xff] %v3554_v44 }
 0x39e   : > { %2917 = vst [vmem:[%s4761_s17 + $0x360] sm:$0xff] %v3494_v45  ;;  %v2755_v49 = vpop.f32.mrb[74].mxu1 }
 0x39f   : > { %2918 = vst [vmem:[%s4761_s17 + $0x368] sm:$0xff] %v3495_v48  ;;  %v1829_v50 = vpop.f32.mrb[74].mxu0  ;;  %v3555_v51 = vadd.f32 %v2755_v49, %v4752_v31  ;;  %v2757_v53 = vpop.f32.mrb[75].mxu1 }
 0x3a0   : > { %v3496_v52 = vadd.f32 %v1829_v50, %v4754_v32  ;;  %v1831_v54 = vpop.f32.mrb[75].mxu0 }
 0x3a1   : > { %v3497_v55 = vadd.f32 %v1831_v54, %v4756_v33  ;;  %2922 = vst [vmem:[%s4761_s17 + $0x388] sm:$0xff] %v3555_v51 }
 0x3a2   : > { %2920 = vst [vmem:[%s4761_s17 + $0x378] sm:$0xff] %v3496_v52  ;;  %v2760_v56 = vpop.f32.mrb[76].mxu1 }
 0x3a3   : > { %2921 = vst [vmem:[%s4761_s17 + $0x380] sm:$0xff] %v3497_v55  ;;  %v1835_v57 = vpop.f32.mrb[76].mxu0  ;;  %v3556_v58 = vadd.f32 %v2760_v56, %v4752_v31  ;;  %v2762_v60 = vpop.f32.mrb[77].mxu1 }
 0x3a4   : > { %v3498_v59 = vadd.f32 %v1835_v57, %v4754_v32  ;;  %v1837_v61 = vpop.f32.mrb[77].mxu0 }
 0x3a5   : > { %v3499_v62 = vadd.f32 %v1837_v61, %v4756_v33  ;;  %2925 = vst [vmem:[%s4761_s17 + $0x3a0] sm:$0xff] %v3556_v58 }
 0x3a6   : > { %2923 = vst [vmem:[%s4761_s17 + $0x390] sm:$0xff] %v3498_v59  ;;  %v2765_v0 = vpop.f32.mrb[78].mxu1 }
 0x3a7   : > { %2924 = vst [vmem:[%s4761_s17 + $0x398] sm:$0xff] %v3499_v62  ;;  %v1841_v63 = vpop.f32.mrb[78].mxu0  ;;  %v3557_v1 = vadd.f32 %v2765_v0, %v4752_v31  ;;  %v2767_v3 = vpop.f32.mrb[79].mxu1 }
 0x3a8   : > { %v3500_v2 = vadd.f32 %v1841_v63, %v4754_v32  ;;  %v1843_v4 = vpop.f32.mrb[79].mxu0 }
 0x3a9   : > { %v3501_v5 = vadd.f32 %v1843_v4, %v4756_v33  ;;  %2928 = vst [vmem:[%s4761_s17 + $0x3b8] sm:$0xff] %v3557_v1 }
 0x3aa   : > { %2926 = vst [vmem:[%s4761_s17 + $0x3a8] sm:$0xff] %v3500_v2  ;;  %v2770_v6 = vpop.f32.mrb[80].mxu1 }
 0x3ab   : > { %2927 = vst [vmem:[%s4761_s17 + $0x3b0] sm:$0xff] %v3501_v5  ;;  %v1847_v7 = vpop.f32.mrb[80].mxu0  ;;  %v3558_v8 = vadd.f32 %v2770_v6, %v4752_v31  ;;  %v2772_v10 = vpop.f32.mrb[81].mxu1 }
 0x3ac   : > { %v3502_v9 = vadd.f32 %v1847_v7, %v4754_v32  ;;  %v1849_v11 = vpop.f32.mrb[81].mxu0 }
 0x3ad   : > { %v3503_v12 = vadd.f32 %v1849_v11, %v4756_v33  ;;  %2931 = vst [vmem:[%s4761_s17 + $0x3d0] sm:$0xff] %v3558_v8 }
 0x3ae   : > { %2929 = vst [vmem:[%s4761_s17 + $0x3c0] sm:$0xff] %v3502_v9  ;;  %v2775_v13 = vpop.f32.mrb[82].mxu1 }
 0x3af   : > { %2930 = vst [vmem:[%s4761_s17 + $0x3c8] sm:$0xff] %v3503_v12  ;;  %v1853_v14 = vpop.f32.mrb[82].mxu0  ;;  %v3559_v15 = vadd.f32 %v2775_v13, %v4752_v31  ;;  %v2777_v17 = vpop.f32.mrb[83].mxu1 }
 0x3b0   : > { %v3504_v16 = vadd.f32 %v1853_v14, %v4754_v32  ;;  %v1855_v18 = vpop.f32.mrb[83].mxu0 }
 0x3b1   : > { %v3505_v19 = vadd.f32 %v1855_v18, %v4756_v33  ;;  %2934 = vst [vmem:[%s4761_s17 + $0x3e8] sm:$0xff] %v3559_v15 }
 0x3b2   : > { %2932 = vst [vmem:[%s4761_s17 + $0x3d8] sm:$0xff] %v3504_v16  ;;  %v2780_v20 = vpop.f32.mrb[84].mxu1 }
 0x3b3   : > { %2933 = vst [vmem:[%s4761_s17 + $0x3e0] sm:$0xff] %v3505_v19  ;;  %v1859_v21 = vpop.f32.mrb[84].mxu0  ;;  %v3560_v22 = vadd.f32 %v2780_v20, %v4752_v31  ;;  %v2782_v24 = vpop.f32.mrb[85].mxu1 }
 0x3b4   : > { %v3506_v23 = vadd.f32 %v1859_v21, %v4754_v32  ;;  %v1861_v25 = vpop.f32.mrb[85].mxu0 }
 0x3b5   : > { %v3507_v26 = vadd.f32 %v1861_v25, %v4756_v33  ;;  %2937 = vst [vmem:[%s4761_s17 + $0x400] sm:$0xff] %v3560_v22 }
 0x3b6   : > { %2935 = vst [vmem:[%s4761_s17 + $0x3f0] sm:$0xff] %v3506_v23  ;;  %v2785_v27 = vpop.f32.mrb[86].mxu1 }
 0x3b7   : > { %2936 = vst [vmem:[%s4761_s17 + $0x3f8] sm:$0xff] %v3507_v26  ;;  %v1865_v28 = vpop.f32.mrb[86].mxu0  ;;  %v3561_v29 = vadd.f32 %v2785_v27, %v4752_v31  ;;  %v2787_v34 = vpop.f32.mrb[87].mxu1 }
 0x3b8   : > { %v3508_v30 = vadd.f32 %v1865_v28, %v4754_v32  ;;  %v1867_v35 = vpop.f32.mrb[87].mxu0 }
 0x3b9   : > { %v3509_v36 = vadd.f32 %v1867_v35, %v4756_v33  ;;  %2940 = vst [vmem:[%s4761_s17 + $0x418] sm:$0xff] %v3561_v29 }
 0x3ba   : > { %2938 = vst [vmem:[%s4761_s17 + $0x408] sm:$0xff] %v3508_v30  ;;  %v2790_v37 = vpop.f32.mrb[88].mxu1 }
 0x3bb   : > { %2939 = vst [vmem:[%s4761_s17 + $0x410] sm:$0xff] %v3509_v36  ;;  %v1871_v38 = vpop.f32.mrb[88].mxu0  ;;  %v3562_v39 = vadd.f32 %v2790_v37, %v4752_v31  ;;  %v2792_v41 = vpop.f32.mrb[89].mxu1 }
 0x3bc   : > { %v3510_v40 = vadd.f32 %v1871_v38, %v4754_v32  ;;  %v1873_v42 = vpop.f32.mrb[89].mxu0 }
 0x3bd   : > { %v3511_v43 = vadd.f32 %v1873_v42, %v4756_v33  ;;  %2943 = vst [vmem:[%s4761_s17 + $0x430] sm:$0xff] %v3562_v39 }
 0x3be   : > { %2941 = vst [vmem:[%s4761_s17 + $0x420] sm:$0xff] %v3510_v40  ;;  %v2795_v44 = vpop.f32.mrb[90].mxu1 }
 0x3bf   : > { %2942 = vst [vmem:[%s4761_s17 + $0x428] sm:$0xff] %v3511_v43  ;;  %v1877_v45 = vpop.f32.mrb[90].mxu0  ;;  %v3563_v46 = vadd.f32 %v2795_v44, %v4752_v31  ;;  %v2797_v48 = vpop.f32.mrb[91].mxu1 }
 0x3c0   : > { %v3512_v47 = vadd.f32 %v1877_v45, %v4754_v32  ;;  %v1879_v49 = vpop.f32.mrb[91].mxu0 }
 0x3c1   : > { %v3513_v50 = vadd.f32 %v1879_v49, %v4756_v33  ;;  %2946 = vst [vmem:[%s4761_s17 + $0x448] sm:$0xff] %v3563_v46 }
 0x3c2   : > { %2944 = vst [vmem:[%s4761_s17 + $0x438] sm:$0xff] %v3512_v47  ;;  %v2800_v51 = vpop.f32.mrb[92].mxu1 }
 0x3c3   : > { %2945 = vst [vmem:[%s4761_s17 + $0x440] sm:$0xff] %v3513_v50  ;;  %v1883_v52 = vpop.f32.mrb[92].mxu0  ;;  %v3564_v53 = vadd.f32 %v2800_v51, %v4752_v31  ;;  %v2802_v55 = vpop.f32.mrb[93].mxu1 }
 0x3c4   : > { %v3514_v54 = vadd.f32 %v1883_v52, %v4754_v32  ;;  %v1885_v56 = vpop.f32.mrb[93].mxu0 }
 0x3c5   : > { %v3515_v57 = vadd.f32 %v1885_v56, %v4756_v33  ;;  %2949 = vst [vmem:[%s4761_s17 + $0x460] sm:$0xff] %v3564_v53 }
 0x3c6   : > { %2947 = vst [vmem:[%s4761_s17 + $0x450] sm:$0xff] %v3514_v54  ;;  %v2805_v58 = vpop.f32.mrb[94].mxu1 }
 0x3c7   : > { %2948 = vst [vmem:[%s4761_s17 + $0x458] sm:$0xff] %v3515_v57  ;;  %v1889_v59 = vpop.f32.mrb[94].mxu0  ;;  %v3565_v60 = vadd.f32 %v2805_v58, %v4752_v31  ;;  %v2807_v62 = vpop.f32.mrb[95].mxu1 }
 0x3c8   : > { %v3516_v61 = vadd.f32 %v1889_v59, %v4754_v32  ;;  %v1891_v0 = vpop.f32.mrb[95].mxu0 }
 0x3c9   : > { %v3517_v63 = vadd.f32 %v1891_v0, %v4756_v33  ;;  %2952 = vst [vmem:[%s4761_s17 + $0x478] sm:$0xff] %v3565_v60 }
 0x3ca   : > { %2950 = vst [vmem:[%s4761_s17 + $0x468] sm:$0xff] %v3516_v61 }
 0x3cb   : > { %2951 = vst [vmem:[%s4761_s17 + $0x470] sm:$0xff] %v3517_v63 }
 0x3cc   : > { %4126 = shalt.err (!%p4123_p6)
}
 0x3cd   : > { %s4127_s18 = scalar_lea.hbm %s5047_s10, 18432  ;;  %s4131_s21 = scalar_lea.hbm %s5102_s3, 36864 }
 0x3ce   : > { %p4128_p9 = scmp.ne.s32.totalorder %s5047_s10, %s4127_s18  ;;  %p4132_p3 = scmp.lt.u32.totalorder %s5047_s10, %s5102_s3 }
 0x3cf   : > { %p4133_p1 = scmp.lt.u32.totalorder %s4131_s21, %s4127_s18  ;;  %p4135_p2 = scmp.lt.u32.totalorder %s4127_s18, %s5047_s10 }
 0x3d0   : > { %p4129_p12 = pnand %p4128_p9, %p5125_p4 }
 0x3d1   : > { %p4134_p10 = por %p4133_p1, %p4132_p3 }
 0x3d2   : > { %p4130_p7 = pneg %p4129_p12 }
 0x3d3   : > { %p4136_p0 = por %p4135_p2, %p4134_p10 }
 0x3d5   : > { %p4137_p11 = pnand %p4136_p0, %p4130_p7 }
 0x3d7   : > { %4140 = shalt.err (!%p4137_p11)
}
 0x3d8   : > { %s4194_s4 = smov 384   ;;  %s4195_s17 = smov 768  }
 0x3d9   : > { %s4196_s22 = smov 24  }
 0x3da   : > { %3963 = dma.vmem_to_hbm [thread:$0]  (%p5125_p4), %s5051_s9, 18432, %s5047_s10, %s2954_s11, %s4194_s4, %s4195_s17, %s4196_s22  }
 0x3db PF: > { %s2982_s25 = sand.u32 1, %s4171_s12   ;;  %p5126_p13 = scmp.ne.s32.totalorder %s5114_s29, 0 }
 0x3dc   : > { %p5127_p8 = scmp.ge.s32.totalorder %s4183_s15, 2  ;;  %s2983_s5 = scalar_lea.sflag [#allocation4], %s2982_s25 }
 0x3de   : > { %p3977_p5 = pnand %p5127_p8, %p5126_p13 }
 0x3e0   : > { %4166 = dma.done.wait (!%p3977_p5), %s2983_s5, 18432  }
 0x3e1   : > { %4168 = vsyncadd (!%p3977_p5), %s2983_s5, 4294948864  ;;  %p17_p6 = scmp.ge.s32.totalorder %s4238_s16, 4   ;;  %s5128_s12 = smov %s4175_s13 }
 0x3e2   : > { %s5129_s13 = smov %s4179_s14  ;;  %s5130_s14 = smov %s4248_s19 }
 0x3e3   : > { %s5131_s15 = smov %s4238_s16  ;;  %19 = sbr.rel (!%p17_p6) target bundleno = 6 (0x6), region = 93 }
 0x3ea   :  { %2988 = vsyncpa [#allocation3], 1 }
 0x3eb   :  { %2990 = vsyncpa [#allocation3 + $0x1], 1 }
 0x3ec   :  { %2991 = vsyncpa [#allocation6], 1 }
 0x3ed   :  { %2993 = vsyncpa [#allocation6 + $0x1], 1 }
 0x3ee   :  { %2994 = vsyncpa [#allocation4], 1 }
 0x3ef   :  { %2996 = vsyncpa [#allocation4 + $0x1], 1 }

</bundles_post_ra>
